<compile_context>
chip_gen: v7x
topology: tpu7x:2x2x1
jax: 0.10.0
libtpu: 0.0.40
codegen_flags: <defaults>
</compile_context>

<pallas_src>
import jax
import jax.numpy as jnp
from jax.experimental import pallas as pl
from jax.experimental.pallas import tpu as pltpu


# ----------------------------- Pallas kernels ------------------------------

def _bneck_1x1_kernel(x_ref, s1_ref, b1_ref, w1_ref, s2_ref, b2_ref, o_ref):
    """relu(bn2(relu(bn1(x)) @ W1)), BN math in f32, MXU operands bf16."""
    a1 = jnp.maximum(x_ref[...] * s1_ref[...] + b1_ref[...], 0.0)
    h = jnp.dot(a1.astype(jnp.bfloat16), w1_ref[...],
                preferred_element_type=jnp.float32)
    a2 = jnp.maximum(h * s2_ref[...] + b2_ref[...], 0.0)
    o_ref[...] = a2.astype(o_ref.dtype)


def _conv3x3_kernel(a_ref, w_ref, o_ref):
    """3x3 conv (pad=1) as shifted matmuls over one image's padded tile.

    a_ref: (1, H+2, W+2, C) bf16 activation with a zero spatial border.
    w_ref: (3, 3*C, G) bf16; row block dy holds [dx=0 | dx=1 | dx=2] weights.
    o_ref: (1, H, W, G) f32.

    For each output row the three dx-shifted slices are lane-concatenated so
    the 9 taps collapse into 3 matmuls of K = 3*C.
    """
    H, W, G = o_ref.shape[1], o_ref.shape[2], o_ref.shape[3]
    w_rows = [w_ref[dy] for dy in range(3)]                  # (3*C, G) each
    rows = [a_ref[0, r, :, :] for r in range(H + 2)]         # (W+2, C) each
    for y in range(H):                                       # static unroll (small H)
        acc = jnp.zeros((W, G), jnp.float32)
        for dy in range(3):
            r = rows[y + dy]
            lhs = jnp.concatenate(
                [r[0:W, :], r[1:W + 1, :], r[2:W + 2, :]], axis=1)   # (W, 3*C)
            acc = acc + jnp.dot(lhs, w_rows[dy],
                                preferred_element_type=jnp.float32)
        o_ref[0, y, :, :] = acc


def _bn_relu_matmul_kernel(x_ref, s_ref, b_ref, w_ref, o_ref):
    """Transition: relu(bn(x)) @ W (1x1 conv), bf16 MXU operands."""
    a = jnp.maximum(x_ref[...] * s_ref[...] + b_ref[...], 0.0)
    o_ref[...] = jnp.dot(a.astype(jnp.bfloat16), w_ref[...],
                         preferred_element_type=jnp.float32)


def _bn_relu_kernel(x_ref, s_ref, b_ref, o_ref):
    o_ref[...] = jnp.maximum(x_ref[...] * s_ref[...] + b_ref[...], 0.0)


_CP1 = pltpu.CompilerParams(dimension_semantics=("parallel",))


def _pick_tile(m):
    # Largest tile dividing M while keeping >=2 grid steps (feeds both v7x
    # TensorCores); fall back to the largest divisor, then to full M.
    for t in (512, 256, 128, 64, 32, 16, 8):
        if m % t == 0 and m // t >= 2:
            return t
    for t in (512, 256, 128, 64, 32, 16, 8):
        if m % t == 0:
            return t
    return m


# ----------------------------- Pallas wrappers ------------------------------

def pallas_bneck_1x1(x, s1, b1, w1, s2, b2):
    M, K = x.shape
    C4 = w1.shape[1]
    TM = _pick_tile(M)
    return pl.pallas_call(
        _bneck_1x1_kernel,
        out_shape=jax.ShapeDtypeStruct((M, C4), jnp.bfloat16),
        grid=(M // TM,),
        in_specs=[pl.BlockSpec((TM, K), lambda i: (i, 0)),
                  pl.BlockSpec((1, K), lambda i: (0, 0)),
                  pl.BlockSpec((1, K), lambda i: (0, 0)),
                  pl.BlockSpec((K, C4), lambda i: (0, 0)),
                  pl.BlockSpec((1, C4), lambda i: (0, 0)),
                  pl.BlockSpec((1, C4), lambda i: (0, 0))],
        out_specs=pl.BlockSpec((TM, C4), lambda i: (i, 0)),
        compiler_params=_CP1,
    )(x, s1, b1, w1, s2, b2)


def pallas_conv3x3(a_pad, w2):
    N, Hp, Wp, C = a_pad.shape
    H, W = Hp - 2, Wp - 2
    G = w2.shape[-1]
    return pl.pallas_call(
        _conv3x3_kernel,
        out_shape=jax.ShapeDtypeStruct((N, H, W, G), jnp.float32),
        grid=(N,),
        in_specs=[pl.BlockSpec((1, Hp, Wp, C), lambda n: (n, 0, 0, 0)),
                  pl.BlockSpec((3, 3 * C, G), lambda n: (0, 0, 0))],
        out_specs=pl.BlockSpec((1, H, W, G), lambda n: (n, 0, 0, 0)),
        compiler_params=_CP1,
    )(a_pad, w2)


def pallas_bn_relu_matmul(x2d, scale, shift, w):
    M, K = x2d.shape
    Nc = w.shape[1]
    TM = _pick_tile(M)
    return pl.pallas_call(
        _bn_relu_matmul_kernel,
        out_shape=jax.ShapeDtypeStruct((M, Nc), jnp.float32),
        grid=(M // TM,),
        in_specs=[pl.BlockSpec((TM, K), lambda i: (i, 0)),
                  pl.BlockSpec((1, K), lambda i: (0, 0)),
                  pl.BlockSpec((1, K), lambda i: (0, 0)),
                  pl.BlockSpec((K, Nc), lambda i: (0, 0))],
        out_specs=pl.BlockSpec((TM, Nc), lambda i: (i, 0)),
        compiler_params=_CP1,
    )(x2d, scale, shift, w)


def pallas_bn_relu(x2d, scale, shift):
    M, C = x2d.shape
    TM = _pick_tile(M)
    return pl.pallas_call(
        _bn_relu_kernel,
        out_shape=jax.ShapeDtypeStruct((M, C), jnp.float32),
        grid=(M // TM,),
        in_specs=[pl.BlockSpec((TM, C), lambda i: (i, 0)),
                  pl.BlockSpec((1, C), lambda i: (0, 0)),
                  pl.BlockSpec((1, C), lambda i: (0, 0))],
        out_specs=pl.BlockSpec((TM, C), lambda i: (i, 0)),
        compiler_params=_CP1,
    )(x2d, scale, shift)


# ------------------------------ JAX glue ops --------------------------------

def maxpool_3x3_s2_p1(x):
    # NHWC, matches nn.MaxPool2d(kernel_size=3, stride=2, padding=1).
    return jax.lax.reduce_window(
        x, -jnp.inf, jax.lax.max,
        window_dimensions=(1, 3, 3, 1),
        window_strides=(1, 2, 2, 1),
        padding=((0, 0), (1, 1), (1, 1), (0, 0)))


def avgpool_2x2(x):
    N, H, W, C = x.shape
    return x.reshape(N, H // 2, 2, W // 2, 2, C).mean(axis=(2, 4))


# ------------------------------- parameters ---------------------------------

def make_params(key, num_classes, growth_rate, block_config):
    keys = iter(jax.random.split(key, 4096))

    def nk():
        return next(keys)

    def bn(c):
        gamma = 1.0 + 0.1 * jax.random.normal(nk(), (c,), jnp.float32)
        beta = 0.1 * jax.random.normal(nk(), (c,), jnp.float32)
        mean = jnp.zeros((c,), jnp.float32)   # running stats (fresh init, eval)
        var = jnp.ones((c,), jnp.float32)
        eps = 1e-5
        scale = gamma / jnp.sqrt(var + eps)
        shift = beta - mean * scale
        return scale, shift

    g = growth_rate
    c0 = 2 * g
    params = {}

    # Stem 7x7 conv (bias=False) with BN1 folded into the weights:
    #   bn(conv(x, W)) = conv(x, W * scale) + shift.
    w_stem = jax.random.normal(nk(), (7, 7, 3, c0), jnp.float32) * 0.1
    s, b = bn(c0)
    params["conv1_w"] = w_stem * s[None, None, None, :]
    params["conv1_shift"] = b

    c = c0
    for bi, nl in enumerate(block_config):
        cfin = c + nl * g
        layers = []
        cl = c
        for _ in range(nl):
            s1, b1 = bn(cl)
            # Pad BN1 / W1 to the block's final width; not-yet-written
            # channels of the feature buffer are zero and the extra W1 rows
            # are zero, so they contribute nothing.
            s1p = jnp.ones((cfin,), jnp.float32).at[:cl].set(s1).reshape(1, cfin)
            b1p = jnp.zeros((cfin,), jnp.float32).at[:cl].set(b1).reshape(1, cfin)
            w1 = jax.random.normal(nk(), (cl, 4 * g), jnp.float32) * 0.1
            w1p = jnp.zeros((cfin, 4 * g), jnp.float32).at[:cl].set(w1)
            s2, b2 = bn(4 * g)
            # conv2 stored as (ky, kx*cin, cout): for each ky the three kx
            # weight slabs sit side by side, matching the in-kernel lane
            # concatenation of the dx-shifted activation slices.
            w2 = jax.random.normal(nk(), (3, 3, 4 * g, g), jnp.float32) * 0.1
            layers.append({
                "bn1": (s1p, b1p),
                "conv1": w1p.astype(jnp.bfloat16),
                "bn2": (s2.reshape(1, -1), b2.reshape(1, -1)),
                "conv2": w2.reshape(3, 3 * 4 * g, g).astype(jnp.bfloat16),
            })
            cl += g
        params[f"dense{bi + 1}"] = layers
        c = cfin
        if bi < len(block_config) - 1:
            s, b = bn(c)
            wt = jax.random.normal(nk(), (c, c // 2), jnp.float32) * 0.1
            params[f"trans{bi + 1}"] = {
                "bn": (s.reshape(1, -1), b.reshape(1, -1)),
                "conv": wt.astype(jnp.bfloat16),
            }
            c = c // 2

    s, b = bn(c)
    params["bn2"] = (s.reshape(1, -1), b.reshape(1, -1))
    params["fc_w"] = jax.random.normal(nk(), (c, num_classes), jnp.float32) * 0.1
    params["fc_b"] = 0.1 * jax.random.normal(nk(), (num_classes,), jnp.float32)
    return params


# ------------------------------- forward pass --------------------------------

def dense_block_forward(x, layers):
    """One dense block; single full-width feature buffer, no per-layer concat."""
    N, H, W, Cin = x.shape
    M = N * H * W
    g = layers[0]["conv2"].shape[-1]
    Cfin = layers[0]["conv1"].shape[0]        # W1 rows are padded to final width
    buf = jnp.zeros((M, Cfin), jnp.float32)
    buf = buf.at[:, :Cin].set(x.reshape(M, Cin))
    off = Cin
    for p in layers:
        s1, b1 = p["bn1"]
        s2, b2 = p["bn2"]
        # bn1 + relu + 1x1 conv + bn2 + relu, fused (bf16 out for the 3x3).
        a2 = pallas_bneck_1x1(buf, s1, b1, p["conv1"], s2, b2)     # (M, 4g)
        a2p = jnp.pad(a2.reshape(N, H, W, -1),
                      ((0, 0), (1, 1), (1, 1), (0, 0)))            # zero border
        feat = pallas_conv3x3(a2p, p["conv2"])                     # (N,H,W,g) f32
        # dropout: identity (eval mode)
        buf = buf.at[:, off:off + g].set(feat.reshape(M, g))
        off += g
    return buf.reshape(N, H, W, Cfin)


def transition_forward(x, p):
    N, H, W, C = x.shape
    s, b = p["bn"]
    h = pallas_bn_relu_matmul(x.reshape(N * H * W, C), s, b, p["conv"])
    h = h.reshape(N, H, W, -1)
    # dropout: identity (eval mode)
    return avgpool_2x2(h)


@jax.jit
def densenet_forward(params, x_nchw):
    x = jnp.transpose(x_nchw, (0, 2, 3, 1)).astype(jnp.float32)    # -> NHWC
    # Stem: 7x7 s2 p3 conv (BN folded into weights) + ReLU + maxpool, XLA glue.
    x = jax.lax.conv_general_dilated(
        x, params["conv1_w"], window_strides=(2, 2),
        padding=((3, 3), (3, 3)),
        dimension_numbers=("NHWC", "HWIO", "NHWC"))
    x = jnp.maximum(x + params["conv1_shift"], 0.0)
    x = maxpool_3x3_s2_p1(x)

    num_blocks = len([k for k in params if k.startswith("dense")])
    for bi in range(num_blocks):
        x = dense_block_forward(x, params[f"dense{bi + 1}"])
        if bi < num_blocks - 1:
            x = transition_forward(x, params[f"trans{bi + 1}"])

    # Final bn + relu (Pallas), global average pool + FC (XLA; tiny shapes).
    N, H, W, C = x.shape
    x = pallas_bn_relu(x.reshape(N * H * W, C),
                       params["bn2"][0], params["bn2"][1]).reshape(N, H, W, C)
    x = x.mean(axis=(1, 2))                                        # (N, C)
    logits = x @ params["fc_w"] + params["fc_b"]
    return logits


# ---------------------------------- main -------------------------------------

if __name__ == "__main__":
    # Small but structurally faithful configuration (4 dense blocks, 3
    # transitions).  32x32 input keeps every stage's spatial size >= 1.
    num_classes = 10
    growth_rate = 8
    block_config = (2, 2, 2, 2)

    key = jax.random.PRNGKey(0)
    pkey, xkey = jax.random.split(key)
    params = make_params(pkey, num_classes, growth_rate, block_config)

    # Input consistent with the module: NCHW, 3 channels.
    x = jax.random.normal(xkey, (2, 3, 32, 32), jnp.float32)

    logits = densenet_forward(params, x)
    logits = jax.block_until_ready(logits)
    assert logits.shape == (2, num_classes)
    assert bool(jnp.all(jnp.isfinite(logits)))
    print("KERNEL_OK")
</pallas_src>

<mosaic_0001>
module attributes {stable_mosaic.version = 11 : i64} {
  func.func @_bneck_1x1_kernel(%arg0: i32, %arg1: memref<64x32xf32, #tpu.memory_space<vmem>>, %arg2: memref<1x32xf32, #tpu.memory_space<vmem>>, %arg3: memref<1x32xf32, #tpu.memory_space<vmem>>, %arg4: memref<32x32xbf16, #tpu.memory_space<vmem>>, %arg5: memref<1x32xf32, #tpu.memory_space<vmem>>, %arg6: memref<1x32xf32, #tpu.memory_space<vmem>>, %arg7: memref<64x32xbf16, #tpu.memory_space<vmem>>) attributes {dimension_semantics = [#tpu.dimension_semantics<parallel>], iteration_bounds = array<i64: 2>, scalar_prefetch = 0 : i64, scratch_operands = 0 : i64, tpu.core_type = #tpu.core_type<tc>, window_params = [{transform_indices = @transform_0, window_bounds = array<i64: 64, 32>}, {pipeline_mode = #tpu.pipeline_mode<synchronous>, transform_indices = @transform_1, window_bounds = array<i64: 1, 32>}, {pipeline_mode = #tpu.pipeline_mode<synchronous>, transform_indices = @transform_2, window_bounds = array<i64: 1, 32>}, {pipeline_mode = #tpu.pipeline_mode<synchronous>, transform_indices = @transform_3, window_bounds = array<i64: 32, 32>}, {pipeline_mode = #tpu.pipeline_mode<synchronous>, transform_indices = @transform_4, window_bounds = array<i64: 1, 32>}, {pipeline_mode = #tpu.pipeline_mode<synchronous>, transform_indices = @transform_5, window_bounds = array<i64: 1, 32>}, {transform_indices = @transform_6, window_bounds = array<i64: 64, 32>}]} {
    %c0 = arith.constant 0 : index
    %c0_0 = arith.constant 0 : index
    %0 = vector.load %arg1[%c0, %c0_0] : memref<64x32xf32, #tpu.memory_space<vmem>>, vector<64x32xf32>
    %c0_1 = arith.constant 0 : index
    %c0_2 = arith.constant 0 : index
    %1 = vector.load %arg2[%c0_1, %c0_2] : memref<1x32xf32, #tpu.memory_space<vmem>>, vector<1x32xf32>
    %2 = vector.broadcast %1 : vector<1x32xf32> to vector<64x32xf32>
    %3 = arith.mulf %0, %2 : vector<64x32xf32>
    %c0_3 = arith.constant 0 : index
    %c0_4 = arith.constant 0 : index
    %4 = vector.load %arg3[%c0_3, %c0_4] : memref<1x32xf32, #tpu.memory_space<vmem>>, vector<1x32xf32>
    %5 = vector.broadcast %4 : vector<1x32xf32> to vector<64x32xf32>
    %6 = arith.addf %3, %5 : vector<64x32xf32>
    %cst = arith.constant 0.000000e+00 : f32
    %7 = vector.broadcast %cst : f32 to vector<64x32xf32>
    %8 = arith.maximumf %6, %7 : vector<64x32xf32>
    %9 = arith.truncf %8 : vector<64x32xf32> to vector<64x32xbf16>
    %c0_5 = arith.constant 0 : index
    %c0_6 = arith.constant 0 : index
    %10 = vector.load %arg4[%c0_5, %c0_6] : memref<32x32xbf16, #tpu.memory_space<vmem>>, vector<32x32xbf16>
    %cst_7 = arith.constant dense<0.000000e+00> : vector<64x32xf32>
    %11 = tpu.matmul %9, %10, %cst_7 {dimension_numbers = #tpu.dot_dimension_numbers<[1], [0], [0], [1], [0, 0, 1, 1], [], []>} : vector<64x32xbf16>, vector<32x32xbf16>, vector<64x32xf32> -> vector<64x32xf32>
    %c0_8 = arith.constant 0 : index
    %c0_9 = arith.constant 0 : index
    %12 = vector.load %arg5[%c0_8, %c0_9] : memref<1x32xf32, #tpu.memory_space<vmem>>, vector<1x32xf32>
    %13 = vector.broadcast %12 : vector<1x32xf32> to vector<64x32xf32>
    %14 = arith.mulf %11, %13 : vector<64x32xf32>
    %c0_10 = arith.constant 0 : index
    %c0_11 = arith.constant 0 : index
    %15 = vector.load %arg6[%c0_10, %c0_11] : memref<1x32xf32, #tpu.memory_space<vmem>>, vector<1x32xf32>
    %16 = vector.broadcast %15 : vector<1x32xf32> to vector<64x32xf32>
    %17 = arith.addf %14, %16 : vector<64x32xf32>
    %cst_12 = arith.constant 0.000000e+00 : f32
    %18 = vector.broadcast %cst_12 : f32 to vector<64x32xf32>
    %19 = arith.maximumf %17, %18 : vector<64x32xf32>
    %20 = arith.truncf %19 : vector<64x32xf32> to vector<64x32xbf16>
    %c0_13 = arith.constant 0 : index
    %c0_14 = arith.constant 0 : index
    %21 = vector.load %arg7[%c0_13, %c0_14] : memref<64x32xbf16, #tpu.memory_space<vmem>>, vector<64x32xbf16>
    tpu.vector_store %arg7[%c0_13, %c0_14], %20 {strides = array<i32>} : memref<64x32xbf16, #tpu.memory_space<vmem>>, vector<64x32xbf16>,
    return
  }
  func.func @transform_0(%arg0: i32) -> (i32, i32) {
    %c0_i32 = arith.constant 0 : i32
    %c0_i32_0 = arith.constant 0 : i32
    return %arg0, %c0_i32 : i32, i32
  }
  func.func @transform_1(%arg0: i32) -> (i32, i32) {
    %c0_i32 = arith.constant 0 : i32
    %c0_i32_0 = arith.constant 0 : i32
    %c0_i32_1 = arith.constant 0 : i32
    return %c0_i32, %c0_i32_0 : i32, i32
  }
  func.func @transform_2(%arg0: i32) -> (i32, i32) {
    %c0_i32 = arith.constant 0 : i32
    %c0_i32_0 = arith.constant 0 : i32
    %c0_i32_1 = arith.constant 0 : i32
    return %c0_i32, %c0_i32_0 : i32, i32
  }
  func.func @transform_3(%arg0: i32) -> (i32, i32) {
    %c0_i32 = arith.constant 0 : i32
    %c0_i32_0 = arith.constant 0 : i32
    %c0_i32_1 = arith.constant 0 : i32
    return %c0_i32, %c0_i32_0 : i32, i32
  }
  func.func @transform_4(%arg0: i32) -> (i32, i32) {
    %c0_i32 = arith.constant 0 : i32
    %c0_i32_0 = arith.constant 0 : i32
    %c0_i32_1 = arith.constant 0 : i32
    return %c0_i32, %c0_i32_0 : i32, i32
  }
  func.func @transform_5(%arg0: i32) -> (i32, i32) {
    %c0_i32 = arith.constant 0 : i32
    %c0_i32_0 = arith.constant 0 : i32
    %c0_i32_1 = arith.constant 0 : i32
    return %c0_i32, %c0_i32_0 : i32, i32
  }
  func.func @transform_6(%arg0: i32) -> (i32, i32) {
    %c0_i32 = arith.constant 0 : i32
    %c0_i32_0 = arith.constant 0 : i32
    return %arg0, %c0_i32 : i32, i32
  }
}

module attributes {stable_mosaic.version = 11 : i64} {
  func.func @_conv3x3_kernel(%arg0: i32, %arg1: memref<1x10x10x32xbf16, #tpu.memory_space<vmem>>, %arg2: memref<3x96x8xbf16, #tpu.memory_space<vmem>>, %arg3: memref<1x8x8x8xf32, #tpu.memory_space<vmem>>) attributes {dimension_semantics = [#tpu.dimension_semantics<parallel>], iteration_bounds = array<i64: 2>, scalar_prefetch = 0 : i64, scratch_operands = 0 : i64, tpu.core_type = #tpu.core_type<tc>, window_params = [{transform_indices = @transform_0, window_bounds = array<i64: 1, 10, 10, 32>}, {pipeline_mode = #tpu.pipeline_mode<synchronous>, transform_indices = @transform_1, window_bounds = array<i64: 3, 96, 8>}, {transform_indices = @transform_2, window_bounds = array<i64: 1, 8, 8, 8>}]} {
    %c0 = arith.constant 0 : index
    %c0_0 = arith.constant 0 : index
    %c0_1 = arith.constant 0 : index
    %0 = vector.load %arg2[%c0, %c0_0, %c0_1] : memref<3x96x8xbf16, #tpu.memory_space<vmem>>, vector<1x96x8xbf16>
    %1 = vector.shape_cast %0 : vector<1x96x8xbf16> to vector<96x8xbf16>
    %c1 = arith.constant 1 : index
    %c0_2 = arith.constant 0 : index
    %c0_3 = arith.constant 0 : index
    %2 = vector.load %arg2[%c1, %c0_2, %c0_3] : memref<3x96x8xbf16, #tpu.memory_space<vmem>>, vector<1x96x8xbf16>
    %3 = vector.shape_cast %2 : vector<1x96x8xbf16> to vector<96x8xbf16>
    %c2 = arith.constant 2 : index
    %c0_4 = arith.constant 0 : index
    %c0_5 = arith.constant 0 : index
    %4 = vector.load %arg2[%c2, %c0_4, %c0_5] : memref<3x96x8xbf16, #tpu.memory_space<vmem>>, vector<1x96x8xbf16>
    %5 = vector.shape_cast %4 : vector<1x96x8xbf16> to vector<96x8xbf16>
    %c0_6 = arith.constant 0 : index
    %c0_7 = arith.constant 0 : index
    %c0_8 = arith.constant 0 : index
    %c0_9 = arith.constant 0 : index
    %6 = vector.load %arg1[%c0_6, %c0_7, %c0_8, %c0_9] : memref<1x10x10x32xbf16, #tpu.memory_space<vmem>>, vector<1x1x10x32xbf16>
    %7 = vector.shape_cast %6 : vector<1x1x10x32xbf16> to vector<10x32xbf16>
    %c0_10 = arith.constant 0 : index
    %c1_11 = arith.constant 1 : index
    %c0_12 = arith.constant 0 : index
    %c0_13 = arith.constant 0 : index
    %8 = vector.load %arg1[%c0_10, %c1_11, %c0_12, %c0_13] : memref<1x10x10x32xbf16, #tpu.memory_space<vmem>>, vector<1x1x10x32xbf16>
    %9 = vector.shape_cast %8 : vector<1x1x10x32xbf16> to vector<10x32xbf16>
    %c0_14 = arith.constant 0 : index
    %c2_15 = arith.constant 2 : index
    %c0_16 = arith.constant 0 : index
    %c0_17 = arith.constant 0 : index
    %10 = vector.load %arg1[%c0_14, %c2_15, %c0_16, %c0_17] : memref<1x10x10x32xbf16, #tpu.memory_space<vmem>>, vector<1x1x10x32xbf16>
    %11 = vector.shape_cast %10 : vector<1x1x10x32xbf16> to vector<10x32xbf16>
    %c0_18 = arith.constant 0 : index
    %c3 = arith.constant 3 : index
    %c0_19 = arith.constant 0 : index
    %c0_20 = arith.constant 0 : index
    %12 = vector.load %arg1[%c0_18, %c3, %c0_19, %c0_20] : memref<1x10x10x32xbf16, #tpu.memory_space<vmem>>, vector<1x1x10x32xbf16>
    %13 = vector.shape_cast %12 : vector<1x1x10x32xbf16> to vector<10x32xbf16>
    %c0_21 = arith.constant 0 : index
    %c4 = arith.constant 4 : index
    %c0_22 = arith.constant 0 : index
    %c0_23 = arith.constant 0 : index
    %14 = vector.load %arg1[%c0_21, %c4, %c0_22, %c0_23] : memref<1x10x10x32xbf16, #tpu.memory_space<vmem>>, vector<1x1x10x32xbf16>
    %15 = vector.shape_cast %14 : vector<1x1x10x32xbf16> to vector<10x32xbf16>
    %c0_24 = arith.constant 0 : index
    %c5 = arith.constant 5 : index
    %c0_25 = arith.constant 0 : index
    %c0_26 = arith.constant 0 : index
    %16 = vector.load %arg1[%c0_24, %c5, %c0_25, %c0_26] : memref<1x10x10x32xbf16, #tpu.memory_space<vmem>>, vector<1x1x10x32xbf16>
    %17 = vector.shape_cast %16 : vector<1x1x10x32xbf16> to vector<10x32xbf16>
    %c0_27 = arith.constant 0 : index
    %c6 = arith.constant 6 : index
    %c0_28 = arith.constant 0 : index
    %c0_29 = arith.constant 0 : index
    %18 = vector.load %arg1[%c0_27, %c6, %c0_28, %c0_29] : memref<1x10x10x32xbf16, #tpu.memory_space<vmem>>, vector<1x1x10x32xbf16>
    %19 = vector.shape_cast %18 : vector<1x1x10x32xbf16> to vector<10x32xbf16>
    %c0_30 = arith.constant 0 : index
    %c7 = arith.constant 7 : index
    %c0_31 = arith.constant 0 : index
    %c0_32 = arith.constant 0 : index
    %20 = vector.load %arg1[%c0_30, %c7, %c0_31, %c0_32] : memref<1x10x10x32xbf16, #tpu.memory_space<vmem>>, vector<1x1x10x32xbf16>
    %21 = vector.shape_cast %20 : vector<1x1x10x32xbf16> to vector<10x32xbf16>
    %c0_33 = arith.constant 0 : index
    %c8 = arith.constant 8 : index
    %c0_34 = arith.constant 0 : index
    %c0_35 = arith.constant 0 : index
    %22 = vector.load %arg1[%c0_33, %c8, %c0_34, %c0_35] : memref<1x10x10x32xbf16, #tpu.memory_space<vmem>>, vector<1x1x10x32xbf16>
    %23 = vector.shape_cast %22 : vector<1x1x10x32xbf16> to vector<10x32xbf16>
    %c0_36 = arith.constant 0 : index
    %c9 = arith.constant 9 : index
    %c0_37 = arith.constant 0 : index
    %c0_38 = arith.constant 0 : index
    %24 = vector.load %arg1[%c0_36, %c9, %c0_37, %c0_38] : memref<1x10x10x32xbf16, #tpu.memory_space<vmem>>, vector<1x1x10x32xbf16>
    %25 = vector.shape_cast %24 : vector<1x1x10x32xbf16> to vector<10x32xbf16>
    %cst = arith.constant 0.000000e+00 : f32
    %26 = vector.broadcast %cst : f32 to vector<8x8xf32>
    %27 = vector.extract_strided_slice %7 {offsets = [0, 0], sizes = [8, 32], strides = [1, 1]} : vector<10x32xbf16> to vector<8x32xbf16>
    %28 = vector.extract_strided_slice %7 {offsets = [1, 0], sizes = [8, 32], strides = [1, 1]} : vector<10x32xbf16> to vector<8x32xbf16>
    %29 = vector.extract_strided_slice %7 {offsets = [2, 0], sizes = [8, 32], strides = [1, 1]} : vector<10x32xbf16> to vector<8x32xbf16>
    %30 = tpu.concatenate %27, %28, %29 in 1 : vector<8x32xbf16>, vector<8x32xbf16>, vector<8x32xbf16> -> vector<8x96xbf16>
    %cst_39 = arith.constant dense<0.000000e+00> : vector<8x8xf32>
    %31 = tpu.matmul %30, %1, %cst_39 {dimension_numbers = #tpu.dot_dimension_numbers<[1], [0], [0], [1], [0, 0, 1, 1], [], []>} : vector<8x96xbf16>, vector<96x8xbf16>, vector<8x8xf32> -> vector<8x8xf32>
    %32 = arith.addf %26, %31 : vector<8x8xf32>
    %33 = vector.extract_strided_slice %9 {offsets = [0, 0], sizes = [8, 32], strides = [1, 1]} : vector<10x32xbf16> to vector<8x32xbf16>
    %34 = vector.extract_strided_slice %9 {offsets = [1, 0], sizes = [8, 32], strides = [1, 1]} : vector<10x32xbf16> to vector<8x32xbf16>
    %35 = vector.extract_strided_slice %9 {offsets = [2, 0], sizes = [8, 32], strides = [1, 1]} : vector<10x32xbf16> to vector<8x32xbf16>
    %36 = tpu.concatenate %33, %34, %35 in 1 : vector<8x32xbf16>, vector<8x32xbf16>, vector<8x32xbf16> -> vector<8x96xbf16>
    %cst_40 = arith.constant dense<0.000000e+00> : vector<8x8xf32>
    %37 = tpu.matmul %36, %3, %cst_40 {dimension_numbers = #tpu.dot_dimension_numbers<[1], [0], [0], [1], [0, 0, 1, 1], [], []>} : vector<8x96xbf16>, vector<96x8xbf16>, vector<8x8xf32> -> vector<8x8xf32>
    %38 = arith.addf %32, %37 : vector<8x8xf32>
    %39 = vector.extract_strided_slice %11 {offsets = [0, 0], sizes = [8, 32], strides = [1, 1]} : vector<10x32xbf16> to vector<8x32xbf16>
    %40 = vector.extract_strided_slice %11 {offsets = [1, 0], sizes = [8, 32], strides = [1, 1]} : vector<10x32xbf16> to vector<8x32xbf16>
    %41 = vector.extract_strided_slice %11 {offsets = [2, 0], sizes = [8, 32], strides = [1, 1]} : vector<10x32xbf16> to vector<8x32xbf16>
    %42 = tpu.concatenate %39, %40, %41 in 1 : vector<8x32xbf16>, vector<8x32xbf16>, vector<8x32xbf16> -> vector<8x96xbf16>
    %cst_41 = arith.constant dense<0.000000e+00> : vector<8x8xf32>
    %43 = tpu.matmul %42, %5, %cst_41 {dimension_numbers = #tpu.dot_dimension_numbers<[1], [0], [0], [1], [0, 0, 1, 1], [], []>} : vector<8x96xbf16>, vector<96x8xbf16>, vector<8x8xf32> -> vector<8x8xf32>
    %44 = arith.addf %38, %43 : vector<8x8xf32>
    %c0_42 = arith.constant 0 : index
    %c0_43 = arith.constant 0 : index
    %c0_44 = arith.constant 0 : index
    %c0_45 = arith.constant 0 : index
    %45 = vector.load %arg3[%c0_42, %c0_43, %c0_44, %c0_45] : memref<1x8x8x8xf32, #tpu.memory_space<vmem>>, vector<1x1x8x8xf32>
    %46 = vector.shape_cast %45 : vector<1x1x8x8xf32> to vector<8x8xf32>
    %47 = vector.shape_cast %44 : vector<8x8xf32> to vector<1x1x8x8xf32>
    tpu.vector_store %arg3[%c0_42, %c0_43, %c0_44, %c0_45], %47 {strides = array<i32>} : memref<1x8x8x8xf32, #tpu.memory_space<vmem>>, vector<1x1x8x8xf32>,
    %cst_46 = arith.constant 0.000000e+00 : f32
    %48 = vector.broadcast %cst_46 : f32 to vector<8x8xf32>
    %49 = vector.extract_strided_slice %9 {offsets = [0, 0], sizes = [8, 32], strides = [1, 1]} : vector<10x32xbf16> to vector<8x32xbf16>
    %50 = vector.extract_strided_slice %9 {offsets = [1, 0], sizes = [8, 32], strides = [1, 1]} : vector<10x32xbf16> to vector<8x32xbf16>
    %51 = vector.extract_strided_slice %9 {offsets = [2, 0], sizes = [8, 32], strides = [1, 1]} : vector<10x32xbf16> to vector<8x32xbf16>
    %52 = tpu.concatenate %49, %50, %51 in 1 : vector<8x32xbf16>, vector<8x32xbf16>, vector<8x32xbf16> -> vector<8x96xbf16>
    %cst_47 = arith.constant dense<0.000000e+00> : vector<8x8xf32>
    %53 = tpu.matmul %52, %1, %cst_47 {dimension_numbers = #tpu.dot_dimension_numbers<[1], [0], [0], [1], [0, 0, 1, 1], [], []>} : vector<8x96xbf16>, vector<96x8xbf16>, vector<8x8xf32> -> vector<8x8xf32>
    %54 = arith.addf %48, %53 : vector<8x8xf32>
    %55 = vector.extract_strided_slice %11 {offsets = [0, 0], sizes = [8, 32], strides = [1, 1]} : vector<10x32xbf16> to vector<8x32xbf16>
    %56 = vector.extract_strided_slice %11 {offsets = [1, 0], sizes = [8, 32], strides = [1, 1]} : vector<10x32xbf16> to vector<8x32xbf16>
    %57 = vector.extract_strided_slice %11 {offsets = [2, 0], sizes = [8, 32], strides = [1, 1]} : vector<10x32xbf16> to vector<8x32xbf16>
    %58 = tpu.concatenate %55, %56, %57 in 1 : vector<8x32xbf16>, vector<8x32xbf16>, vector<8x32xbf16> -> vector<8x96xbf16>
    %cst_48 = arith.constant dense<0.000000e+00> : vector<8x8xf32>
    %59 = tpu.matmul %58, %3, %cst_48 {dimension_numbers = #tpu.dot_dimension_numbers<[1], [0], [0], [1], [0, 0, 1, 1], [], []>} : vector<8x96xbf16>, vector<96x8xbf16>, vector<8x8xf32> -> vector<8x8xf32>
    %60 = arith.addf %54, %59 : vector<8x8xf32>
    %61 = vector.extract_strided_slice %13 {offsets = [0, 0], sizes = [8, 32], strides = [1, 1]} : vector<10x32xbf16> to vector<8x32xbf16>
    %62 = vector.extract_strided_slice %13 {offsets = [1, 0], sizes = [8, 32], strides = [1, 1]} : vector<10x32xbf16> to vector<8x32xbf16>
    %63 = vector.extract_strided_slice %13 {offsets = [2, 0], sizes = [8, 32], strides = [1, 1]} : vector<10x32xbf16> to vector<8x32xbf16>
    %64 = tpu.concatenate %61, %62, %63 in 1 : vector<8x32xbf16>, vector<8x32xbf16>, vector<8x32xbf16> -> vector<8x96xbf16>
    %cst_49 = arith.constant dense<0.000000e+00> : vector<8x8xf32>
    %65 = tpu.matmul %64, %5, %cst_49 {dimension_numbers = #tpu.dot_dimension_numbers<[1], [0], [0], [1], [0, 0, 1, 1], [], []>} : vector<8x96xbf16>, vector<96x8xbf16>, vector<8x8xf32> -> vector<8x8xf32>
    %66 = arith.addf %60, %65 : vector<8x8xf32>
    %c0_50 = arith.constant 0 : index
    %c1_51 = arith.constant 1 : index
    %c0_52 = arith.constant 0 : index
    %c0_53 = arith.constant 0 : index
    %67 = vector.load %arg3[%c0_50, %c1_51, %c0_52, %c0_53] : memref<1x8x8x8xf32, #tpu.memory_space<vmem>>, vector<1x1x8x8xf32>
    %68 = vector.shape_cast %67 : vector<1x1x8x8xf32> to vector<8x8xf32>
    %69 = vector.shape_cast %66 : vector<8x8xf32> to vector<1x1x8x8xf32>
    tpu.vector_store %arg3[%c0_50, %c1_51, %c0_52, %c0_53], %69 {strides = array<i32>} : memref<1x8x8x8xf32, #tpu.memory_space<vmem>>, vector<1x1x8x8xf32>,
    %cst_54 = arith.constant 0.000000e+00 : f32
    %70 = vector.broadcast %cst_54 : f32 to vector<8x8xf32>
    %71 = vector.extract_strided_slice %11 {offsets = [0, 0], sizes = [8, 32], strides = [1, 1]} : vector<10x32xbf16> to vector<8x32xbf16>
    %72 = vector.extract_strided_slice %11 {offsets = [1, 0], sizes = [8, 32], strides = [1, 1]} : vector<10x32xbf16> to vector<8x32xbf16>
    %73 = vector.extract_strided_slice %11 {offsets = [2, 0], sizes = [8, 32], strides = [1, 1]} : vector<10x32xbf16> to vector<8x32xbf16>
    %74 = tpu.concatenate %71, %72, %73 in 1 : vector<8x32xbf16>, vector<8x32xbf16>, vector<8x32xbf16> -> vector<8x96xbf16>
    %cst_55 = arith.constant dense<0.000000e+00> : vector<8x8xf32>
    %75 = tpu.matmul %74, %1, %cst_55 {dimension_numbers = #tpu.dot_dimension_numbers<[1], [0], [0], [1], [0, 0, 1, 1], [], []>} : vector<8x96xbf16>, vector<96x8xbf16>, vector<8x8xf32> -> vector<8x8xf32>
    %76 = arith.addf %70, %75 : vector<8x8xf32>
    %77 = vector.extract_strided_slice %13 {offsets = [0, 0], sizes = [8, 32], strides = [1, 1]} : vector<10x32xbf16> to vector<8x32xbf16>
    %78 = vector.extract_strided_slice %13 {offsets = [1, 0], sizes = [8, 32], strides = [1, 1]} : vector<10x32xbf16> to vector<8x32xbf16>
    %79 = vector.extract_strided_slice %13 {offsets = [2, 0], sizes = [8, 32], strides = [1, 1]} : vector<10x32xbf16> to vector<8x32xbf16>
    %80 = tpu.concatenate %77, %78, %79 in 1 : vector<8x32xbf16>, vector<8x32xbf16>, vector<8x32xbf16> -> vector<8x96xbf16>
    %cst_56 = arith.constant dense<0.000000e+00> : vector<8x8xf32>
    %81 = tpu.matmul %80, %3, %cst_56 {dimension_numbers = #tpu.dot_dimension_numbers<[1], [0], [0], [1], [0, 0, 1, 1], [], []>} : vector<8x96xbf16>, vector<96x8xbf16>, vector<8x8xf32> -> vector<8x8xf32>
    %82 = arith.addf %76, %81 : vector<8x8xf32>
    %83 = vector.extract_strided_slice %15 {offsets = [0, 0], sizes = [8, 32], strides = [1, 1]} : vector<10x32xbf16> to vector<8x32xbf16>
    %84 = vector.extract_strided_slice %15 {offsets = [1, 0], sizes = [8, 32], strides = [1, 1]} : vector<10x32xbf16> to vector<8x32xbf16>
    %85 = vector.extract_strided_slice %15 {offsets = [2, 0], sizes = [8, 32], strides = [1, 1]} : vector<10x32xbf16> to vector<8x32xbf16>
    %86 = tpu.concatenate %83, %84, %85 in 1 : vector<8x32xbf16>, vector<8x32xbf16>, vector<8x32xbf16> -> vector<8x96xbf16>
    %cst_57 = arith.constant dense<0.000000e+00> : vector<8x8xf32>
    %87 = tpu.matmul %86, %5, %cst_57 {dimension_numbers = #tpu.dot_dimension_numbers<[1], [0], [0], [1], [0, 0, 1, 1], [], []>} : vector<8x96xbf16>, vector<96x8xbf16>, vector<8x8xf32> -> vector<8x8xf32>
    %88 = arith.addf %82, %87 : vector<8x8xf32>
    %c0_58 = arith.constant 0 : index
    %c2_59 = arith.constant 2 : index
    %c0_60 = arith.constant 0 : index
    %c0_61 = arith.constant 0 : index
    %89 = vector.load %arg3[%c0_58, %c2_59, %c0_60, %c0_61] : memref<1x8x8x8xf32, #tpu.memory_space<vmem>>, vector<1x1x8x8xf32>
    %90 = vector.shape_cast %89 : vector<1x1x8x8xf32> to vector<8x8xf32>
    %91 = vector.shape_cast %88 : vector<8x8xf32> to vector<1x1x8x8xf32>
    tpu.vector_store %arg3[%c0_58, %c2_59, %c0_60, %c0_61], %91 {strides = array<i32>} : memref<1x8x8x8xf32, #tpu.memory_space<vmem>>, vector<1x1x8x8xf32>,
    %cst_62 = arith.constant 0.000000e+00 : f32
    %92 = vector.broadcast %cst_62 : f32 to vector<8x8xf32>
    %93 = vector.extract_strided_slice %13 {offsets = [0, 0], sizes = [8, 32], strides = [1, 1]} : vector<10x32xbf16> to vector<8x32xbf16>
    %94 = vector.extract_strided_slice %13 {offsets = [1, 0], sizes = [8, 32], strides = [1, 1]} : vector<10x32xbf16> to vector<8x32xbf16>
    %95 = vector.extract_strided_slice %13 {offsets = [2, 0], sizes = [8, 32], strides = [1, 1]} : vector<10x32xbf16> to vector<8x32xbf16>
    %96 = tpu.concatenate %93, %94, %95 in 1 : vector<8x32xbf16>, vector<8x32xbf16>, vector<8x32xbf16> -> vector<8x96xbf16>
    %cst_63 = arith.constant dense<0.000000e+00> : vector<8x8xf32>
    %97 = tpu.matmul %96, %1, %cst_63 {dimension_numbers = #tpu.dot_dimension_numbers<[1], [0], [0], [1], [0, 0, 1, 1], [], []>} : vector<8x96xbf16>, vector<96x8xbf16>, vector<8x8xf32> -> vector<8x8xf32>
    %98 = arith.addf %92, %97 : vector<8x8xf32>
    %99 = vector.extract_strided_slice %15 {offsets = [0, 0], sizes = [8, 32], strides = [1, 1]} : vector<10x32xbf16> to vector<8x32xbf16>
    %100 = vector.extract_strided_slice %15 {offsets = [1, 0], sizes = [8, 32], strides = [1, 1]} : vector<10x32xbf16> to vector<8x32xbf16>
    %101 = vector.extract_strided_slice %15 {offsets = [2, 0], sizes = [8, 32], strides = [1, 1]} : vector<10x32xbf16> to vector<8x32xbf16>
    %102 = tpu.concatenate %99, %100, %101 in 1 : vector<8x32xbf16>, vector<8x32xbf16>, vector<8x32xbf16> -> vector<8x96xbf16>
    %cst_64 = arith.constant dense<0.000000e+00> : vector<8x8xf32>
    %103 = tpu.matmul %102, %3, %cst_64 {dimension_numbers = #tpu.dot_dimension_numbers<[1], [0], [0], [1], [0, 0, 1, 1], [], []>} : vector<8x96xbf16>, vector<96x8xbf16>, vector<8x8xf32> -> vector<8x8xf32>
    %104 = arith.addf %98, %103 : vector<8x8xf32>
    %105 = vector.extract_strided_slice %17 {offsets = [0, 0], sizes = [8, 32], strides = [1, 1]} : vector<10x32xbf16> to vector<8x32xbf16>
    %106 = vector.extract_strided_slice %17 {offsets = [1, 0], sizes = [8, 32], strides = [1, 1]} : vector<10x32xbf16> to vector<8x32xbf16>
    %107 = vector.extract_strided_slice %17 {offsets = [2, 0], sizes = [8, 32], strides = [1, 1]} : vector<10x32xbf16> to vector<8x32xbf16>
    %108 = tpu.concatenate %105, %106, %107 in 1 : vector<8x32xbf16>, vector<8x32xbf16>, vector<8x32xbf16> -> vector<8x96xbf16>
    %cst_65 = arith.constant dense<0.000000e+00> : vector<8x8xf32>
    %109 = tpu.matmul %108, %5, %cst_65 {dimension_numbers = #tpu.dot_dimension_numbers<[1], [0], [0], [1], [0, 0, 1, 1], [], []>} : vector<8x96xbf16>, vector<96x8xbf16>, vector<8x8xf32> -> vector<8x8xf32>
    %110 = arith.addf %104, %109 : vector<8x8xf32>
    %c0_66 = arith.constant 0 : index
    %c3_67 = arith.constant 3 : index
    %c0_68 = arith.constant 0 : index
    %c0_69 = arith.constant 0 : index
    %111 = vector.load %arg3[%c0_66, %c3_67, %c0_68, %c0_69] : memref<1x8x8x8xf32, #tpu.memory_space<vmem>>, vector<1x1x8x8xf32>
    %112 = vector.shape_cast %111 : vector<1x1x8x8xf32> to vector<8x8xf32>
    %113 = vector.shape_cast %110 : vector<8x8xf32> to vector<1x1x8x8xf32>
    tpu.vector_store %arg3[%c0_66, %c3_67, %c0_68, %c0_69], %113 {strides = array<i32>} : memref<1x8x8x8xf32, #tpu.memory_space<vmem>>, vector<1x1x8x8xf32>,
    %cst_70 = arith.constant 0.000000e+00 : f32
    %114 = vector.broadcast %cst_70 : f32 to vector<8x8xf32>
    %115 = vector.extract_strided_slice %15 {offsets = [0, 0], sizes = [8, 32], strides = [1, 1]} : vector<10x32xbf16> to vector<8x32xbf16>
    %116 = vector.extract_strided_slice %15 {offsets = [1, 0], sizes = [8, 32], strides = [1, 1]} : vector<10x32xbf16> to vector<8x32xbf16>
    %117 = vector.extract_strided_slice %15 {offsets = [2, 0], sizes = [8, 32], strides = [1, 1]} : vector<10x32xbf16> to vector<8x32xbf16>
    %118 = tpu.concatenate %115, %116, %117 in 1 : vector<8x32xbf16>, vector<8x32xbf16>, vector<8x32xbf16> -> vector<8x96xbf16>
    %cst_71 = arith.constant dense<0.000000e+00> : vector<8x8xf32>
    %119 = tpu.matmul %118, %1, %cst_71 {dimension_numbers = #tpu.dot_dimension_numbers<[1], [0], [0], [1], [0, 0, 1, 1], [], []>} : vector<8x96xbf16>, vector<96x8xbf16>, vector<8x8xf32> -> vector<8x8xf32>
    %120 = arith.addf %114, %119 : vector<8x8xf32>
    %121 = vector.extract_strided_slice %17 {offsets = [0, 0], sizes = [8, 32], strides = [1, 1]} : vector<10x32xbf16> to vector<8x32xbf16>
    %122 = vector.extract_strided_slice %17 {offsets = [1, 0], sizes = [8, 32], strides = [1, 1]} : vector<10x32xbf16> to vector<8x32xbf16>
    %123 = vector.extract_strided_slice %17 {offsets = [2, 0], sizes = [8, 32], strides = [1, 1]} : vector<10x32xbf16> to vector<8x32xbf16>
    %124 = tpu.concatenate %121, %122, %123 in 1 : vector<8x32xbf16>, vector<8x32xbf16>, vector<8x32xbf16> -> vector<8x96xbf16>
    %cst_72 = arith.constant dense<0.000000e+00> : vector<8x8xf32>
    %125 = tpu.matmul %124, %3, %cst_72 {dimension_numbers = #tpu.dot_dimension_numbers<[1], [0], [0], [1], [0, 0, 1, 1], [], []>} : vector<8x96xbf16>, vector<96x8xbf16>, vector<8x8xf32> -> vector<8x8xf32>
    %126 = arith.addf %120, %125 : vector<8x8xf32>
    %127 = vector.extract_strided_slice %19 {offsets = [0, 0], sizes = [8, 32], strides = [1, 1]} : vector<10x32xbf16> to vector<8x32xbf16>
    %128 = vector.extract_strided_slice %19 {offsets = [1, 0], sizes = [8, 32], strides = [1, 1]} : vector<10x32xbf16> to vector<8x32xbf16>
    %129 = vector.extract_strided_slice %19 {offsets = [2, 0], sizes = [8, 32], strides = [1, 1]} : vector<10x32xbf16> to vector<8x32xbf16>
    %130 = tpu.concatenate %127, %128, %129 in 1 : vector<8x32xbf16>, vector<8x32xbf16>, vector<8x32xbf16> -> vector<8x96xbf16>
    %cst_73 = arith.constant dense<0.000000e+00> : vector<8x8xf32>
    %131 = tpu.matmul %130, %5, %cst_73 {dimension_numbers = #tpu.dot_dimension_numbers<[1], [0], [0], [1], [0, 0, 1, 1], [], []>} : vector<8x96xbf16>, vector<96x8xbf16>, vector<8x8xf32> -> vector<8x8xf32>
    %132 = arith.addf %126, %131 : vector<8x8xf32>
    %c0_74 = arith.constant 0 : index
    %c4_75 = arith.constant 4 : index
    %c0_76 = arith.constant 0 : index
    %c0_77 = arith.constant 0 : index
    %133 = vector.load %arg3[%c0_74, %c4_75, %c0_76, %c0_77] : memref<1x8x8x8xf32, #tpu.memory_space<vmem>>, vector<1x1x8x8xf32>
    %134 = vector.shape_cast %133 : vector<1x1x8x8xf32> to vector<8x8xf32>
    %135 = vector.shape_cast %132 : vector<8x8xf32> to vector<1x1x8x8xf32>
    tpu.vector_store %arg3[%c0_74, %c4_75, %c0_76, %c0_77], %135 {strides = array<i32>} : memref<1x8x8x8xf32, #tpu.memory_space<vmem>>, vector<1x1x8x8xf32>,
    %cst_78 = arith.constant 0.000000e+00 : f32
    %136 = vector.broadcast %cst_78 : f32 to vector<8x8xf32>
    %137 = vector.extract_strided_slice %17 {offsets = [0, 0], sizes = [8, 32], strides = [1, 1]} : vector<10x32xbf16> to vector<8x32xbf16>
    %138 = vector.extract_strided_slice %17 {offsets = [1, 0], sizes = [8, 32], strides = [1, 1]} : vector<10x32xbf16> to vector<8x32xbf16>
    %139 = vector.extract_strided_slice %17 {offsets = [2, 0], sizes = [8, 32], strides = [1, 1]} : vector<10x32xbf16> to vector<8x32xbf16>
    %140 = tpu.concatenate %137, %138, %139 in 1 : vector<8x32xbf16>, vector<8x32xbf16>, vector<8x32xbf16> -> vector<8x96xbf16>
    %cst_79 = arith.constant dense<0.000000e+00> : vector<8x8xf32>
    %141 = tpu.matmul %140, %1, %cst_79 {dimension_numbers = #tpu.dot_dimension_numbers<[1], [0], [0], [1], [0, 0, 1, 1], [], []>} : vector<8x96xbf16>, vector<96x8xbf16>, vector<8x8xf32> -> vector<8x8xf32>
    %142 = arith.addf %136, %141 : vector<8x8xf32>
    %143 = vector.extract_strided_slice %19 {offsets = [0, 0], sizes = [8, 32], strides = [1, 1]} : vector<10x32xbf16> to vector<8x32xbf16>
    %144 = vector.extract_strided_slice %19 {offsets = [1, 0], sizes = [8, 32], strides = [1, 1]} : vector<10x32xbf16> to vector<8x32xbf16>
    %145 = vector.extract_strided_slice %19 {offsets = [2, 0], sizes = [8, 32], strides = [1, 1]} : vector<10x32xbf16> to vector<8x32xbf16>
    %146 = tpu.concatenate %143, %144, %145 in 1 : vector<8x32xbf16>, vector<8x32xbf16>, vector<8x32xbf16> -> vector<8x96xbf16>
    %cst_80 = arith.constant dense<0.000000e+00> : vector<8x8xf32>
    %147 = tpu.matmul %146, %3, %cst_80 {dimension_numbers = #tpu.dot_dimension_numbers<[1], [0], [0], [1], [0, 0, 1, 1], [], []>} : vector<8x96xbf16>, vector<96x8xbf16>, vector<8x8xf32> -> vector<8x8xf32>
    %148 = arith.addf %142, %147 : vector<8x8xf32>
    %149 = vector.extract_strided_slice %21 {offsets = [0, 0], sizes = [8, 32], strides = [1, 1]} : vector<10x32xbf16> to vector<8x32xbf16>
    %150 = vector.extract_strided_slice %21 {offsets = [1, 0], sizes = [8, 32], strides = [1, 1]} : vector<10x32xbf16> to vector<8x32xbf16>
    %151 = vector.extract_strided_slice %21 {offsets = [2, 0], sizes = [8, 32], strides = [1, 1]} : vector<10x32xbf16> to vector<8x32xbf16>
    %152 = tpu.concatenate %149, %150, %151 in 1 : vector<8x32xbf16>, vector<8x32xbf16>, vector<8x32xbf16> -> vector<8x96xbf16>
    %cst_81 = arith.constant dense<0.000000e+00> : vector<8x8xf32>
    %153 = tpu.matmul %152, %5, %cst_81 {dimension_numbers = #tpu.dot_dimension_numbers<[1], [0], [0], [1], [0, 0, 1, 1], [], []>} : vector<8x96xbf16>, vector<96x8xbf16>, vector<8x8xf32> -> vector<8x8xf32>
    %154 = arith.addf %148, %153 : vector<8x8xf32>
    %c0_82 = arith.constant 0 : index
    %c5_83 = arith.constant 5 : index
    %c0_84 = arith.constant 0 : index
    %c0_85 = arith.constant 0 : index
    %155 = vector.load %arg3[%c0_82, %c5_83, %c0_84, %c0_85] : memref<1x8x8x8xf32, #tpu.memory_space<vmem>>, vector<1x1x8x8xf32>
    %156 = vector.shape_cast %155 : vector<1x1x8x8xf32> to vector<8x8xf32>
    %157 = vector.shape_cast %154 : vector<8x8xf32> to vector<1x1x8x8xf32>
    tpu.vector_store %arg3[%c0_82, %c5_83, %c0_84, %c0_85], %157 {strides = array<i32>} : memref<1x8x8x8xf32, #tpu.memory_space<vmem>>, vector<1x1x8x8xf32>,
    %cst_86 = arith.constant 0.000000e+00 : f32
    %158 = vector.broadcast %cst_86 : f32 to vector<8x8xf32>
    %159 = vector.extract_strided_slice %19 {offsets = [0, 0], sizes = [8, 32], strides = [1, 1]} : vector<10x32xbf16> to vector<8x32xbf16>
    %160 = vector.extract_strided_slice %19 {offsets = [1, 0], sizes = [8, 32], strides = [1, 1]} : vector<10x32xbf16> to vector<8x32xbf16>
    %161 = vector.extract_strided_slice %19 {offsets = [2, 0], sizes = [8, 32], strides = [1, 1]} : vector<10x32xbf16> to vector<8x32xbf16>
    %162 = tpu.concatenate %159, %160, %161 in 1 : vector<8x32xbf16>, vector<8x32xbf16>, vector<8x32xbf16> -> vector<8x96xbf16>
    %cst_87 = arith.constant dense<0.000000e+00> : vector<8x8xf32>
    %163 = tpu.matmul %162, %1, %cst_87 {dimension_numbers = #tpu.dot_dimension_numbers<[1], [0], [0], [1], [0, 0, 1, 1], [], []>} : vector<8x96xbf16>, vector<96x8xbf16>, vector<8x8xf32> -> vector<8x8xf32>
    %164 = arith.addf %158, %163 : vector<8x8xf32>
    %165 = vector.extract_strided_slice %21 {offsets = [0, 0], sizes = [8, 32], strides = [1, 1]} : vector<10x32xbf16> to vector<8x32xbf16>
    %166 = vector.extract_strided_slice %21 {offsets = [1, 0], sizes = [8, 32], strides = [1, 1]} : vector<10x32xbf16> to vector<8x32xbf16>
    %167 = vector.extract_strided_slice %21 {offsets = [2, 0], sizes = [8, 32], strides = [1, 1]} : vector<10x32xbf16> to vector<8x32xbf16>
    %168 = tpu.concatenate %165, %166, %167 in 1 : vector<8x32xbf16>, vector<8x32xbf16>, vector<8x32xbf16> -> vector<8x96xbf16>
    %cst_88 = arith.constant dense<0.000000e+00> : vector<8x8xf32>
    %169 = tpu.matmul %168, %3, %cst_88 {dimension_numbers = #tpu.dot_dimension_numbers<[1], [0], [0], [1], [0, 0, 1, 1], [], []>} : vector<8x96xbf16>, vector<96x8xbf16>, vector<8x8xf32> -> vector<8x8xf32>
    %170 = arith.addf %164, %169 : vector<8x8xf32>
    %171 = vector.extract_strided_slice %23 {offsets = [0, 0], sizes = [8, 32], strides = [1, 1]} : vector<10x32xbf16> to vector<8x32xbf16>
    %172 = vector.extract_strided_slice %23 {offsets = [1, 0], sizes = [8, 32], strides = [1, 1]} : vector<10x32xbf16> to vector<8x32xbf16>
    %173 = vector.extract_strided_slice %23 {offsets = [2, 0], sizes = [8, 32], strides = [1, 1]} : vector<10x32xbf16> to vector<8x32xbf16>
    %174 = tpu.concatenate %171, %172, %173 in 1 : vector<8x32xbf16>, vector<8x32xbf16>, vector<8x32xbf16> -> vector<8x96xbf16>
    %cst_89 = arith.constant dense<0.000000e+00> : vector<8x8xf32>
    %175 = tpu.matmul %174, %5, %cst_89 {dimension_numbers = #tpu.dot_dimension_numbers<[1], [0], [0], [1], [0, 0, 1, 1], [], []>} : vector<8x96xbf16>, vector<96x8xbf16>, vector<8x8xf32> -> vector<8x8xf32>
    %176 = arith.addf %170, %175 : vector<8x8xf32>
    %c0_90 = arith.constant 0 : index
    %c6_91 = arith.constant 6 : index
    %c0_92 = arith.constant 0 : index
    %c0_93 = arith.constant 0 : index
    %177 = vector.load %arg3[%c0_90, %c6_91, %c0_92, %c0_93] : memref<1x8x8x8xf32, #tpu.memory_space<vmem>>, vector<1x1x8x8xf32>
    %178 = vector.shape_cast %177 : vector<1x1x8x8xf32> to vector<8x8xf32>
    %179 = vector.shape_cast %176 : vector<8x8xf32> to vector<1x1x8x8xf32>
    tpu.vector_store %arg3[%c0_90, %c6_91, %c0_92, %c0_93], %179 {strides = array<i32>} : memref<1x8x8x8xf32, #tpu.memory_space<vmem>>, vector<1x1x8x8xf32>,
    %cst_94 = arith.constant 0.000000e+00 : f32
    %180 = vector.broadcast %cst_94 : f32 to vector<8x8xf32>
    %181 = vector.extract_strided_slice %21 {offsets = [0, 0], sizes = [8, 32], strides = [1, 1]} : vector<10x32xbf16> to vector<8x32xbf16>
    %182 = vector.extract_strided_slice %21 {offsets = [1, 0], sizes = [8, 32], strides = [1, 1]} : vector<10x32xbf16> to vector<8x32xbf16>
    %183 = vector.extract_strided_slice %21 {offsets = [2, 0], sizes = [8, 32], strides = [1, 1]} : vector<10x32xbf16> to vector<8x32xbf16>
    %184 = tpu.concatenate %181, %182, %183 in 1 : vector<8x32xbf16>, vector<8x32xbf16>, vector<8x32xbf16> -> vector<8x96xbf16>
    %cst_95 = arith.constant dense<0.000000e+00> : vector<8x8xf32>
    %185 = tpu.matmul %184, %1, %cst_95 {dimension_numbers = #tpu.dot_dimension_numbers<[1], [0], [0], [1], [0, 0, 1, 1], [], []>} : vector<8x96xbf16>, vector<96x8xbf16>, vector<8x8xf32> -> vector<8x8xf32>
    %186 = arith.addf %180, %185 : vector<8x8xf32>
    %187 = vector.extract_strided_slice %23 {offsets = [0, 0], sizes = [8, 32], strides = [1, 1]} : vector<10x32xbf16> to vector<8x32xbf16>
    %188 = vector.extract_strided_slice %23 {offsets = [1, 0], sizes = [8, 32], strides = [1, 1]} : vector<10x32xbf16> to vector<8x32xbf16>
    %189 = vector.extract_strided_slice %23 {offsets = [2, 0], sizes = [8, 32], strides = [1, 1]} : vector<10x32xbf16> to vector<8x32xbf16>
    %190 = tpu.concatenate %187, %188, %189 in 1 : vector<8x32xbf16>, vector<8x32xbf16>, vector<8x32xbf16> -> vector<8x96xbf16>
    %cst_96 = arith.constant dense<0.000000e+00> : vector<8x8xf32>
    %191 = tpu.matmul %190, %3, %cst_96 {dimension_numbers = #tpu.dot_dimension_numbers<[1], [0], [0], [1], [0, 0, 1, 1], [], []>} : vector<8x96xbf16>, vector<96x8xbf16>, vector<8x8xf32> -> vector<8x8xf32>
    %192 = arith.addf %186, %191 : vector<8x8xf32>
    %193 = vector.extract_strided_slice %25 {offsets = [0, 0], sizes = [8, 32], strides = [1, 1]} : vector<10x32xbf16> to vector<8x32xbf16>
    %194 = vector.extract_strided_slice %25 {offsets = [1, 0], sizes = [8, 32], strides = [1, 1]} : vector<10x32xbf16> to vector<8x32xbf16>
    %195 = vector.extract_strided_slice %25 {offsets = [2, 0], sizes = [8, 32], strides = [1, 1]} : vector<10x32xbf16> to vector<8x32xbf16>
    %196 = tpu.concatenate %193, %194, %195 in 1 : vector<8x32xbf16>, vector<8x32xbf16>, vector<8x32xbf16> -> vector<8x96xbf16>
    %cst_97 = arith.constant dense<0.000000e+00> : vector<8x8xf32>
    %197 = tpu.matmul %196, %5, %cst_97 {dimension_numbers = #tpu.dot_dimension_numbers<[1], [0], [0], [1], [0, 0, 1, 1], [], []>} : vector<8x96xbf16>, vector<96x8xbf16>, vector<8x8xf32> -> vector<8x8xf32>
    %198 = arith.addf %192, %197 : vector<8x8xf32>
    %c0_98 = arith.constant 0 : index
    %c7_99 = arith.constant 7 : index
    %c0_100 = arith.constant 0 : index
    %c0_101 = arith.constant 0 : index
    %199 = vector.load %arg3[%c0_98, %c7_99, %c0_100, %c0_101] : memref<1x8x8x8xf32, #tpu.memory_space<vmem>>, vector<1x1x8x8xf32>
    %200 = vector.shape_cast %199 : vector<1x1x8x8xf32> to vector<8x8xf32>
    %201 = vector.shape_cast %198 : vector<8x8xf32> to vector<1x1x8x8xf32>
    tpu.vector_store %arg3[%c0_98, %c7_99, %c0_100, %c0_101], %201 {strides = array<i32>} : memref<1x8x8x8xf32, #tpu.memory_space<vmem>>, vector<1x1x8x8xf32>,
    return
  }
  func.func @transform_0(%arg0: i32) -> (i32, i32, i32, i32) {
    %c0_i32 = arith.constant 0 : i32
    %c0_i32_0 = arith.constant 0 : i32
    %c0_i32_1 = arith.constant 0 : i32
    %c0_i32_2 = arith.constant 0 : i32
    return %arg0, %c0_i32, %c0_i32_0, %c0_i32_1 : i32, i32, i32, i32
  }
  func.func @transform_1(%arg0: i32) -> (i32, i32, i32) {
    %c0_i32 = arith.constant 0 : i32
    %c0_i32_0 = arith.constant 0 : i32
    %c0_i32_1 = arith.constant 0 : i32
    %c0_i32_2 = arith.constant 0 : i32
    return %c0_i32, %c0_i32_0, %c0_i32_1 : i32, i32, i32
  }
  func.func @transform_2(%arg0: i32) -> (i32, i32, i32, i32) {
    %c0_i32 = arith.constant 0 : i32
    %c0_i32_0 = arith.constant 0 : i32
    %c0_i32_1 = arith.constant 0 : i32
    %c0_i32_2 = arith.constant 0 : i32
    return %arg0, %c0_i32, %c0_i32_0, %c0_i32_1 : i32, i32, i32, i32
  }
}

module attributes {stable_mosaic.version = 11 : i64} {
  func.func @_bn_relu_matmul_kernel(%arg0: i32, %arg1: memref<64x32xf32, #tpu.memory_space<vmem>>, %arg2: memref<1x32xf32, #tpu.memory_space<vmem>>, %arg3: memref<1x32xf32, #tpu.memory_space<vmem>>, %arg4: memref<32x16xbf16, #tpu.memory_space<vmem>>, %arg5: memref<64x16xf32, #tpu.memory_space<vmem>>) attributes {dimension_semantics = [#tpu.dimension_semantics<parallel>], iteration_bounds = array<i64: 2>, scalar_prefetch = 0 : i64, scratch_operands = 0 : i64, tpu.core_type = #tpu.core_type<tc>, window_params = [{transform_indices = @transform_0, window_bounds = array<i64: 64, 32>}, {pipeline_mode = #tpu.pipeline_mode<synchronous>, transform_indices = @transform_1, window_bounds = array<i64: 1, 32>}, {pipeline_mode = #tpu.pipeline_mode<synchronous>, transform_indices = @transform_2, window_bounds = array<i64: 1, 32>}, {pipeline_mode = #tpu.pipeline_mode<synchronous>, transform_indices = @transform_3, window_bounds = array<i64: 32, 16>}, {transform_indices = @transform_4, window_bounds = array<i64: 64, 16>}]} {
    %c0 = arith.constant 0 : index
    %c0_0 = arith.constant 0 : index
    %0 = vector.load %arg1[%c0, %c0_0] : memref<64x32xf32, #tpu.memory_space<vmem>>, vector<64x32xf32>
    %c0_1 = arith.constant 0 : index
    %c0_2 = arith.constant 0 : index
    %1 = vector.load %arg2[%c0_1, %c0_2] : memref<1x32xf32, #tpu.memory_space<vmem>>, vector<1x32xf32>
    %2 = vector.broadcast %1 : vector<1x32xf32> to vector<64x32xf32>
    %3 = arith.mulf %0, %2 : vector<64x32xf32>
    %c0_3 = arith.constant 0 : index
    %c0_4 = arith.constant 0 : index
    %4 = vector.load %arg3[%c0_3, %c0_4] : memref<1x32xf32, #tpu.memory_space<vmem>>, vector<1x32xf32>
    %5 = vector.broadcast %4 : vector<1x32xf32> to vector<64x32xf32>
    %6 = arith.addf %3, %5 : vector<64x32xf32>
    %cst = arith.constant 0.000000e+00 : f32
    %7 = vector.broadcast %cst : f32 to vector<64x32xf32>
    %8 = arith.maximumf %6, %7 : vector<64x32xf32>
    %9 = arith.truncf %8 : vector<64x32xf32> to vector<64x32xbf16>
    %c0_5 = arith.constant 0 : index
    %c0_6 = arith.constant 0 : index
    %10 = vector.load %arg4[%c0_5, %c0_6] : memref<32x16xbf16, #tpu.memory_space<vmem>>, vector<32x16xbf16>
    %cst_7 = arith.constant dense<0.000000e+00> : vector<64x16xf32>
    %11 = tpu.matmul %9, %10, %cst_7 {dimension_numbers = #tpu.dot_dimension_numbers<[1], [0], [0], [1], [0, 0, 1, 1], [], []>} : vector<64x32xbf16>, vector<32x16xbf16>, vector<64x16xf32> -> vector<64x16xf32>
    %c0_8 = arith.constant 0 : index
    %c0_9 = arith.constant 0 : index
    %12 = vector.load %arg5[%c0_8, %c0_9] : memref<64x16xf32, #tpu.memory_space<vmem>>, vector<64x16xf32>
    tpu.vector_store %arg5[%c0_8, %c0_9], %11 {strides = array<i32>} : memref<64x16xf32, #tpu.memory_space<vmem>>, vector<64x16xf32>,
    return
  }
  func.func @transform_0(%arg0: i32) -> (i32, i32) {
    %c0_i32 = arith.constant 0 : i32
    %c0_i32_0 = arith.constant 0 : i32
    return %arg0, %c0_i32 : i32, i32
  }
  func.func @transform_1(%arg0: i32) -> (i32, i32) {
    %c0_i32 = arith.constant 0 : i32
    %c0_i32_0 = arith.constant 0 : i32
    %c0_i32_1 = arith.constant 0 : i32
    return %c0_i32, %c0_i32_0 : i32, i32
  }
  func.func @transform_2(%arg0: i32) -> (i32, i32) {
    %c0_i32 = arith.constant 0 : i32
    %c0_i32_0 = arith.constant 0 : i32
    %c0_i32_1 = arith.constant 0 : i32
    return %c0_i32, %c0_i32_0 : i32, i32
  }
  func.func @transform_3(%arg0: i32) -> (i32, i32) {
    %c0_i32 = arith.constant 0 : i32
    %c0_i32_0 = arith.constant 0 : i32
    %c0_i32_1 = arith.constant 0 : i32
    return %c0_i32, %c0_i32_0 : i32, i32
  }
  func.func @transform_4(%arg0: i32) -> (i32, i32) {
    %c0_i32 = arith.constant 0 : i32
    %c0_i32_0 = arith.constant 0 : i32
    return %arg0, %c0_i32 : i32, i32
  }
}

module attributes {stable_mosaic.version = 11 : i64} {
  func.func @_bneck_1x1_kernel(%arg0: i32, %arg1: memref<16x32xf32, #tpu.memory_space<vmem>>, %arg2: memref<1x32xf32, #tpu.memory_space<vmem>>, %arg3: memref<1x32xf32, #tpu.memory_space<vmem>>, %arg4: memref<32x32xbf16, #tpu.memory_space<vmem>>, %arg5: memref<1x32xf32, #tpu.memory_space<vmem>>, %arg6: memref<1x32xf32, #tpu.memory_space<vmem>>, %arg7: memref<16x32xbf16, #tpu.memory_space<vmem>>) attributes {dimension_semantics = [#tpu.dimension_semantics<parallel>], iteration_bounds = array<i64: 2>, scalar_prefetch = 0 : i64, scratch_operands = 0 : i64, tpu.core_type = #tpu.core_type<tc>, window_params = [{transform_indices = @transform_0, window_bounds = array<i64: 16, 32>}, {pipeline_mode = #tpu.pipeline_mode<synchronous>, transform_indices = @transform_1, window_bounds = array<i64: 1, 32>}, {pipeline_mode = #tpu.pipeline_mode<synchronous>, transform_indices = @transform_2, window_bounds = array<i64: 1, 32>}, {pipeline_mode = #tpu.pipeline_mode<synchronous>, transform_indices = @transform_3, window_bounds = array<i64: 32, 32>}, {pipeline_mode = #tpu.pipeline_mode<synchronous>, transform_indices = @transform_4, window_bounds = array<i64: 1, 32>}, {pipeline_mode = #tpu.pipeline_mode<synchronous>, transform_indices = @transform_5, window_bounds = array<i64: 1, 32>}, {transform_indices = @transform_6, window_bounds = array<i64: 16, 32>}]} {
    %c0 = arith.constant 0 : index
    %c0_0 = arith.constant 0 : index
    %0 = vector.load %arg1[%c0, %c0_0] : memref<16x32xf32, #tpu.memory_space<vmem>>, vector<16x32xf32>
    %c0_1 = arith.constant 0 : index
    %c0_2 = arith.constant 0 : index
    %1 = vector.load %arg2[%c0_1, %c0_2] : memref<1x32xf32, #tpu.memory_space<vmem>>, vector<1x32xf32>
    %2 = vector.broadcast %1 : vector<1x32xf32> to vector<16x32xf32>
    %3 = arith.mulf %0, %2 : vector<16x32xf32>
    %c0_3 = arith.constant 0 : index
    %c0_4 = arith.constant 0 : index
    %4 = vector.load %arg3[%c0_3, %c0_4] : memref<1x32xf32, #tpu.memory_space<vmem>>, vector<1x32xf32>
    %5 = vector.broadcast %4 : vector<1x32xf32> to vector<16x32xf32>
    %6 = arith.addf %3, %5 : vector<16x32xf32>
    %cst = arith.constant 0.000000e+00 : f32
    %7 = vector.broadcast %cst : f32 to vector<16x32xf32>
    %8 = arith.maximumf %6, %7 : vector<16x32xf32>
    %9 = arith.truncf %8 : vector<16x32xf32> to vector<16x32xbf16>
    %c0_5 = arith.constant 0 : index
    %c0_6 = arith.constant 0 : index
    %10 = vector.load %arg4[%c0_5, %c0_6] : memref<32x32xbf16, #tpu.memory_space<vmem>>, vector<32x32xbf16>
    %cst_7 = arith.constant dense<0.000000e+00> : vector<16x32xf32>
    %11 = tpu.matmul %9, %10, %cst_7 {dimension_numbers = #tpu.dot_dimension_numbers<[1], [0], [0], [1], [0, 0, 1, 1], [], []>} : vector<16x32xbf16>, vector<32x32xbf16>, vector<16x32xf32> -> vector<16x32xf32>
    %c0_8 = arith.constant 0 : index
    %c0_9 = arith.constant 0 : index
    %12 = vector.load %arg5[%c0_8, %c0_9] : memref<1x32xf32, #tpu.memory_space<vmem>>, vector<1x32xf32>
    %13 = vector.broadcast %12 : vector<1x32xf32> to vector<16x32xf32>
    %14 = arith.mulf %11, %13 : vector<16x32xf32>
    %c0_10 = arith.constant 0 : index
    %c0_11 = arith.constant 0 : index
    %15 = vector.load %arg6[%c0_10, %c0_11] : memref<1x32xf32, #tpu.memory_space<vmem>>, vector<1x32xf32>
    %16 = vector.broadcast %15 : vector<1x32xf32> to vector<16x32xf32>
    %17 = arith.addf %14, %16 : vector<16x32xf32>
    %cst_12 = arith.constant 0.000000e+00 : f32
    %18 = vector.broadcast %cst_12 : f32 to vector<16x32xf32>
    %19 = arith.maximumf %17, %18 : vector<16x32xf32>
    %20 = arith.truncf %19 : vector<16x32xf32> to vector<16x32xbf16>
    %c0_13 = arith.constant 0 : index
    %c0_14 = arith.constant 0 : index
    %21 = vector.load %arg7[%c0_13, %c0_14] : memref<16x32xbf16, #tpu.memory_space<vmem>>, vector<16x32xbf16>
    tpu.vector_store %arg7[%c0_13, %c0_14], %20 {strides = array<i32>} : memref<16x32xbf16, #tpu.memory_space<vmem>>, vector<16x32xbf16>,
    return
  }
  func.func @transform_0(%arg0: i32) -> (i32, i32) {
    %c0_i32 = arith.constant 0 : i32
    %c0_i32_0 = arith.constant 0 : i32
    return %arg0, %c0_i32 : i32, i32
  }
  func.func @transform_1(%arg0: i32) -> (i32, i32) {
    %c0_i32 = arith.constant 0 : i32
    %c0_i32_0 = arith.constant 0 : i32
    %c0_i32_1 = arith.constant 0 : i32
    return %c0_i32, %c0_i32_0 : i32, i32
  }
  func.func @transform_2(%arg0: i32) -> (i32, i32) {
    %c0_i32 = arith.constant 0 : i32
    %c0_i32_0 = arith.constant 0 : i32
    %c0_i32_1 = arith.constant 0 : i32
    return %c0_i32, %c0_i32_0 : i32, i32
  }
  func.func @transform_3(%arg0: i32) -> (i32, i32) {
    %c0_i32 = arith.constant 0 : i32
    %c0_i32_0 = arith.constant 0 : i32
    %c0_i32_1 = arith.constant 0 : i32
    return %c0_i32, %c0_i32_0 : i32, i32
  }
  func.func @transform_4(%arg0: i32) -> (i32, i32) {
    %c0_i32 = arith.constant 0 : i32
    %c0_i32_0 = arith.constant 0 : i32
    %c0_i32_1 = arith.constant 0 : i32
    return %c0_i32, %c0_i32_0 : i32, i32
  }
  func.func @transform_5(%arg0: i32) -> (i32, i32) {
    %c0_i32 = arith.constant 0 : i32
    %c0_i32_0 = arith.constant 0 : i32
    %c0_i32_1 = arith.constant 0 : i32
    return %c0_i32, %c0_i32_0 : i32, i32
  }
  func.func @transform_6(%arg0: i32) -> (i32, i32) {
    %c0_i32 = arith.constant 0 : i32
    %c0_i32_0 = arith.constant 0 : i32
    return %arg0, %c0_i32 : i32, i32
  }
}

module attributes {stable_mosaic.version = 11 : i64} {
  func.func @_conv3x3_kernel(%arg0: i32, %arg1: memref<1x6x6x32xbf16, #tpu.memory_space<vmem>>, %arg2: memref<3x96x8xbf16, #tpu.memory_space<vmem>>, %arg3: memref<1x4x4x8xf32, #tpu.memory_space<vmem>>) attributes {dimension_semantics = [#tpu.dimension_semantics<parallel>], iteration_bounds = array<i64: 2>, scalar_prefetch = 0 : i64, scratch_operands = 0 : i64, tpu.core_type = #tpu.core_type<tc>, window_params = [{transform_indices = @transform_0, window_bounds = array<i64: 1, 6, 6, 32>}, {pipeline_mode = #tpu.pipeline_mode<synchronous>, transform_indices = @transform_1, window_bounds = array<i64: 3, 96, 8>}, {transform_indices = @transform_2, window_bounds = array<i64: 1, 4, 4, 8>}]} {
    %c0 = arith.constant 0 : index
    %c0_0 = arith.constant 0 : index
    %c0_1 = arith.constant 0 : index
    %0 = vector.load %arg2[%c0, %c0_0, %c0_1] : memref<3x96x8xbf16, #tpu.memory_space<vmem>>, vector<1x96x8xbf16>
    %1 = vector.shape_cast %0 : vector<1x96x8xbf16> to vector<96x8xbf16>
    %c1 = arith.constant 1 : index
    %c0_2 = arith.constant 0 : index
    %c0_3 = arith.constant 0 : index
    %2 = vector.load %arg2[%c1, %c0_2, %c0_3] : memref<3x96x8xbf16, #tpu.memory_space<vmem>>, vector<1x96x8xbf16>
    %3 = vector.shape_cast %2 : vector<1x96x8xbf16> to vector<96x8xbf16>
    %c2 = arith.constant 2 : index
    %c0_4 = arith.constant 0 : index
    %c0_5 = arith.constant 0 : index
    %4 = vector.load %arg2[%c2, %c0_4, %c0_5] : memref<3x96x8xbf16, #tpu.memory_space<vmem>>, vector<1x96x8xbf16>
    %5 = vector.shape_cast %4 : vector<1x96x8xbf16> to vector<96x8xbf16>
    %c0_6 = arith.constant 0 : index
    %c0_7 = arith.constant 0 : index
    %c0_8 = arith.constant 0 : index
    %c0_9 = arith.constant 0 : index
    %6 = vector.load %arg1[%c0_6, %c0_7, %c0_8, %c0_9] : memref<1x6x6x32xbf16, #tpu.memory_space<vmem>>, vector<1x1x6x32xbf16>
    %7 = vector.shape_cast %6 : vector<1x1x6x32xbf16> to vector<6x32xbf16>
    %c0_10 = arith.constant 0 : index
    %c1_11 = arith.constant 1 : index
    %c0_12 = arith.constant 0 : index
    %c0_13 = arith.constant 0 : index
    %8 = vector.load %arg1[%c0_10, %c1_11, %c0_12, %c0_13] : memref<1x6x6x32xbf16, #tpu.memory_space<vmem>>, vector<1x1x6x32xbf16>
    %9 = vector.shape_cast %8 : vector<1x1x6x32xbf16> to vector<6x32xbf16>
    %c0_14 = arith.constant 0 : index
    %c2_15 = arith.constant 2 : index
    %c0_16 = arith.constant 0 : index
    %c0_17 = arith.constant 0 : index
    %10 = vector.load %arg1[%c0_14, %c2_15, %c0_16, %c0_17] : memref<1x6x6x32xbf16, #tpu.memory_space<vmem>>, vector<1x1x6x32xbf16>
    %11 = vector.shape_cast %10 : vector<1x1x6x32xbf16> to vector<6x32xbf16>
    %c0_18 = arith.constant 0 : index
    %c3 = arith.constant 3 : index
    %c0_19 = arith.constant 0 : index
    %c0_20 = arith.constant 0 : index
    %12 = vector.load %arg1[%c0_18, %c3, %c0_19, %c0_20] : memref<1x6x6x32xbf16, #tpu.memory_space<vmem>>, vector<1x1x6x32xbf16>
    %13 = vector.shape_cast %12 : vector<1x1x6x32xbf16> to vector<6x32xbf16>
    %c0_21 = arith.constant 0 : index
    %c4 = arith.constant 4 : index
    %c0_22 = arith.constant 0 : index
    %c0_23 = arith.constant 0 : index
    %14 = vector.load %arg1[%c0_21, %c4, %c0_22, %c0_23] : memref<1x6x6x32xbf16, #tpu.memory_space<vmem>>, vector<1x1x6x32xbf16>
    %15 = vector.shape_cast %14 : vector<1x1x6x32xbf16> to vector<6x32xbf16>
    %c0_24 = arith.constant 0 : index
    %c5 = arith.constant 5 : index
    %c0_25 = arith.constant 0 : index
    %c0_26 = arith.constant 0 : index
    %16 = vector.load %arg1[%c0_24, %c5, %c0_25, %c0_26] : memref<1x6x6x32xbf16, #tpu.memory_space<vmem>>, vector<1x1x6x32xbf16>
    %17 = vector.shape_cast %16 : vector<1x1x6x32xbf16> to vector<6x32xbf16>
    %cst = arith.constant 0.000000e+00 : f32
    %18 = vector.broadcast %cst : f32 to vector<4x8xf32>
    %19 = vector.extract_strided_slice %7 {offsets = [0, 0], sizes = [4, 32], strides = [1, 1]} : vector<6x32xbf16> to vector<4x32xbf16>
    %20 = vector.extract_strided_slice %7 {offsets = [1, 0], sizes = [4, 32], strides = [1, 1]} : vector<6x32xbf16> to vector<4x32xbf16>
    %21 = vector.extract_strided_slice %7 {offsets = [2, 0], sizes = [4, 32], strides = [1, 1]} : vector<6x32xbf16> to vector<4x32xbf16>
    %22 = tpu.concatenate %19, %20, %21 in 1 : vector<4x32xbf16>, vector<4x32xbf16>, vector<4x32xbf16> -> vector<4x96xbf16>
    %cst_27 = arith.constant dense<0.000000e+00> : vector<4x8xf32>
    %23 = tpu.matmul %22, %1, %cst_27 {dimension_numbers = #tpu.dot_dimension_numbers<[1], [0], [0], [1], [0, 0, 1, 1], [], []>} : vector<4x96xbf16>, vector<96x8xbf16>, vector<4x8xf32> -> vector<4x8xf32>
    %24 = arith.addf %18, %23 : vector<4x8xf32>
    %25 = vector.extract_strided_slice %9 {offsets = [0, 0], sizes = [4, 32], strides = [1, 1]} : vector<6x32xbf16> to vector<4x32xbf16>
    %26 = vector.extract_strided_slice %9 {offsets = [1, 0], sizes = [4, 32], strides = [1, 1]} : vector<6x32xbf16> to vector<4x32xbf16>
    %27 = vector.extract_strided_slice %9 {offsets = [2, 0], sizes = [4, 32], strides = [1, 1]} : vector<6x32xbf16> to vector<4x32xbf16>
    %28 = tpu.concatenate %25, %26, %27 in 1 : vector<4x32xbf16>, vector<4x32xbf16>, vector<4x32xbf16> -> vector<4x96xbf16>
    %cst_28 = arith.constant dense<0.000000e+00> : vector<4x8xf32>
    %29 = tpu.matmul %28, %3, %cst_28 {dimension_numbers = #tpu.dot_dimension_numbers<[1], [0], [0], [1], [0, 0, 1, 1], [], []>} : vector<4x96xbf16>, vector<96x8xbf16>, vector<4x8xf32> -> vector<4x8xf32>
    %30 = arith.addf %24, %29 : vector<4x8xf32>
    %31 = vector.extract_strided_slice %11 {offsets = [0, 0], sizes = [4, 32], strides = [1, 1]} : vector<6x32xbf16> to vector<4x32xbf16>
    %32 = vector.extract_strided_slice %11 {offsets = [1, 0], sizes = [4, 32], strides = [1, 1]} : vector<6x32xbf16> to vector<4x32xbf16>
    %33 = vector.extract_strided_slice %11 {offsets = [2, 0], sizes = [4, 32], strides = [1, 1]} : vector<6x32xbf16> to vector<4x32xbf16>
    %34 = tpu.concatenate %31, %32, %33 in 1 : vector<4x32xbf16>, vector<4x32xbf16>, vector<4x32xbf16> -> vector<4x96xbf16>
    %cst_29 = arith.constant dense<0.000000e+00> : vector<4x8xf32>
    %35 = tpu.matmul %34, %5, %cst_29 {dimension_numbers = #tpu.dot_dimension_numbers<[1], [0], [0], [1], [0, 0, 1, 1], [], []>} : vector<4x96xbf16>, vector<96x8xbf16>, vector<4x8xf32> -> vector<4x8xf32>
    %36 = arith.addf %30, %35 : vector<4x8xf32>
    %c0_30 = arith.constant 0 : index
    %c0_31 = arith.constant 0 : index
    %c0_32 = arith.constant 0 : index
    %c0_33 = arith.constant 0 : index
    %37 = vector.load %arg3[%c0_30, %c0_31, %c0_32, %c0_33] : memref<1x4x4x8xf32, #tpu.memory_space<vmem>>, vector<1x1x4x8xf32>
    %38 = vector.shape_cast %37 : vector<1x1x4x8xf32> to vector<4x8xf32>
    %39 = vector.shape_cast %36 : vector<4x8xf32> to vector<1x1x4x8xf32>
    tpu.vector_store %arg3[%c0_30, %c0_31, %c0_32, %c0_33], %39 {strides = array<i32>} : memref<1x4x4x8xf32, #tpu.memory_space<vmem>>, vector<1x1x4x8xf32>,
    %cst_34 = arith.constant 0.000000e+00 : f32
    %40 = vector.broadcast %cst_34 : f32 to vector<4x8xf32>
    %41 = vector.extract_strided_slice %9 {offsets = [0, 0], sizes = [4, 32], strides = [1, 1]} : vector<6x32xbf16> to vector<4x32xbf16>
    %42 = vector.extract_strided_slice %9 {offsets = [1, 0], sizes = [4, 32], strides = [1, 1]} : vector<6x32xbf16> to vector<4x32xbf16>
    %43 = vector.extract_strided_slice %9 {offsets = [2, 0], sizes = [4, 32], strides = [1, 1]} : vector<6x32xbf16> to vector<4x32xbf16>
    %44 = tpu.concatenate %41, %42, %43 in 1 : vector<4x32xbf16>, vector<4x32xbf16>, vector<4x32xbf16> -> vector<4x96xbf16>
    %cst_35 = arith.constant dense<0.000000e+00> : vector<4x8xf32>
    %45 = tpu.matmul %44, %1, %cst_35 {dimension_numbers = #tpu.dot_dimension_numbers<[1], [0], [0], [1], [0, 0, 1, 1], [], []>} : vector<4x96xbf16>, vector<96x8xbf16>, vector<4x8xf32> -> vector<4x8xf32>
    %46 = arith.addf %40, %45 : vector<4x8xf32>
    %47 = vector.extract_strided_slice %11 {offsets = [0, 0], sizes = [4, 32], strides = [1, 1]} : vector<6x32xbf16> to vector<4x32xbf16>
    %48 = vector.extract_strided_slice %11 {offsets = [1, 0], sizes = [4, 32], strides = [1, 1]} : vector<6x32xbf16> to vector<4x32xbf16>
    %49 = vector.extract_strided_slice %11 {offsets = [2, 0], sizes = [4, 32], strides = [1, 1]} : vector<6x32xbf16> to vector<4x32xbf16>
    %50 = tpu.concatenate %47, %48, %49 in 1 : vector<4x32xbf16>, vector<4x32xbf16>, vector<4x32xbf16> -> vector<4x96xbf16>
    %cst_36 = arith.constant dense<0.000000e+00> : vector<4x8xf32>
    %51 = tpu.matmul %50, %3, %cst_36 {dimension_numbers = #tpu.dot_dimension_numbers<[1], [0], [0], [1], [0, 0, 1, 1], [], []>} : vector<4x96xbf16>, vector<96x8xbf16>, vector<4x8xf32> -> vector<4x8xf32>
    %52 = arith.addf %46, %51 : vector<4x8xf32>
    %53 = vector.extract_strided_slice %13 {offsets = [0, 0], sizes = [4, 32], strides = [1, 1]} : vector<6x32xbf16> to vector<4x32xbf16>
    %54 = vector.extract_strided_slice %13 {offsets = [1, 0], sizes = [4, 32], strides = [1, 1]} : vector<6x32xbf16> to vector<4x32xbf16>
    %55 = vector.extract_strided_slice %13 {offsets = [2, 0], sizes = [4, 32], strides = [1, 1]} : vector<6x32xbf16> to vector<4x32xbf16>
    %56 = tpu.concatenate %53, %54, %55 in 1 : vector<4x32xbf16>, vector<4x32xbf16>, vector<4x32xbf16> -> vector<4x96xbf16>
    %cst_37 = arith.constant dense<0.000000e+00> : vector<4x8xf32>
    %57 = tpu.matmul %56, %5, %cst_37 {dimension_numbers = #tpu.dot_dimension_numbers<[1], [0], [0], [1], [0, 0, 1, 1], [], []>} : vector<4x96xbf16>, vector<96x8xbf16>, vector<4x8xf32> -> vector<4x8xf32>
    %58 = arith.addf %52, %57 : vector<4x8xf32>
    %c0_38 = arith.constant 0 : index
    %c1_39 = arith.constant 1 : index
    %c0_40 = arith.constant 0 : index
    %c0_41 = arith.constant 0 : index
    %59 = vector.load %arg3[%c0_38, %c1_39, %c0_40, %c0_41] : memref<1x4x4x8xf32, #tpu.memory_space<vmem>>, vector<1x1x4x8xf32>
    %60 = vector.shape_cast %59 : vector<1x1x4x8xf32> to vector<4x8xf32>
    %61 = vector.shape_cast %58 : vector<4x8xf32> to vector<1x1x4x8xf32>
    tpu.vector_store %arg3[%c0_38, %c1_39, %c0_40, %c0_41], %61 {strides = array<i32>} : memref<1x4x4x8xf32, #tpu.memory_space<vmem>>, vector<1x1x4x8xf32>,
    %cst_42 = arith.constant 0.000000e+00 : f32
    %62 = vector.broadcast %cst_42 : f32 to vector<4x8xf32>
    %63 = vector.extract_strided_slice %11 {offsets = [0, 0], sizes = [4, 32], strides = [1, 1]} : vector<6x32xbf16> to vector<4x32xbf16>
    %64 = vector.extract_strided_slice %11 {offsets = [1, 0], sizes = [4, 32], strides = [1, 1]} : vector<6x32xbf16> to vector<4x32xbf16>
    %65 = vector.extract_strided_slice %11 {offsets = [2, 0], sizes = [4, 32], strides = [1, 1]} : vector<6x32xbf16> to vector<4x32xbf16>
    %66 = tpu.concatenate %63, %64, %65 in 1 : vector<4x32xbf16>, vector<4x32xbf16>, vector<4x32xbf16> -> vector<4x96xbf16>
    %cst_43 = arith.constant dense<0.000000e+00> : vector<4x8xf32>
    %67 = tpu.matmul %66, %1, %cst_43 {dimension_numbers = #tpu.dot_dimension_numbers<[1], [0], [0], [1], [0, 0, 1, 1], [], []>} : vector<4x96xbf16>, vector<96x8xbf16>, vector<4x8xf32> -> vector<4x8xf32>
    %68 = arith.addf %62, %67 : vector<4x8xf32>
    %69 = vector.extract_strided_slice %13 {offsets = [0, 0], sizes = [4, 32], strides = [1, 1]} : vector<6x32xbf16> to vector<4x32xbf16>
    %70 = vector.extract_strided_slice %13 {offsets = [1, 0], sizes = [4, 32], strides = [1, 1]} : vector<6x32xbf16> to vector<4x32xbf16>
    %71 = vector.extract_strided_slice %13 {offsets = [2, 0], sizes = [4, 32], strides = [1, 1]} : vector<6x32xbf16> to vector<4x32xbf16>
    %72 = tpu.concatenate %69, %70, %71 in 1 : vector<4x32xbf16>, vector<4x32xbf16>, vector<4x32xbf16> -> vector<4x96xbf16>
    %cst_44 = arith.constant dense<0.000000e+00> : vector<4x8xf32>
    %73 = tpu.matmul %72, %3, %cst_44 {dimension_numbers = #tpu.dot_dimension_numbers<[1], [0], [0], [1], [0, 0, 1, 1], [], []>} : vector<4x96xbf16>, vector<96x8xbf16>, vector<4x8xf32> -> vector<4x8xf32>
    %74 = arith.addf %68, %73 : vector<4x8xf32>
    %75 = vector.extract_strided_slice %15 {offsets = [0, 0], sizes = [4, 32], strides = [1, 1]} : vector<6x32xbf16> to vector<4x32xbf16>
    %76 = vector.extract_strided_slice %15 {offsets = [1, 0], sizes = [4, 32], strides = [1, 1]} : vector<6x32xbf16> to vector<4x32xbf16>
    %77 = vector.extract_strided_slice %15 {offsets = [2, 0], sizes = [4, 32], strides = [1, 1]} : vector<6x32xbf16> to vector<4x32xbf16>
    %78 = tpu.concatenate %75, %76, %77 in 1 : vector<4x32xbf16>, vector<4x32xbf16>, vector<4x32xbf16> -> vector<4x96xbf16>
    %cst_45 = arith.constant dense<0.000000e+00> : vector<4x8xf32>
    %79 = tpu.matmul %78, %5, %cst_45 {dimension_numbers = #tpu.dot_dimension_numbers<[1], [0], [0], [1], [0, 0, 1, 1], [], []>} : vector<4x96xbf16>, vector<96x8xbf16>, vector<4x8xf32> -> vector<4x8xf32>
    %80 = arith.addf %74, %79 : vector<4x8xf32>
    %c0_46 = arith.constant 0 : index
    %c2_47 = arith.constant 2 : index
    %c0_48 = arith.constant 0 : index
    %c0_49 = arith.constant 0 : index
    %81 = vector.load %arg3[%c0_46, %c2_47, %c0_48, %c0_49] : memref<1x4x4x8xf32, #tpu.memory_space<vmem>>, vector<1x1x4x8xf32>
    %82 = vector.shape_cast %81 : vector<1x1x4x8xf32> to vector<4x8xf32>
    %83 = vector.shape_cast %80 : vector<4x8xf32> to vector<1x1x4x8xf32>
    tpu.vector_store %arg3[%c0_46, %c2_47, %c0_48, %c0_49], %83 {strides = array<i32>} : memref<1x4x4x8xf32, #tpu.memory_space<vmem>>, vector<1x1x4x8xf32>,
    %cst_50 = arith.constant 0.000000e+00 : f32
    %84 = vector.broadcast %cst_50 : f32 to vector<4x8xf32>
    %85 = vector.extract_strided_slice %13 {offsets = [0, 0], sizes = [4, 32], strides = [1, 1]} : vector<6x32xbf16> to vector<4x32xbf16>
    %86 = vector.extract_strided_slice %13 {offsets = [1, 0], sizes = [4, 32], strides = [1, 1]} : vector<6x32xbf16> to vector<4x32xbf16>
    %87 = vector.extract_strided_slice %13 {offsets = [2, 0], sizes = [4, 32], strides = [1, 1]} : vector<6x32xbf16> to vector<4x32xbf16>
    %88 = tpu.concatenate %85, %86, %87 in 1 : vector<4x32xbf16>, vector<4x32xbf16>, vector<4x32xbf16> -> vector<4x96xbf16>
    %cst_51 = arith.constant dense<0.000000e+00> : vector<4x8xf32>
    %89 = tpu.matmul %88, %1, %cst_51 {dimension_numbers = #tpu.dot_dimension_numbers<[1], [0], [0], [1], [0, 0, 1, 1], [], []>} : vector<4x96xbf16>, vector<96x8xbf16>, vector<4x8xf32> -> vector<4x8xf32>
    %90 = arith.addf %84, %89 : vector<4x8xf32>
    %91 = vector.extract_strided_slice %15 {offsets = [0, 0], sizes = [4, 32], strides = [1, 1]} : vector<6x32xbf16> to vector<4x32xbf16>
    %92 = vector.extract_strided_slice %15 {offsets = [1, 0], sizes = [4, 32], strides = [1, 1]} : vector<6x32xbf16> to vector<4x32xbf16>
    %93 = vector.extract_strided_slice %15 {offsets = [2, 0], sizes = [4, 32], strides = [1, 1]} : vector<6x32xbf16> to vector<4x32xbf16>
    %94 = tpu.concatenate %91, %92, %93 in 1 : vector<4x32xbf16>, vector<4x32xbf16>, vector<4x32xbf16> -> vector<4x96xbf16>
    %cst_52 = arith.constant dense<0.000000e+00> : vector<4x8xf32>
    %95 = tpu.matmul %94, %3, %cst_52 {dimension_numbers = #tpu.dot_dimension_numbers<[1], [0], [0], [1], [0, 0, 1, 1], [], []>} : vector<4x96xbf16>, vector<96x8xbf16>, vector<4x8xf32> -> vector<4x8xf32>
    %96 = arith.addf %90, %95 : vector<4x8xf32>
    %97 = vector.extract_strided_slice %17 {offsets = [0, 0], sizes = [4, 32], strides = [1, 1]} : vector<6x32xbf16> to vector<4x32xbf16>
    %98 = vector.extract_strided_slice %17 {offsets = [1, 0], sizes = [4, 32], strides = [1, 1]} : vector<6x32xbf16> to vector<4x32xbf16>
    %99 = vector.extract_strided_slice %17 {offsets = [2, 0], sizes = [4, 32], strides = [1, 1]} : vector<6x32xbf16> to vector<4x32xbf16>
    %100 = tpu.concatenate %97, %98, %99 in 1 : vector<4x32xbf16>, vector<4x32xbf16>, vector<4x32xbf16> -> vector<4x96xbf16>
    %cst_53 = arith.constant dense<0.000000e+00> : vector<4x8xf32>
    %101 = tpu.matmul %100, %5, %cst_53 {dimension_numbers = #tpu.dot_dimension_numbers<[1], [0], [0], [1], [0, 0, 1, 1], [], []>} : vector<4x96xbf16>, vector<96x8xbf16>, vector<4x8xf32> -> vector<4x8xf32>
    %102 = arith.addf %96, %101 : vector<4x8xf32>
    %c0_54 = arith.constant 0 : index
    %c3_55 = arith.constant 3 : index
    %c0_56 = arith.constant 0 : index
    %c0_57 = arith.constant 0 : index
    %103 = vector.load %arg3[%c0_54, %c3_55, %c0_56, %c0_57] : memref<1x4x4x8xf32, #tpu.memory_space<vmem>>, vector<1x1x4x8xf32>
    %104 = vector.shape_cast %103 : vector<1x1x4x8xf32> to vector<4x8xf32>
    %105 = vector.shape_cast %102 : vector<4x8xf32> to vector<1x1x4x8xf32>
    tpu.vector_store %arg3[%c0_54, %c3_55, %c0_56, %c0_57], %105 {strides = array<i32>} : memref<1x4x4x8xf32, #tpu.memory_space<vmem>>, vector<1x1x4x8xf32>,
    return
  }
  func.func @transform_0(%arg0: i32) -> (i32, i32, i32, i32) {
    %c0_i32 = arith.constant 0 : i32
    %c0_i32_0 = arith.constant 0 : i32
    %c0_i32_1 = arith.constant 0 : i32
    %c0_i32_2 = arith.constant 0 : i32
    return %arg0, %c0_i32, %c0_i32_0, %c0_i32_1 : i32, i32, i32, i32
  }
  func.func @transform_1(%arg0: i32) -> (i32, i32, i32) {
    %c0_i32 = arith.constant 0 : i32
    %c0_i32_0 = arith.constant 0 : i32
    %c0_i32_1 = arith.constant 0 : i32
    %c0_i32_2 = arith.constant 0 : i32
    return %c0_i32, %c0_i32_0, %c0_i32_1 : i32, i32, i32
  }
  func.func @transform_2(%arg0: i32) -> (i32, i32, i32, i32) {
    %c0_i32 = arith.constant 0 : i32
    %c0_i32_0 = arith.constant 0 : i32
    %c0_i32_1 = arith.constant 0 : i32
    %c0_i32_2 = arith.constant 0 : i32
    return %arg0, %c0_i32, %c0_i32_0, %c0_i32_1 : i32, i32, i32, i32
  }
}

module attributes {stable_mosaic.version = 11 : i64} {
  func.func @_bn_relu_matmul_kernel(%arg0: i32, %arg1: memref<16x32xf32, #tpu.memory_space<vmem>>, %arg2: memref<1x32xf32, #tpu.memory_space<vmem>>, %arg3: memref<1x32xf32, #tpu.memory_space<vmem>>, %arg4: memref<32x16xbf16, #tpu.memory_space<vmem>>, %arg5: memref<16x16xf32, #tpu.memory_space<vmem>>) attributes {dimension_semantics = [#tpu.dimension_semantics<parallel>], iteration_bounds = array<i64: 2>, scalar_prefetch = 0 : i64, scratch_operands = 0 : i64, tpu.core_type = #tpu.core_type<tc>, window_params = [{transform_indices = @transform_0, window_bounds = array<i64: 16, 32>}, {pipeline_mode = #tpu.pipeline_mode<synchronous>, transform_indices = @transform_1, window_bounds = array<i64: 1, 32>}, {pipeline_mode = #tpu.pipeline_mode<synchronous>, transform_indices = @transform_2, window_bounds = array<i64: 1, 32>}, {pipeline_mode = #tpu.pipeline_mode<synchronous>, transform_indices = @transform_3, window_bounds = array<i64: 32, 16>}, {transform_indices = @transform_4, window_bounds = array<i64: 16, 16>}]} {
    %c0 = arith.constant 0 : index
    %c0_0 = arith.constant 0 : index
    %0 = vector.load %arg1[%c0, %c0_0] : memref<16x32xf32, #tpu.memory_space<vmem>>, vector<16x32xf32>
    %c0_1 = arith.constant 0 : index
    %c0_2 = arith.constant 0 : index
    %1 = vector.load %arg2[%c0_1, %c0_2] : memref<1x32xf32, #tpu.memory_space<vmem>>, vector<1x32xf32>
    %2 = vector.broadcast %1 : vector<1x32xf32> to vector<16x32xf32>
    %3 = arith.mulf %0, %2 : vector<16x32xf32>
    %c0_3 = arith.constant 0 : index
    %c0_4 = arith.constant 0 : index
    %4 = vector.load %arg3[%c0_3, %c0_4] : memref<1x32xf32, #tpu.memory_space<vmem>>, vector<1x32xf32>
    %5 = vector.broadcast %4 : vector<1x32xf32> to vector<16x32xf32>
    %6 = arith.addf %3, %5 : vector<16x32xf32>
    %cst = arith.constant 0.000000e+00 : f32
    %7 = vector.broadcast %cst : f32 to vector<16x32xf32>
    %8 = arith.maximumf %6, %7 : vector<16x32xf32>
    %9 = arith.truncf %8 : vector<16x32xf32> to vector<16x32xbf16>
    %c0_5 = arith.constant 0 : index
    %c0_6 = arith.constant 0 : index
    %10 = vector.load %arg4[%c0_5, %c0_6] : memref<32x16xbf16, #tpu.memory_space<vmem>>, vector<32x16xbf16>
    %cst_7 = arith.constant dense<0.000000e+00> : vector<16x16xf32>
    %11 = tpu.matmul %9, %10, %cst_7 {dimension_numbers = #tpu.dot_dimension_numbers<[1], [0], [0], [1], [0, 0, 1, 1], [], []>} : vector<16x32xbf16>, vector<32x16xbf16>, vector<16x16xf32> -> vector<16x16xf32>
    %c0_8 = arith.constant 0 : index
    %c0_9 = arith.constant 0 : index
    %12 = vector.load %arg5[%c0_8, %c0_9] : memref<16x16xf32, #tpu.memory_space<vmem>>, vector<16x16xf32>
    tpu.vector_store %arg5[%c0_8, %c0_9], %11 {strides = array<i32>} : memref<16x16xf32, #tpu.memory_space<vmem>>, vector<16x16xf32>,
    return
  }
  func.func @transform_0(%arg0: i32) -> (i32, i32) {
    %c0_i32 = arith.constant 0 : i32
    %c0_i32_0 = arith.constant 0 : i32
    return %arg0, %c0_i32 : i32, i32
  }
  func.func @transform_1(%arg0: i32) -> (i32, i32) {
    %c0_i32 = arith.constant 0 : i32
    %c0_i32_0 = arith.constant 0 : i32
    %c0_i32_1 = arith.constant 0 : i32
    return %c0_i32, %c0_i32_0 : i32, i32
  }
  func.func @transform_2(%arg0: i32) -> (i32, i32) {
    %c0_i32 = arith.constant 0 : i32
    %c0_i32_0 = arith.constant 0 : i32
    %c0_i32_1 = arith.constant 0 : i32
    return %c0_i32, %c0_i32_0 : i32, i32
  }
  func.func @transform_3(%arg0: i32) -> (i32, i32) {
    %c0_i32 = arith.constant 0 : i32
    %c0_i32_0 = arith.constant 0 : i32
    %c0_i32_1 = arith.constant 0 : i32
    return %c0_i32, %c0_i32_0 : i32, i32
  }
  func.func @transform_4(%arg0: i32) -> (i32, i32) {
    %c0_i32 = arith.constant 0 : i32
    %c0_i32_0 = arith.constant 0 : i32
    return %arg0, %c0_i32 : i32, i32
  }
}

module attributes {stable_mosaic.version = 11 : i64} {
  func.func @_bneck_1x1_kernel(%arg0: i32, %arg1: memref<8x32xf32, #tpu.memory_space<vmem>>, %arg2: memref<1x32xf32, #tpu.memory_space<vmem>>, %arg3: memref<1x32xf32, #tpu.memory_space<vmem>>, %arg4: memref<32x32xbf16, #tpu.memory_space<vmem>>, %arg5: memref<1x32xf32, #tpu.memory_space<vmem>>, %arg6: memref<1x32xf32, #tpu.memory_space<vmem>>, %arg7: memref<8x32xbf16, #tpu.memory_space<vmem>>) attributes {dimension_semantics = [#tpu.dimension_semantics<parallel>], iteration_bounds = array<i64: 1>, scalar_prefetch = 0 : i64, scratch_operands = 0 : i64, tpu.core_type = #tpu.core_type<tc>, window_params = [{transform_indices = @transform_0, window_bounds = array<i64: 8, 32>}, {pipeline_mode = #tpu.pipeline_mode<synchronous>, transform_indices = @transform_1, window_bounds = array<i64: 1, 32>}, {pipeline_mode = #tpu.pipeline_mode<synchronous>, transform_indices = @transform_2, window_bounds = array<i64: 1, 32>}, {pipeline_mode = #tpu.pipeline_mode<synchronous>, transform_indices = @transform_3, window_bounds = array<i64: 32, 32>}, {pipeline_mode = #tpu.pipeline_mode<synchronous>, transform_indices = @transform_4, window_bounds = array<i64: 1, 32>}, {pipeline_mode = #tpu.pipeline_mode<synchronous>, transform_indices = @transform_5, window_bounds = array<i64: 1, 32>}, {transform_indices = @transform_6, window_bounds = array<i64: 8, 32>}]} {
    %c0 = arith.constant 0 : index
    %c0_0 = arith.constant 0 : index
    %0 = vector.load %arg1[%c0, %c0_0] : memref<8x32xf32, #tpu.memory_space<vmem>>, vector<8x32xf32>
    %c0_1 = arith.constant 0 : index
    %c0_2 = arith.constant 0 : index
    %1 = vector.load %arg2[%c0_1, %c0_2] : memref<1x32xf32, #tpu.memory_space<vmem>>, vector<1x32xf32>
    %2 = vector.broadcast %1 : vector<1x32xf32> to vector<8x32xf32>
    %3 = arith.mulf %0, %2 : vector<8x32xf32>
    %c0_3 = arith.constant 0 : index
    %c0_4 = arith.constant 0 : index
    %4 = vector.load %arg3[%c0_3, %c0_4] : memref<1x32xf32, #tpu.memory_space<vmem>>, vector<1x32xf32>
    %5 = vector.broadcast %4 : vector<1x32xf32> to vector<8x32xf32>
    %6 = arith.addf %3, %5 : vector<8x32xf32>
    %cst = arith.constant 0.000000e+00 : f32
    %7 = vector.broadcast %cst : f32 to vector<8x32xf32>
    %8 = arith.maximumf %6, %7 : vector<8x32xf32>
    %9 = arith.truncf %8 : vector<8x32xf32> to vector<8x32xbf16>
    %c0_5 = arith.constant 0 : index
    %c0_6 = arith.constant 0 : index
    %10 = vector.load %arg4[%c0_5, %c0_6] : memref<32x32xbf16, #tpu.memory_space<vmem>>, vector<32x32xbf16>
    %cst_7 = arith.constant dense<0.000000e+00> : vector<8x32xf32>
    %11 = tpu.matmul %9, %10, %cst_7 {dimension_numbers = #tpu.dot_dimension_numbers<[1], [0], [0], [1], [0, 0, 1, 1], [], []>} : vector<8x32xbf16>, vector<32x32xbf16>, vector<8x32xf32> -> vector<8x32xf32>
    %c0_8 = arith.constant 0 : index
    %c0_9 = arith.constant 0 : index
    %12 = vector.load %arg5[%c0_8, %c0_9] : memref<1x32xf32, #tpu.memory_space<vmem>>, vector<1x32xf32>
    %13 = vector.broadcast %12 : vector<1x32xf32> to vector<8x32xf32>
    %14 = arith.mulf %11, %13 : vector<8x32xf32>
    %c0_10 = arith.constant 0 : index
    %c0_11 = arith.constant 0 : index
    %15 = vector.load %arg6[%c0_10, %c0_11] : memref<1x32xf32, #tpu.memory_space<vmem>>, vector<1x32xf32>
    %16 = vector.broadcast %15 : vector<1x32xf32> to vector<8x32xf32>
    %17 = arith.addf %14, %16 : vector<8x32xf32>
    %cst_12 = arith.constant 0.000000e+00 : f32
    %18 = vector.broadcast %cst_12 : f32 to vector<8x32xf32>
    %19 = arith.maximumf %17, %18 : vector<8x32xf32>
    %20 = arith.truncf %19 : vector<8x32xf32> to vector<8x32xbf16>
    %c0_13 = arith.constant 0 : index
    %c0_14 = arith.constant 0 : index
    %21 = vector.load %arg7[%c0_13, %c0_14] : memref<8x32xbf16, #tpu.memory_space<vmem>>, vector<8x32xbf16>
    tpu.vector_store %arg7[%c0_13, %c0_14], %20 {strides = array<i32>} : memref<8x32xbf16, #tpu.memory_space<vmem>>, vector<8x32xbf16>,
    return
  }
  func.func @transform_0(%arg0: i32) -> (i32, i32) {
    %c0_i32 = arith.constant 0 : i32
    %c0_i32_0 = arith.constant 0 : i32
    return %arg0, %c0_i32 : i32, i32
  }
  func.func @transform_1(%arg0: i32) -> (i32, i32) {
    %c0_i32 = arith.constant 0 : i32
    %c0_i32_0 = arith.constant 0 : i32
    %c0_i32_1 = arith.constant 0 : i32
    return %c0_i32, %c0_i32_0 : i32, i32
  }
  func.func @transform_2(%arg0: i32) -> (i32, i32) {
    %c0_i32 = arith.constant 0 : i32
    %c0_i32_0 = arith.constant 0 : i32
    %c0_i32_1 = arith.constant 0 : i32
    return %c0_i32, %c0_i32_0 : i32, i32
  }
  func.func @transform_3(%arg0: i32) -> (i32, i32) {
    %c0_i32 = arith.constant 0 : i32
    %c0_i32_0 = arith.constant 0 : i32
    %c0_i32_1 = arith.constant 0 : i32
    return %c0_i32, %c0_i32_0 : i32, i32
  }
  func.func @transform_4(%arg0: i32) -> (i32, i32) {
    %c0_i32 = arith.constant 0 : i32
    %c0_i32_0 = arith.constant 0 : i32
    %c0_i32_1 = arith.constant 0 : i32
    return %c0_i32, %c0_i32_0 : i32, i32
  }
  func.func @transform_5(%arg0: i32) -> (i32, i32) {
    %c0_i32 = arith.constant 0 : i32
    %c0_i32_0 = arith.constant 0 : i32
    %c0_i32_1 = arith.constant 0 : i32
    return %c0_i32, %c0_i32_0 : i32, i32
  }
  func.func @transform_6(%arg0: i32) -> (i32, i32) {
    %c0_i32 = arith.constant 0 : i32
    %c0_i32_0 = arith.constant 0 : i32
    return %arg0, %c0_i32 : i32, i32
  }
}

module attributes {stable_mosaic.version = 11 : i64} {
  func.func @_conv3x3_kernel(%arg0: i32, %arg1: memref<1x4x4x32xbf16, #tpu.memory_space<vmem>>, %arg2: memref<3x96x8xbf16, #tpu.memory_space<vmem>>, %arg3: memref<1x2x2x8xf32, #tpu.memory_space<vmem>>) attributes {dimension_semantics = [#tpu.dimension_semantics<parallel>], iteration_bounds = array<i64: 2>, scalar_prefetch = 0 : i64, scratch_operands = 0 : i64, tpu.core_type = #tpu.core_type<tc>, window_params = [{transform_indices = @transform_0, window_bounds = array<i64: 1, 4, 4, 32>}, {pipeline_mode = #tpu.pipeline_mode<synchronous>, transform_indices = @transform_1, window_bounds = array<i64: 3, 96, 8>}, {transform_indices = @transform_2, window_bounds = array<i64: 1, 2, 2, 8>}]} {
    %c0 = arith.constant 0 : index
    %c0_0 = arith.constant 0 : index
    %c0_1 = arith.constant 0 : index
    %0 = vector.load %arg2[%c0, %c0_0, %c0_1] : memref<3x96x8xbf16, #tpu.memory_space<vmem>>, vector<1x96x8xbf16>
    %1 = vector.shape_cast %0 : vector<1x96x8xbf16> to vector<96x8xbf16>
    %c1 = arith.constant 1 : index
    %c0_2 = arith.constant 0 : index
    %c0_3 = arith.constant 0 : index
    %2 = vector.load %arg2[%c1, %c0_2, %c0_3] : memref<3x96x8xbf16, #tpu.memory_space<vmem>>, vector<1x96x8xbf16>
    %3 = vector.shape_cast %2 : vector<1x96x8xbf16> to vector<96x8xbf16>
    %c2 = arith.constant 2 : index
    %c0_4 = arith.constant 0 : index
    %c0_5 = arith.constant 0 : index
    %4 = vector.load %arg2[%c2, %c0_4, %c0_5] : memref<3x96x8xbf16, #tpu.memory_space<vmem>>, vector<1x96x8xbf16>
    %5 = vector.shape_cast %4 : vector<1x96x8xbf16> to vector<96x8xbf16>
    %c0_6 = arith.constant 0 : index
    %c0_7 = arith.constant 0 : index
    %c0_8 = arith.constant 0 : index
    %c0_9 = arith.constant 0 : index
    %6 = vector.load %arg1[%c0_6, %c0_7, %c0_8, %c0_9] : memref<1x4x4x32xbf16, #tpu.memory_space<vmem>>, vector<1x1x4x32xbf16>
    %7 = vector.shape_cast %6 : vector<1x1x4x32xbf16> to vector<4x32xbf16>
    %c0_10 = arith.constant 0 : index
    %c1_11 = arith.constant 1 : index
    %c0_12 = arith.constant 0 : index
    %c0_13 = arith.constant 0 : index
    %8 = vector.load %arg1[%c0_10, %c1_11, %c0_12, %c0_13] : memref<1x4x4x32xbf16, #tpu.memory_space<vmem>>, vector<1x1x4x32xbf16>
    %9 = vector.shape_cast %8 : vector<1x1x4x32xbf16> to vector<4x32xbf16>
    %c0_14 = arith.constant 0 : index
    %c2_15 = arith.constant 2 : index
    %c0_16 = arith.constant 0 : index
    %c0_17 = arith.constant 0 : index
    %10 = vector.load %arg1[%c0_14, %c2_15, %c0_16, %c0_17] : memref<1x4x4x32xbf16, #tpu.memory_space<vmem>>, vector<1x1x4x32xbf16>
    %11 = vector.shape_cast %10 : vector<1x1x4x32xbf16> to vector<4x32xbf16>
    %c0_18 = arith.constant 0 : index
    %c3 = arith.constant 3 : index
    %c0_19 = arith.constant 0 : index
    %c0_20 = arith.constant 0 : index
    %12 = vector.load %arg1[%c0_18, %c3, %c0_19, %c0_20] : memref<1x4x4x32xbf16, #tpu.memory_space<vmem>>, vector<1x1x4x32xbf16>
    %13 = vector.shape_cast %12 : vector<1x1x4x32xbf16> to vector<4x32xbf16>
    %cst = arith.constant 0.000000e+00 : f32
    %14 = vector.broadcast %cst : f32 to vector<2x8xf32>
    %15 = vector.extract_strided_slice %7 {offsets = [0, 0], sizes = [2, 32], strides = [1, 1]} : vector<4x32xbf16> to vector<2x32xbf16>
    %16 = vector.extract_strided_slice %7 {offsets = [1, 0], sizes = [2, 32], strides = [1, 1]} : vector<4x32xbf16> to vector<2x32xbf16>
    %17 = vector.extract_strided_slice %7 {offsets = [2, 0], sizes = [2, 32], strides = [1, 1]} : vector<4x32xbf16> to vector<2x32xbf16>
    %18 = tpu.concatenate %15, %16, %17 in 1 : vector<2x32xbf16>, vector<2x32xbf16>, vector<2x32xbf16> -> vector<2x96xbf16>
    %cst_21 = arith.constant dense<0.000000e+00> : vector<2x8xf32>
    %19 = tpu.matmul %18, %1, %cst_21 {dimension_numbers = #tpu.dot_dimension_numbers<[1], [0], [0], [1], [0, 0, 1, 1], [], []>} : vector<2x96xbf16>, vector<96x8xbf16>, vector<2x8xf32> -> vector<2x8xf32>
    %20 = arith.addf %14, %19 : vector<2x8xf32>
    %21 = vector.extract_strided_slice %9 {offsets = [0, 0], sizes = [2, 32], strides = [1, 1]} : vector<4x32xbf16> to vector<2x32xbf16>
    %22 = vector.extract_strided_slice %9 {offsets = [1, 0], sizes = [2, 32], strides = [1, 1]} : vector<4x32xbf16> to vector<2x32xbf16>
    %23 = vector.extract_strided_slice %9 {offsets = [2, 0], sizes = [2, 32], strides = [1, 1]} : vector<4x32xbf16> to vector<2x32xbf16>
    %24 = tpu.concatenate %21, %22, %23 in 1 : vector<2x32xbf16>, vector<2x32xbf16>, vector<2x32xbf16> -> vector<2x96xbf16>
    %cst_22 = arith.constant dense<0.000000e+00> : vector<2x8xf32>
    %25 = tpu.matmul %24, %3, %cst_22 {dimension_numbers = #tpu.dot_dimension_numbers<[1], [0], [0], [1], [0, 0, 1, 1], [], []>} : vector<2x96xbf16>, vector<96x8xbf16>, vector<2x8xf32> -> vector<2x8xf32>
    %26 = arith.addf %20, %25 : vector<2x8xf32>
    %27 = vector.extract_strided_slice %11 {offsets = [0, 0], sizes = [2, 32], strides = [1, 1]} : vector<4x32xbf16> to vector<2x32xbf16>
    %28 = vector.extract_strided_slice %11 {offsets = [1, 0], sizes = [2, 32], strides = [1, 1]} : vector<4x32xbf16> to vector<2x32xbf16>
    %29 = vector.extract_strided_slice %11 {offsets = [2, 0], sizes = [2, 32], strides = [1, 1]} : vector<4x32xbf16> to vector<2x32xbf16>
    %30 = tpu.concatenate %27, %28, %29 in 1 : vector<2x32xbf16>, vector<2x32xbf16>, vector<2x32xbf16> -> vector<2x96xbf16>
    %cst_23 = arith.constant dense<0.000000e+00> : vector<2x8xf32>
    %31 = tpu.matmul %30, %5, %cst_23 {dimension_numbers = #tpu.dot_dimension_numbers<[1], [0], [0], [1], [0, 0, 1, 1], [], []>} : vector<2x96xbf16>, vector<96x8xbf16>, vector<2x8xf32> -> vector<2x8xf32>
    %32 = arith.addf %26, %31 : vector<2x8xf32>
    %c0_24 = arith.constant 0 : index
    %c0_25 = arith.constant 0 : index
    %c0_26 = arith.constant 0 : index
    %c0_27 = arith.constant 0 : index
    %33 = vector.load %arg3[%c0_24, %c0_25, %c0_26, %c0_27] : memref<1x2x2x8xf32, #tpu.memory_space<vmem>>, vector<1x1x2x8xf32>
    %34 = vector.shape_cast %33 : vector<1x1x2x8xf32> to vector<2x8xf32>
    %35 = vector.shape_cast %32 : vector<2x8xf32> to vector<1x1x2x8xf32>
    tpu.vector_store %arg3[%c0_24, %c0_25, %c0_26, %c0_27], %35 {strides = array<i32>} : memref<1x2x2x8xf32, #tpu.memory_space<vmem>>, vector<1x1x2x8xf32>,
    %cst_28 = arith.constant 0.000000e+00 : f32
    %36 = vector.broadcast %cst_28 : f32 to vector<2x8xf32>
    %37 = vector.extract_strided_slice %9 {offsets = [0, 0], sizes = [2, 32], strides = [1, 1]} : vector<4x32xbf16> to vector<2x32xbf16>
    %38 = vector.extract_strided_slice %9 {offsets = [1, 0], sizes = [2, 32], strides = [1, 1]} : vector<4x32xbf16> to vector<2x32xbf16>
    %39 = vector.extract_strided_slice %9 {offsets = [2, 0], sizes = [2, 32], strides = [1, 1]} : vector<4x32xbf16> to vector<2x32xbf16>
    %40 = tpu.concatenate %37, %38, %39 in 1 : vector<2x32xbf16>, vector<2x32xbf16>, vector<2x32xbf16> -> vector<2x96xbf16>
    %cst_29 = arith.constant dense<0.000000e+00> : vector<2x8xf32>
    %41 = tpu.matmul %40, %1, %cst_29 {dimension_numbers = #tpu.dot_dimension_numbers<[1], [0], [0], [1], [0, 0, 1, 1], [], []>} : vector<2x96xbf16>, vector<96x8xbf16>, vector<2x8xf32> -> vector<2x8xf32>
    %42 = arith.addf %36, %41 : vector<2x8xf32>
    %43 = vector.extract_strided_slice %11 {offsets = [0, 0], sizes = [2, 32], strides = [1, 1]} : vector<4x32xbf16> to vector<2x32xbf16>
    %44 = vector.extract_strided_slice %11 {offsets = [1, 0], sizes = [2, 32], strides = [1, 1]} : vector<4x32xbf16> to vector<2x32xbf16>
    %45 = vector.extract_strided_slice %11 {offsets = [2, 0], sizes = [2, 32], strides = [1, 1]} : vector<4x32xbf16> to vector<2x32xbf16>
    %46 = tpu.concatenate %43, %44, %45 in 1 : vector<2x32xbf16>, vector<2x32xbf16>, vector<2x32xbf16> -> vector<2x96xbf16>
    %cst_30 = arith.constant dense<0.000000e+00> : vector<2x8xf32>
    %47 = tpu.matmul %46, %3, %cst_30 {dimension_numbers = #tpu.dot_dimension_numbers<[1], [0], [0], [1], [0, 0, 1, 1], [], []>} : vector<2x96xbf16>, vector<96x8xbf16>, vector<2x8xf32> -> vector<2x8xf32>
    %48 = arith.addf %42, %47 : vector<2x8xf32>
    %49 = vector.extract_strided_slice %13 {offsets = [0, 0], sizes = [2, 32], strides = [1, 1]} : vector<4x32xbf16> to vector<2x32xbf16>
    %50 = vector.extract_strided_slice %13 {offsets = [1, 0], sizes = [2, 32], strides = [1, 1]} : vector<4x32xbf16> to vector<2x32xbf16>
    %51 = vector.extract_strided_slice %13 {offsets = [2, 0], sizes = [2, 32], strides = [1, 1]} : vector<4x32xbf16> to vector<2x32xbf16>
    %52 = tpu.concatenate %49, %50, %51 in 1 : vector<2x32xbf16>, vector<2x32xbf16>, vector<2x32xbf16> -> vector<2x96xbf16>
    %cst_31 = arith.constant dense<0.000000e+00> : vector<2x8xf32>
    %53 = tpu.matmul %52, %5, %cst_31 {dimension_numbers = #tpu.dot_dimension_numbers<[1], [0], [0], [1], [0, 0, 1, 1], [], []>} : vector<2x96xbf16>, vector<96x8xbf16>, vector<2x8xf32> -> vector<2x8xf32>
    %54 = arith.addf %48, %53 : vector<2x8xf32>
    %c0_32 = arith.constant 0 : index
    %c1_33 = arith.constant 1 : index
    %c0_34 = arith.constant 0 : index
    %c0_35 = arith.constant 0 : index
    %55 = vector.load %arg3[%c0_32, %c1_33, %c0_34, %c0_35] : memref<1x2x2x8xf32, #tpu.memory_space<vmem>>, vector<1x1x2x8xf32>
    %56 = vector.shape_cast %55 : vector<1x1x2x8xf32> to vector<2x8xf32>
    %57 = vector.shape_cast %54 : vector<2x8xf32> to vector<1x1x2x8xf32>
    tpu.vector_store %arg3[%c0_32, %c1_33, %c0_34, %c0_35], %57 {strides = array<i32>} : memref<1x2x2x8xf32, #tpu.memory_space<vmem>>, vector<1x1x2x8xf32>,
    return
  }
  func.func @transform_0(%arg0: i32) -> (i32, i32, i32, i32) {
    %c0_i32 = arith.constant 0 : i32
    %c0_i32_0 = arith.constant 0 : i32
    %c0_i32_1 = arith.constant 0 : i32
    %c0_i32_2 = arith.constant 0 : i32
    return %arg0, %c0_i32, %c0_i32_0, %c0_i32_1 : i32, i32, i32, i32
  }
  func.func @transform_1(%arg0: i32) -> (i32, i32, i32) {
    %c0_i32 = arith.constant 0 : i32
    %c0_i32_0 = arith.constant 0 : i32
    %c0_i32_1 = arith.constant 0 : i32
    %c0_i32_2 = arith.constant 0 : i32
    return %c0_i32, %c0_i32_0, %c0_i32_1 : i32, i32, i32
  }
  func.func @transform_2(%arg0: i32) -> (i32, i32, i32, i32) {
    %c0_i32 = arith.constant 0 : i32
    %c0_i32_0 = arith.constant 0 : i32
    %c0_i32_1 = arith.constant 0 : i32
    %c0_i32_2 = arith.constant 0 : i32
    return %arg0, %c0_i32, %c0_i32_0, %c0_i32_1 : i32, i32, i32, i32
  }
}

module attributes {stable_mosaic.version = 11 : i64} {
  func.func @_bn_relu_matmul_kernel(%arg0: i32, %arg1: memref<8x32xf32, #tpu.memory_space<vmem>>, %arg2: memref<1x32xf32, #tpu.memory_space<vmem>>, %arg3: memref<1x32xf32, #tpu.memory_space<vmem>>, %arg4: memref<32x16xbf16, #tpu.memory_space<vmem>>, %arg5: memref<8x16xf32, #tpu.memory_space<vmem>>) attributes {dimension_semantics = [#tpu.dimension_semantics<parallel>], iteration_bounds = array<i64: 1>, scalar_prefetch = 0 : i64, scratch_operands = 0 : i64, tpu.core_type = #tpu.core_type<tc>, window_params = [{transform_indices = @transform_0, window_bounds = array<i64: 8, 32>}, {pipeline_mode = #tpu.pipeline_mode<synchronous>, transform_indices = @transform_1, window_bounds = array<i64: 1, 32>}, {pipeline_mode = #tpu.pipeline_mode<synchronous>, transform_indices = @transform_2, window_bounds = array<i64: 1, 32>}, {pipeline_mode = #tpu.pipeline_mode<synchronous>, transform_indices = @transform_3, window_bounds = array<i64: 32, 16>}, {transform_indices = @transform_4, window_bounds = array<i64: 8, 16>}]} {
    %c0 = arith.constant 0 : index
    %c0_0 = arith.constant 0 : index
    %0 = vector.load %arg1[%c0, %c0_0] : memref<8x32xf32, #tpu.memory_space<vmem>>, vector<8x32xf32>
    %c0_1 = arith.constant 0 : index
    %c0_2 = arith.constant 0 : index
    %1 = vector.load %arg2[%c0_1, %c0_2] : memref<1x32xf32, #tpu.memory_space<vmem>>, vector<1x32xf32>
    %2 = vector.broadcast %1 : vector<1x32xf32> to vector<8x32xf32>
    %3 = arith.mulf %0, %2 : vector<8x32xf32>
    %c0_3 = arith.constant 0 : index
    %c0_4 = arith.constant 0 : index
    %4 = vector.load %arg3[%c0_3, %c0_4] : memref<1x32xf32, #tpu.memory_space<vmem>>, vector<1x32xf32>
    %5 = vector.broadcast %4 : vector<1x32xf32> to vector<8x32xf32>
    %6 = arith.addf %3, %5 : vector<8x32xf32>
    %cst = arith.constant 0.000000e+00 : f32
    %7 = vector.broadcast %cst : f32 to vector<8x32xf32>
    %8 = arith.maximumf %6, %7 : vector<8x32xf32>
    %9 = arith.truncf %8 : vector<8x32xf32> to vector<8x32xbf16>
    %c0_5 = arith.constant 0 : index
    %c0_6 = arith.constant 0 : index
    %10 = vector.load %arg4[%c0_5, %c0_6] : memref<32x16xbf16, #tpu.memory_space<vmem>>, vector<32x16xbf16>
    %cst_7 = arith.constant dense<0.000000e+00> : vector<8x16xf32>
    %11 = tpu.matmul %9, %10, %cst_7 {dimension_numbers = #tpu.dot_dimension_numbers<[1], [0], [0], [1], [0, 0, 1, 1], [], []>} : vector<8x32xbf16>, vector<32x16xbf16>, vector<8x16xf32> -> vector<8x16xf32>
    %c0_8 = arith.constant 0 : index
    %c0_9 = arith.constant 0 : index
    %12 = vector.load %arg5[%c0_8, %c0_9] : memref<8x16xf32, #tpu.memory_space<vmem>>, vector<8x16xf32>
    tpu.vector_store %arg5[%c0_8, %c0_9], %11 {strides = array<i32>} : memref<8x16xf32, #tpu.memory_space<vmem>>, vector<8x16xf32>,
    return
  }
  func.func @transform_0(%arg0: i32) -> (i32, i32) {
    %c0_i32 = arith.constant 0 : i32
    %c0_i32_0 = arith.constant 0 : i32
    return %arg0, %c0_i32 : i32, i32
  }
  func.func @transform_1(%arg0: i32) -> (i32, i32) {
    %c0_i32 = arith.constant 0 : i32
    %c0_i32_0 = arith.constant 0 : i32
    %c0_i32_1 = arith.constant 0 : i32
    return %c0_i32, %c0_i32_0 : i32, i32
  }
  func.func @transform_2(%arg0: i32) -> (i32, i32) {
    %c0_i32 = arith.constant 0 : i32
    %c0_i32_0 = arith.constant 0 : i32
    %c0_i32_1 = arith.constant 0 : i32
    return %c0_i32, %c0_i32_0 : i32, i32
  }
  func.func @transform_3(%arg0: i32) -> (i32, i32) {
    %c0_i32 = arith.constant 0 : i32
    %c0_i32_0 = arith.constant 0 : i32
    %c0_i32_1 = arith.constant 0 : i32
    return %c0_i32, %c0_i32_0 : i32, i32
  }
  func.func @transform_4(%arg0: i32) -> (i32, i32) {
    %c0_i32 = arith.constant 0 : i32
    %c0_i32_0 = arith.constant 0 : i32
    return %arg0, %c0_i32 : i32, i32
  }
}

module attributes {stable_mosaic.version = 11 : i64} {
  func.func @_bneck_1x1_kernel(%arg0: i32, %arg1: memref<2x32xf32, #tpu.memory_space<vmem>>, %arg2: memref<1x32xf32, #tpu.memory_space<vmem>>, %arg3: memref<1x32xf32, #tpu.memory_space<vmem>>, %arg4: memref<32x32xbf16, #tpu.memory_space<vmem>>, %arg5: memref<1x32xf32, #tpu.memory_space<vmem>>, %arg6: memref<1x32xf32, #tpu.memory_space<vmem>>, %arg7: memref<2x32xbf16, #tpu.memory_space<vmem>>) attributes {dimension_semantics = [#tpu.dimension_semantics<parallel>], iteration_bounds = array<i64: 1>, scalar_prefetch = 0 : i64, scratch_operands = 0 : i64, tpu.core_type = #tpu.core_type<tc>, window_params = [{transform_indices = @transform_0, window_bounds = array<i64: 2, 32>}, {pipeline_mode = #tpu.pipeline_mode<synchronous>, transform_indices = @transform_1, window_bounds = array<i64: 1, 32>}, {pipeline_mode = #tpu.pipeline_mode<synchronous>, transform_indices = @transform_2, window_bounds = array<i64: 1, 32>}, {pipeline_mode = #tpu.pipeline_mode<synchronous>, transform_indices = @transform_3, window_bounds = array<i64: 32, 32>}, {pipeline_mode = #tpu.pipeline_mode<synchronous>, transform_indices = @transform_4, window_bounds = array<i64: 1, 32>}, {pipeline_mode = #tpu.pipeline_mode<synchronous>, transform_indices = @transform_5, window_bounds = array<i64: 1, 32>}, {transform_indices = @transform_6, window_bounds = array<i64: 2, 32>}]} {
    %c0 = arith.constant 0 : index
    %c0_0 = arith.constant 0 : index
    %0 = vector.load %arg1[%c0, %c0_0] : memref<2x32xf32, #tpu.memory_space<vmem>>, vector<2x32xf32>
    %c0_1 = arith.constant 0 : index
    %c0_2 = arith.constant 0 : index
    %1 = vector.load %arg2[%c0_1, %c0_2] : memref<1x32xf32, #tpu.memory_space<vmem>>, vector<1x32xf32>
    %2 = vector.broadcast %1 : vector<1x32xf32> to vector<2x32xf32>
    %3 = arith.mulf %0, %2 : vector<2x32xf32>
    %c0_3 = arith.constant 0 : index
    %c0_4 = arith.constant 0 : index
    %4 = vector.load %arg3[%c0_3, %c0_4] : memref<1x32xf32, #tpu.memory_space<vmem>>, vector<1x32xf32>
    %5 = vector.broadcast %4 : vector<1x32xf32> to vector<2x32xf32>
    %6 = arith.addf %3, %5 : vector<2x32xf32>
    %cst = arith.constant 0.000000e+00 : f32
    %7 = vector.broadcast %cst : f32 to vector<2x32xf32>
    %8 = arith.maximumf %6, %7 : vector<2x32xf32>
    %9 = arith.truncf %8 : vector<2x32xf32> to vector<2x32xbf16>
    %c0_5 = arith.constant 0 : index
    %c0_6 = arith.constant 0 : index
    %10 = vector.load %arg4[%c0_5, %c0_6] : memref<32x32xbf16, #tpu.memory_space<vmem>>, vector<32x32xbf16>
    %cst_7 = arith.constant dense<0.000000e+00> : vector<2x32xf32>
    %11 = tpu.matmul %9, %10, %cst_7 {dimension_numbers = #tpu.dot_dimension_numbers<[1], [0], [0], [1], [0, 0, 1, 1], [], []>} : vector<2x32xbf16>, vector<32x32xbf16>, vector<2x32xf32> -> vector<2x32xf32>
    %c0_8 = arith.constant 0 : index
    %c0_9 = arith.constant 0 : index
    %12 = vector.load %arg5[%c0_8, %c0_9] : memref<1x32xf32, #tpu.memory_space<vmem>>, vector<1x32xf32>
    %13 = vector.broadcast %12 : vector<1x32xf32> to vector<2x32xf32>
    %14 = arith.mulf %11, %13 : vector<2x32xf32>
    %c0_10 = arith.constant 0 : index
    %c0_11 = arith.constant 0 : index
    %15 = vector.load %arg6[%c0_10, %c0_11] : memref<1x32xf32, #tpu.memory_space<vmem>>, vector<1x32xf32>
    %16 = vector.broadcast %15 : vector<1x32xf32> to vector<2x32xf32>
    %17 = arith.addf %14, %16 : vector<2x32xf32>
    %cst_12 = arith.constant 0.000000e+00 : f32
    %18 = vector.broadcast %cst_12 : f32 to vector<2x32xf32>
    %19 = arith.maximumf %17, %18 : vector<2x32xf32>
    %20 = arith.truncf %19 : vector<2x32xf32> to vector<2x32xbf16>
    %c0_13 = arith.constant 0 : index
    %c0_14 = arith.constant 0 : index
    %21 = vector.load %arg7[%c0_13, %c0_14] : memref<2x32xbf16, #tpu.memory_space<vmem>>, vector<2x32xbf16>
    tpu.vector_store %arg7[%c0_13, %c0_14], %20 {strides = array<i32>} : memref<2x32xbf16, #tpu.memory_space<vmem>>, vector<2x32xbf16>,
    return
  }
  func.func @transform_0(%arg0: i32) -> (i32, i32) {
    %c0_i32 = arith.constant 0 : i32
    %c0_i32_0 = arith.constant 0 : i32
    return %arg0, %c0_i32 : i32, i32
  }
  func.func @transform_1(%arg0: i32) -> (i32, i32) {
    %c0_i32 = arith.constant 0 : i32
    %c0_i32_0 = arith.constant 0 : i32
    %c0_i32_1 = arith.constant 0 : i32
    return %c0_i32, %c0_i32_0 : i32, i32
  }
  func.func @transform_2(%arg0: i32) -> (i32, i32) {
    %c0_i32 = arith.constant 0 : i32
    %c0_i32_0 = arith.constant 0 : i32
    %c0_i32_1 = arith.constant 0 : i32
    return %c0_i32, %c0_i32_0 : i32, i32
  }
  func.func @transform_3(%arg0: i32) -> (i32, i32) {
    %c0_i32 = arith.constant 0 : i32
    %c0_i32_0 = arith.constant 0 : i32
    %c0_i32_1 = arith.constant 0 : i32
    return %c0_i32, %c0_i32_0 : i32, i32
  }
  func.func @transform_4(%arg0: i32) -> (i32, i32) {
    %c0_i32 = arith.constant 0 : i32
    %c0_i32_0 = arith.constant 0 : i32
    %c0_i32_1 = arith.constant 0 : i32
    return %c0_i32, %c0_i32_0 : i32, i32
  }
  func.func @transform_5(%arg0: i32) -> (i32, i32) {
    %c0_i32 = arith.constant 0 : i32
    %c0_i32_0 = arith.constant 0 : i32
    %c0_i32_1 = arith.constant 0 : i32
    return %c0_i32, %c0_i32_0 : i32, i32
  }
  func.func @transform_6(%arg0: i32) -> (i32, i32) {
    %c0_i32 = arith.constant 0 : i32
    %c0_i32_0 = arith.constant 0 : i32
    return %arg0, %c0_i32 : i32, i32
  }
}

module attributes {stable_mosaic.version = 11 : i64} {
  func.func @_conv3x3_kernel(%arg0: i32, %arg1: memref<1x3x3x32xbf16, #tpu.memory_space<vmem>>, %arg2: memref<3x96x8xbf16, #tpu.memory_space<vmem>>, %arg3: memref<1x1x1x8xf32, #tpu.memory_space<vmem>>) attributes {dimension_semantics = [#tpu.dimension_semantics<parallel>], iteration_bounds = array<i64: 2>, scalar_prefetch = 0 : i64, scratch_operands = 0 : i64, tpu.core_type = #tpu.core_type<tc>, window_params = [{transform_indices = @transform_0, window_bounds = array<i64: 1, 3, 3, 32>}, {pipeline_mode = #tpu.pipeline_mode<synchronous>, transform_indices = @transform_1, window_bounds = array<i64: 3, 96, 8>}, {transform_indices = @transform_2, window_bounds = array<i64: 1, 1, 1, 8>}]} {
    %c0 = arith.constant 0 : index
    %c0_0 = arith.constant 0 : index
    %c0_1 = arith.constant 0 : index
    %0 = vector.load %arg2[%c0, %c0_0, %c0_1] : memref<3x96x8xbf16, #tpu.memory_space<vmem>>, vector<1x96x8xbf16>
    %1 = vector.shape_cast %0 : vector<1x96x8xbf16> to vector<96x8xbf16>
    %c1 = arith.constant 1 : index
    %c0_2 = arith.constant 0 : index
    %c0_3 = arith.constant 0 : index
    %2 = vector.load %arg2[%c1, %c0_2, %c0_3] : memref<3x96x8xbf16, #tpu.memory_space<vmem>>, vector<1x96x8xbf16>
    %3 = vector.shape_cast %2 : vector<1x96x8xbf16> to vector<96x8xbf16>
    %c2 = arith.constant 2 : index
    %c0_4 = arith.constant 0 : index
    %c0_5 = arith.constant 0 : index
    %4 = vector.load %arg2[%c2, %c0_4, %c0_5] : memref<3x96x8xbf16, #tpu.memory_space<vmem>>, vector<1x96x8xbf16>
    %5 = vector.shape_cast %4 : vector<1x96x8xbf16> to vector<96x8xbf16>
    %c0_6 = arith.constant 0 : index
    %c0_7 = arith.constant 0 : index
    %c0_8 = arith.constant 0 : index
    %c0_9 = arith.constant 0 : index
    %6 = vector.load %arg1[%c0_6, %c0_7, %c0_8, %c0_9] : memref<1x3x3x32xbf16, #tpu.memory_space<vmem>>, vector<1x1x3x32xbf16>
    %7 = vector.shape_cast %6 : vector<1x1x3x32xbf16> to vector<3x32xbf16>
    %c0_10 = arith.constant 0 : index
    %c1_11 = arith.constant 1 : index
    %c0_12 = arith.constant 0 : index
    %c0_13 = arith.constant 0 : index
    %8 = vector.load %arg1[%c0_10, %c1_11, %c0_12, %c0_13] : memref<1x3x3x32xbf16, #tpu.memory_space<vmem>>, vector<1x1x3x32xbf16>
    %9 = vector.shape_cast %8 : vector<1x1x3x32xbf16> to vector<3x32xbf16>
    %c0_14 = arith.constant 0 : index
    %c2_15 = arith.constant 2 : index
    %c0_16 = arith.constant 0 : index
    %c0_17 = arith.constant 0 : index
    %10 = vector.load %arg1[%c0_14, %c2_15, %c0_16, %c0_17] : memref<1x3x3x32xbf16, #tpu.memory_space<vmem>>, vector<1x1x3x32xbf16>
    %11 = vector.shape_cast %10 : vector<1x1x3x32xbf16> to vector<3x32xbf16>
    %cst = arith.constant 0.000000e+00 : f32
    %12 = vector.broadcast %cst : f32 to vector<1x8xf32>
    %13 = vector.extract_strided_slice %7 {offsets = [0, 0], sizes = [1, 32], strides = [1, 1]} : vector<3x32xbf16> to vector<1x32xbf16>
    %14 = vector.extract_strided_slice %7 {offsets = [1, 0], sizes = [1, 32], strides = [1, 1]} : vector<3x32xbf16> to vector<1x32xbf16>
    %15 = vector.extract_strided_slice %7 {offsets = [2, 0], sizes = [1, 32], strides = [1, 1]} : vector<3x32xbf16> to vector<1x32xbf16>
    %16 = tpu.concatenate %13, %14, %15 in 1 : vector<1x32xbf16>, vector<1x32xbf16>, vector<1x32xbf16> -> vector<1x96xbf16>
    %cst_18 = arith.constant dense<0.000000e+00> : vector<1x8xf32>
    %17 = tpu.matmul %16, %1, %cst_18 {dimension_numbers = #tpu.dot_dimension_numbers<[1], [0], [0], [1], [0, 0, 1, 1], [], []>} : vector<1x96xbf16>, vector<96x8xbf16>, vector<1x8xf32> -> vector<1x8xf32>
    %18 = arith.addf %12, %17 : vector<1x8xf32>
    %19 = vector.extract_strided_slice %9 {offsets = [0, 0], sizes = [1, 32], strides = [1, 1]} : vector<3x32xbf16> to vector<1x32xbf16>
    %20 = vector.extract_strided_slice %9 {offsets = [1, 0], sizes = [1, 32], strides = [1, 1]} : vector<3x32xbf16> to vector<1x32xbf16>
    %21 = vector.extract_strided_slice %9 {offsets = [2, 0], sizes = [1, 32], strides = [1, 1]} : vector<3x32xbf16> to vector<1x32xbf16>
    %22 = tpu.concatenate %19, %20, %21 in 1 : vector<1x32xbf16>, vector<1x32xbf16>, vector<1x32xbf16> -> vector<1x96xbf16>
    %cst_19 = arith.constant dense<0.000000e+00> : vector<1x8xf32>
    %23 = tpu.matmul %22, %3, %cst_19 {dimension_numbers = #tpu.dot_dimension_numbers<[1], [0], [0], [1], [0, 0, 1, 1], [], []>} : vector<1x96xbf16>, vector<96x8xbf16>, vector<1x8xf32> -> vector<1x8xf32>
    %24 = arith.addf %18, %23 : vector<1x8xf32>
    %25 = vector.extract_strided_slice %11 {offsets = [0, 0], sizes = [1, 32], strides = [1, 1]} : vector<3x32xbf16> to vector<1x32xbf16>
    %26 = vector.extract_strided_slice %11 {offsets = [1, 0], sizes = [1, 32], strides = [1, 1]} : vector<3x32xbf16> to vector<1x32xbf16>
    %27 = vector.extract_strided_slice %11 {offsets = [2, 0], sizes = [1, 32], strides = [1, 1]} : vector<3x32xbf16> to vector<1x32xbf16>
    %28 = tpu.concatenate %25, %26, %27 in 1 : vector<1x32xbf16>, vector<1x32xbf16>, vector<1x32xbf16> -> vector<1x96xbf16>
    %cst_20 = arith.constant dense<0.000000e+00> : vector<1x8xf32>
    %29 = tpu.matmul %28, %5, %cst_20 {dimension_numbers = #tpu.dot_dimension_numbers<[1], [0], [0], [1], [0, 0, 1, 1], [], []>} : vector<1x96xbf16>, vector<96x8xbf16>, vector<1x8xf32> -> vector<1x8xf32>
    %30 = arith.addf %24, %29 : vector<1x8xf32>
    %c0_21 = arith.constant 0 : index
    %c0_22 = arith.constant 0 : index
    %c0_23 = arith.constant 0 : index
    %c0_24 = arith.constant 0 : index
    %31 = vector.load %arg3[%c0_21, %c0_22, %c0_23, %c0_24] : memref<1x1x1x8xf32, #tpu.memory_space<vmem>>, vector<1x1x1x8xf32>
    %32 = vector.shape_cast %31 : vector<1x1x1x8xf32> to vector<1x8xf32>
    %33 = vector.shape_cast %30 : vector<1x8xf32> to vector<1x1x1x8xf32>
    tpu.vector_store %arg3[%c0_21, %c0_22, %c0_23, %c0_24], %33 {strides = array<i32>} : memref<1x1x1x8xf32, #tpu.memory_space<vmem>>, vector<1x1x1x8xf32>,
    return
  }
  func.func @transform_0(%arg0: i32) -> (i32, i32, i32, i32) {
    %c0_i32 = arith.constant 0 : i32
    %c0_i32_0 = arith.constant 0 : i32
    %c0_i32_1 = arith.constant 0 : i32
    %c0_i32_2 = arith.constant 0 : i32
    return %arg0, %c0_i32, %c0_i32_0, %c0_i32_1 : i32, i32, i32, i32
  }
  func.func @transform_1(%arg0: i32) -> (i32, i32, i32) {
    %c0_i32 = arith.constant 0 : i32
    %c0_i32_0 = arith.constant 0 : i32
    %c0_i32_1 = arith.constant 0 : i32
    %c0_i32_2 = arith.constant 0 : i32
    return %c0_i32, %c0_i32_0, %c0_i32_1 : i32, i32, i32
  }
  func.func @transform_2(%arg0: i32) -> (i32, i32, i32, i32) {
    %c0_i32 = arith.constant 0 : i32
    %c0_i32_0 = arith.constant 0 : i32
    %c0_i32_1 = arith.constant 0 : i32
    %c0_i32_2 = arith.constant 0 : i32
    return %arg0, %c0_i32, %c0_i32_0, %c0_i32_1 : i32, i32, i32, i32
  }
}

module attributes {stable_mosaic.version = 11 : i64} {
  func.func @_bn_relu_kernel(%arg0: i32, %arg1: memref<2x32xf32, #tpu.memory_space<vmem>>, %arg2: memref<1x32xf32, #tpu.memory_space<vmem>>, %arg3: memref<1x32xf32, #tpu.memory_space<vmem>>, %arg4: memref<2x32xf32, #tpu.memory_space<vmem>>) attributes {dimension_semantics = [#tpu.dimension_semantics<parallel>], iteration_bounds = array<i64: 1>, scalar_prefetch = 0 : i64, scratch_operands = 0 : i64, tpu.core_type = #tpu.core_type<tc>, window_params = [{transform_indices = @transform_0, window_bounds = array<i64: 2, 32>}, {pipeline_mode = #tpu.pipeline_mode<synchronous>, transform_indices = @transform_1, window_bounds = array<i64: 1, 32>}, {pipeline_mode = #tpu.pipeline_mode<synchronous>, transform_indices = @transform_2, window_bounds = array<i64: 1, 32>}, {transform_indices = @transform_3, window_bounds = array<i64: 2, 32>}]} {
    %c0 = arith.constant 0 : index
    %c0_0 = arith.constant 0 : index
    %0 = vector.load %arg1[%c0, %c0_0] : memref<2x32xf32, #tpu.memory_space<vmem>>, vector<2x32xf32>
    %c0_1 = arith.constant 0 : index
    %c0_2 = arith.constant 0 : index
    %1 = vector.load %arg2[%c0_1, %c0_2] : memref<1x32xf32, #tpu.memory_space<vmem>>, vector<1x32xf32>
    %2 = vector.broadcast %1 : vector<1x32xf32> to vector<2x32xf32>
    %3 = arith.mulf %0, %2 : vector<2x32xf32>
    %c0_3 = arith.constant 0 : index
    %c0_4 = arith.constant 0 : index
    %4 = vector.load %arg3[%c0_3, %c0_4] : memref<1x32xf32, #tpu.memory_space<vmem>>, vector<1x32xf32>
    %5 = vector.broadcast %4 : vector<1x32xf32> to vector<2x32xf32>
    %6 = arith.addf %3, %5 : vector<2x32xf32>
    %cst = arith.constant 0.000000e+00 : f32
    %7 = vector.broadcast %cst : f32 to vector<2x32xf32>
    %8 = arith.maximumf %6, %7 : vector<2x32xf32>
    %c0_5 = arith.constant 0 : index
    %c0_6 = arith.constant 0 : index
    %9 = vector.load %arg4[%c0_5, %c0_6] : memref<2x32xf32, #tpu.memory_space<vmem>>, vector<2x32xf32>
    tpu.vector_store %arg4[%c0_5, %c0_6], %8 {strides = array<i32>} : memref<2x32xf32, #tpu.memory_space<vmem>>, vector<2x32xf32>,
    return
  }
  func.func @transform_0(%arg0: i32) -> (i32, i32) {
    %c0_i32 = arith.constant 0 : i32
    %c0_i32_0 = arith.constant 0 : i32
    return %arg0, %c0_i32 : i32, i32
  }
  func.func @transform_1(%arg0: i32) -> (i32, i32) {
    %c0_i32 = arith.constant 0 : i32
    %c0_i32_0 = arith.constant 0 : i32
    %c0_i32_1 = arith.constant 0 : i32
    return %c0_i32, %c0_i32_0 : i32, i32
  }
  func.func @transform_2(%arg0: i32) -> (i32, i32) {
    %c0_i32 = arith.constant 0 : i32
    %c0_i32_0 = arith.constant 0 : i32
    %c0_i32_1 = arith.constant 0 : i32
    return %c0_i32, %c0_i32_0 : i32, i32
  }
  func.func @transform_3(%arg0: i32) -> (i32, i32) {
    %c0_i32 = arith.constant 0 : i32
    %c0_i32_0 = arith.constant 0 : i32
    return %arg0, %c0_i32 : i32, i32
  }
}

</mosaic_0001>

<bundles_post_ra>
// kernel: densenet_forward.20
= control target key start
LH: loop header
LB: loop body
LE: loop exit
PB: predicated region body
PF: predicated region fallthrough
CT: control target
= control target key end

     0   :  { %s647_s21 = smov 0   ;;  %s698_s0 = inlined_call_operand.vmem [shape: f32[128,32], index: 0, kind: input, shape index: {}]   ;;  %s699_s1 = inlined_call_operand.vmem [shape: f32[1,32], index: 1, kind: input, shape index: {}]   ;;  %s700_s2 = inlined_call_operand.vmem [shape: f32[1,32], index: 2, kind: input, shape index: {}]   ;;  %s701_s3 = inlined_call_operand.vmem [shape: bf16[32,32], index: 3, kind: input, shape index: {}]   ;;  %s702_s4 = inlined_call_operand.vmem [shape: f32[1,32], index: 4, kind: input, shape index: {}]   ;;  %s703_s5 = inlined_call_operand.vmem [shape: f32[1,32], index: 5, kind: input, shape index: {}]   ;;  %s704_s6 = inlined_call_operand.vmem [shape: bf16[128,32], index: 6, kind: output, shape index: {}]  }
   0x1 LB: > { %s535_s22 = sadd.s32 4294967295, %s610_s21   ;;  %p539_p0 = scmp.ge.s32.totalorder %s610_s21, 1  ;;  %s610_s21 = sphi %s647_s21, %s16_s21  }
   0x2   : > { %p213_p1 = scmp.lt.s32.totalorder %s610_s21, 3 }
   0x4   : > { %p214_p2 = pnand %p539_p0, %p213_p1 }
   0x5   : > { %v602_v0 = vld [vmem:[%s701_s3] sm:$0xff] (!%p214_p2)   ;;  %s540_s25 = sshll.u32 (!%p214_p2), %s535_s22, 3  ;;  %v603_v1 = vld [vmem:[%s701_s3 + $0x8] sm:$0xff] (!%p214_p2)   ;;  %vm322_vm0 = vcmask (!%p214_p2), 261120   ;;  %vm470_vm1 = vcmask (!%p214_p2), 257024  }
   0x6   : > { %217 = sbr.rel (%p214_p2) target bundleno = 252 (0xfc), region = 44  ;;  %p244_p3 = scmp.lt.s32.totalorder (!%p214_p2), %s540_s25, 15  ;;  %578 = vmatprep.subr.bf16.mxu0 (!%p214_p2), %v602_v0  ;;  %590 = vmatprep.subr.bf16.mxu1 (!%p214_p2), %v602_v0  ;;  %v544_v2 = vld [vmem:[%s699_s1] ss:$0 sm:$0xff] (!%p214_p2) }
   0x7   : > { %579 = vmatpush3.bf16.msra.mxu0 (!%p214_p2), %v602_v0  ;;  %592 = vmatpush3.bf16.msra.mxu1 (!%p214_p2), %v602_v0  ;;  %v545_v3 = vld [vmem:[%s700_s2] ss:$0 sm:$0xff] (!%p214_p2) }
   0x8   : > { %580 = vmatprep.subr.bf16.mxu0 (!%p214_p2), %v603_v1  ;;  %591 = vmatprep.subr.bf16.mxu1 (!%p214_p2), %v603_v1  ;;  %v552_v40 = vld [vmem:[%s702_s4] ss:$0 sm:$0xff] (!%p214_p2) }
   0x9   : > { %v553_v42 = vld [vmem:[%s703_s5] ss:$0 sm:$0xff] (!%p214_p2) }
   0xb   : > { %581 = vmatpush3.bf16.msra.mxu0 (!%p214_p2), %v603_v1  ;;  %593 = vmatpush3.bf16.msra.mxu1 (!%p214_p2), %v603_v1 }
   0xd   : > { %s706_s25 = smov (!%p244_p3, %s540_s25), 15 }
   0xe   : > { %s541_s28 = sshll.u32 %s706_s25, 3  ;;  %s543_s16 = sshll.u32 %s706_s25, 2 }
   0xf   : > { %s247_s9 = scalar_lea.vmem %s698_s0, %s541_s28  ;;  %s253_s19 = scalar_lea.vmem %s704_s6, %s543_s16 }
  0x10   : > { %v256_v4 = vld [vmem:[%s247_s9] sm:$0xff]  ;;  %v257_v5 = vld [vmem:[%s247_s9 + $0x8] sm:$0xff]  ;;  %v258_v11 = vld [vmem:[%s247_s9 + $0x10] sm:$0xff] }
  0x11   : > { %v260_v6 = vld [vmem:[%s247_s9 + $0x20] sm:$0xff]  ;;  %v271_v7 = vmul.f32 %v544_v2, %v256_v4  ;;  %v272_v8 = vmul.f32 %v544_v2, %v257_v5  ;;  %v261_v9 = vld [vmem:[%s247_s9 + $0x28] sm:$0xff]  ;;  %v259_v12 = vld [vmem:[%s247_s9 + $0x18] sm:$0xff]  ;;  %v273_v14 = vmul.f32 %v544_v2, %v258_v11 }
  0x12   : > { %v275_v10 = vmul.f32 %v544_v2, %v260_v6  ;;  %v276_v13 = vmul.f32 %v544_v2, %v261_v9  ;;  %v274_v15 = vmul.f32 %v544_v2, %v259_v12  ;;  %v262_v16 = vld [vmem:[%s247_s9 + $0x30] sm:$0xff]  ;;  %v263_v17 = vld [vmem:[%s247_s9 + $0x38] sm:$0xff] }
  0x13   : > { %v286_v18 = vadd.f32 %v545_v3, %v271_v7  ;;  %v287_v19 = vadd.f32 %v545_v3, %v272_v8  ;;  %v277_v21 = vmul.f32 %v544_v2, %v262_v16  ;;  %v288_v23 = vadd.f32 %v545_v3, %v273_v14 }
  0x14   : > { %v290_v20 = vadd.f32 %v545_v3, %v275_v10  ;;  %v291_v22 = vadd.f32 %v545_v3, %v276_v13  ;;  %v289_v24 = vadd.f32 %v545_v3, %v274_v15  ;;  %v278_v25 = vmul.f32 %v544_v2, %v263_v17 }
  0x15   : > { %v294_v26 = vmax.f32 %v286_v18, 0.0  ;;  %v295_v27 = vmax.f32 %v287_v19, 0.0  ;;  %v292_v29 = vadd.f32 %v545_v3, %v277_v21  ;;  %v296_v31 = vmax.f32 %v288_v23, 0.0 }
  0x16   : > { %v298_v28 = vmax.f32 %v290_v20, 0.0  ;;  %v299_v30 = vmax.f32 %v291_v22, 0.0  ;;  %v297_v32 = vmax.f32 %v289_v24, 0.0  ;;  %v293_v33 = vadd.f32 %v545_v3, %v278_v25 }
  0x17   : > { %v302_v34 = vpack.c.bf16 %v295_v27, %v294_v26  ;;  %v300_v35 = vmax.f32 %v292_v29, 0.0 }
  0x18   : > { %v304_v36 = vpack.c.bf16 %v299_v30, %v298_v28  ;;  %v303_v37 = vpack.c.bf16 %v297_v32, %v296_v31  ;;  %v301_v38 = vmax.f32 %v293_v33, 0.0 }
  0x19   : > { %582 = vmatprep.mubr.msk.bf16.mxu0 %vm322_vm0, %v302_v34 }
  0x1a   : > { %586 = vmatprep.mubr.msk.bf16.mxu1 %vm322_vm0, %v304_v36  ;;  %583 = vmatmul.mubr.msk.bf16.vlgmr.msra.gmra.mrb[0].mxu0 %vm322_vm0, %v303_v37  ;;  %v305_v39 = vpack.c.bf16 %v301_v38, %v300_v35 }
  0x1c   : > { %587 = vmatmul.mubr.msk.bf16.vlgmr.msra.gmra.mrb[0].mxu1 %vm322_vm0, %v305_v39 }
  0xed   : > { %v584_v41 = vpop.f32.mrb[0].mxu0 }
  0xee   : > { %v409_v43 = vmul.f32 %v584_v41, %v552_v40  ;;  %v369_v44 = vpop.f32.mrb[1].mxu0 }
  0xef   : > { %v588_v45 = vpop.f32.mrb[0].mxu1  ;;  %v407_v46 = vmul.f32 %v552_v40, %v369_v44  ;;  %v585_v47 = vpop.f32.mrb[2].mxu0 }
  0xf0   : > { %v424_v48 = vadd.f32 %v553_v42, %v409_v43  ;;  %v413_v49 = vmul.f32 %v588_v45, %v552_v40  ;;  %v385_v50 = vpop.f32.mrb[1].mxu1  ;;  %v410_v51 = vmul.f32 %v585_v47, %v552_v40  ;;  %v372_v52 = vpop.f32.mrb[3].mxu0 }
  0xf1   : > { %v422_v53 = vadd.f32 %v553_v42, %v407_v46  ;;  %v411_v54 = vmul.f32 %v552_v40, %v385_v50  ;;  %v589_v55 = vpop.f32.mrb[2].mxu1  ;;  %v408_v56 = vmul.f32 %v552_v40, %v372_v52 }
  0xf2   : > { %v432_v57 = vmax.f32 %v424_v48, 0.0  ;;  %v428_v58 = vadd.f32 %v553_v42, %v413_v49  ;;  %v425_v59 = vadd.f32 %v553_v42, %v410_v51  ;;  %v414_v60 = vmul.f32 %v589_v55, %v552_v40  ;;  %v388_v61 = vpop.f32.mrb[3].mxu1 }
  0xf3   : > { %v430_v62 = vmax.f32 %v422_v53, 0.0  ;;  %v426_v63 = vadd.f32 %v553_v42, %v411_v54  ;;  %v423_v0 = vadd.f32 %v553_v42, %v408_v56  ;;  %v412_v1 = vmul.f32 %v552_v40, %v388_v61 }
  0xf4   : > { %v566_v2 = vpack.c.bf16 %v432_v57, %v432_v57  ;;  %v436_v3 = vmax.f32 %v428_v58, 0.0  ;;  %v433_v4 = vmax.f32 %v425_v59, 0.0  ;;  %v429_v5 = vadd.f32 %v553_v42, %v414_v60 }
  0xf5   : > { %v564_v6 = vpack.c.bf16 %v430_v62, %v430_v62  ;;  %v434_v7 = vmax.f32 %v426_v63, 0.0  ;;  %v431_v8 = vmax.f32 %v423_v0, 0.0  ;;  %v427_v9 = vadd.f32 %v553_v42, %v412_v1 }
  0xf6   : > { %473 = vst.msk [vmem:[%s253_s19 + $0x8] sm:$0xf] %vm470_vm1, %v566_v2  ;;  %v570_v10 = vpack.c.bf16 %v436_v3, %v436_v3  ;;  %v567_v11 = vpack.c.bf16 %v433_v4, %v433_v4  ;;  %v437_v12 = vmax.f32 %v429_v5, 0.0 }
  0xf7   : > { %471 = vst.msk [vmem:[%s253_s19] sm:$0xf] %vm470_vm1, %v564_v6  ;;  %v568_v13 = vpack.c.bf16 %v434_v7, %v434_v7  ;;  %v565_v14 = vpack.c.bf16 %v431_v8, %v431_v8  ;;  %v435_v15 = vmax.f32 %v427_v9, 0.0 }
  0xf8   : > { %477 = vst.msk [vmem:[%s253_s19 + $0x18] sm:$0xf] %vm470_vm1, %v570_v10  ;;  %474 = vst.msk [vmem:[%s253_s19 + $0xc] sm:$0xf] %vm470_vm1, %v567_v11  ;;  %v571_v16 = vpack.c.bf16 %v437_v12, %v437_v12 }
  0xf9   : > { %475 = vst.msk [vmem:[%s253_s19 + $0x10] sm:$0xf] %vm470_vm1, %v568_v13  ;;  %472 = vst.msk [vmem:[%s253_s19 + $0x4] sm:$0xf] %vm470_vm1, %v565_v14  ;;  %v569_v17 = vpack.c.bf16 %v435_v15, %v435_v15 }
  0xfa   : > { %478 = vst.msk [vmem:[%s253_s19 + $0x1c] sm:$0xf] %vm470_vm1, %v571_v16 }
  0xfb   : > { %476 = vst.msk [vmem:[%s253_s19 + $0x14] sm:$0xf] %vm470_vm1, %v569_v17 }
  0xfc PF: > { %s16_s21 = sadd.s32 1, %s610_s21  }
  0xfd   : > { %p13_p4 = scmp.ge.s32.totalorder %s16_s21, 4  }
  0xff   :  { %15 = sbr.rel (!%p13_p4) target bundleno = 1 (0x1), region = 74 }

// kernel: densenet_forward.21
= control target key start
LH: loop header
LB: loop body
LE: loop exit
PB: predicated region body
PF: predicated region fallthrough
CT: control target
= control target key end

     0   :  { %s2398_s9 = smov 0   ;;  %s3023_s0 = inlined_call_operand.vmem [shape: bf16[2,10,10,32], index: 0, kind: input, shape index: {}]   ;;  %s3024_s1 = inlined_call_operand.vmem [shape: bf16[3,96,8], index: 1, kind: input, shape index: {}]   ;;  %s3025_s2 = inlined_call_operand.vmem [shape: f32[2,8,8,8], index: 2, kind: output, shape index: {}]  }
   0x1 LB: > { %s1602_s10 = sadd.s32 4294967295, %s2377_s9   ;;  %p1606_p0 = scmp.ge.s32.totalorder %s2377_s9, 1  ;;  %s2377_s9 = sphi %s2398_s9, %s12_s9  }
   0x2   : > { %p112_p1 = scmp.lt.s32.totalorder %s2377_s9, 3 }
   0x4   : > { %p113_p2 = pnand %p1606_p0, %p112_p1 }
   0x5   : > { %p134_p3 = scmp.lt.s32.totalorder (!%p113_p2), %s1602_s10, 1  ;;  %v2409_v0 = vld [vmem:[%s3024_s1 + $0x30] sm:$0xff] (!%p113_p2)   ;;  %v2379_v1 = vmov (!%p113_p2), 0.0   ;;  %v2419_v2 = vld [vmem:[%s3024_s1 + $0x38] sm:$0xff] (!%p113_p2)   ;;  %v2434_v3 = vld [vmem:[%s3024_s1 + $0x40] sm:$0xff] (!%p113_p2)   ;;  %vm2380_vm0 = vmmov (!%p113_p2), 0  }
   0x6   : > { %116 = sbr.rel (%p113_p2) target bundleno = 626 (0x272), region = 28  ;;  %1882 = vmatprep.subr.bf16.mxu0 (!%p113_p2), %v2379_v1  ;;  %1930 = vmatprep.subr.bf16.mxu1 (!%p113_p2), %v2379_v1  ;;  %v2466_v18 = vld [vmem:[%s3024_s1 + $0x48] sm:$0xff] (!%p113_p2)   ;;  %s2381_s23 = smov (!%p113_p2), 64   ;;  %v2481_v29 = vld [vmem:[%s3024_s1 + $0x50] sm:$0xff] (!%p113_p2)   ;;  %v2497_v38 = vld [vmem:[%s3024_s1 + $0x58] sm:$0xff] (!%p113_p2)   ;;  %vm229_vm1 = vcmask (!%p113_p2), 261120  }
   0x7   : > { %1883 = vmatpush3.bf16.msra.mxu0 (!%p113_p2), %v2409_v0  ;;  %1931 = vmatpush3.bf16.msra.mxu1 (!%p113_p2), %v2409_v0  ;;  %s2382_s26 = smov (!%p113_p2), 32   ;;  %vm233_vm2 = vcmask (!%p113_p2), 523264   ;;  %vm294_vm3 = vcmask (!%p113_p2), 785408   ;;  %vm516_vm4 = vcmask (!%p113_p2), 64512  }
   0x8   : > { %1884 = vmatprep.subr.bf16.mxu0 (!%p113_p2), %v2379_v1  ;;  %1932 = vmatprep.subr.bf16.mxu1 (!%p113_p2), %v2379_v1 }
   0x9   : > { %1894 = vmatprep.mubr.msk.bf16.mxu0 (!%p113_p2), %vm2380_vm0, %v2379_v1  ;;  %1942 = vmatprep.mubr.msk.bf16.mxu1 (!%p113_p2), %vm2380_vm0, %v2379_v1 }
   0xb   : > { %1885 = vmatpush3.bf16.msra.mxu0 (!%p113_p2), %v2419_v2  ;;  %1933 = vmatpush3.bf16.msra.mxu1 (!%p113_p2), %v2419_v2 }
   0xc   : > { %1886 = vmatprep.subr.bf16.mxu0 (!%p113_p2), %v2379_v1  ;;  %1934 = vmatprep.subr.bf16.mxu1 (!%p113_p2), %v2379_v1 }
   0xd   : > { %s3027_s10 = smov (!%p134_p3, %s1602_s10), 1 }
   0xe   : > { %s2330_s15 = smul.u32 80, %s3027_s10  ;;  %s1713_s27 = sshll.u32 %s3027_s10, 6 }
   0xf   : > { %1887 = vmatpush3.bf16.msra.mxu0 %v2434_v3  ;;  %1935 = vmatpush3.bf16.msra.mxu1 %v2434_v3  ;;  %s2990_s30 = scalar_lea.vmem %s3025_s2, %s1713_s27 }
  0x10   : > { %s2428_s18 = scalar_lea.vmem %s3023_s0, %s2330_s15  ;;  %1888 = vmatprep.subr.bf16.mxu0 %v2379_v1  ;;  %1936 = vmatprep.subr.bf16.mxu1 %v2379_v1 }
  0x11   : > { %v2438_v4 = vld [vmem:[%s2428_s18 + $0x8] sm:$0xf]  ;;  %v1635_v5 = vld [vmem:[%s2428_s18 + $0xc] sm:$0x1]  ;;  %v2442_v6 = vld [vmem:[%s2428_s18 + $0x10] sm:$0xf] }
  0x12   : > { %v1653_v7 = vcombine.low %v2438_v4, %v1635_v5  ;;  %v1637_v8 = vld [vmem:[%s2428_s18 + $0x14] sm:$0x1]  ;;  %v2449_v9 = vld [vmem:[%s2428_s18] sm:$0xf]  ;;  %v184_v10 = vld [vmem:[%s2428_s18 + $0x4] sm:$0x1] }
  0x13   : > { %v1668_v11 = vcombine.low %v2442_v6, %v1637_v8  ;;  %v1652_v12 = vcombine.low %v2449_v9, %v184_v10  ;;  %v2459_v13 = vld [vmem:[%s2428_s18 + $0x18] sm:$0xf]  ;;  %v1639_v14 = vld [vmem:[%s2428_s18 + $0x1c] sm:$0x1]  ;;  %v2471_v21 = vld [vmem:[%s2428_s18 + $0x20] sm:$0xf]  ;;  %1889 = vmatpush3.bf16.msra.mxu0 %v2466_v18  ;;  %1937 = vmatpush3.bf16.msra.mxu1 %v2466_v18 }
  0x14   : > { %v242_v15 = vshrl.u32 %v1653_v7, 16  ;;  %v244_v16 = vshll.u32 %v1653_v7, 16  ;;  %v250_v17 = vrot.slane %v1653_v7, 1  ;;  %v1678_v20 = vcombine.low %v2459_v13, %v1639_v14  ;;  %v1641_v27 = vld [vmem:[%s2428_s18 + $0x24] sm:$0x1]  ;;  %1890 = vmatprep.subr.bf16.mxu0 %v2379_v1  ;;  %1938 = vmatprep.subr.bf16.mxu1 %v2379_v1 }
  0x15   : > { %v423_v19 = vshll.u32 %v1668_v11, 16  ;;  %v421_v23 = vshrl.u32 %v1668_v11, 16  ;;  %v429_v24 = vrot.slane %v1668_v11, 1  ;;  %v220_v25 = vshll.u32 %v1652_v12, 16  ;;  %v2487_v32 = vld [vmem:[%s2428_s18 + $0x28] sm:$0xf] }
  0x16   : > { %v246_v22 = vrot.slane %v244_v16, 1  ;;  %251 = vrot.lane.b32.xlu1 %v250_v17, %s2381_s23  ;;  %v218_v30 = vshrl.u32 %v1652_v12, 16  ;;  %v226_v31 = vrot.slane %v1652_v12, 1  ;;  %v606_v35 = vshll.u32 %v1678_v20, 16  ;;  %v1643_v37 = vld [vmem:[%s2428_s18 + $0x2c] sm:$0x1] }
  0x17   : > { %v425_v26 = vrot.slane %v423_v19, 1  ;;  %v222_v34 = vrot.slane %v220_v25, 1  ;;  %v1683_v36 = vcombine.low %v2471_v21, %v1641_v27  ;;  %1891 = vmatpush3.bf16.msra.mxu0 %v2481_v29  ;;  %1939 = vmatpush3.bf16.msra.mxu1 %v2481_v29  ;;  %v604_v39 = vshrl.u32 %v1678_v20, 16  ;;  %v2514_v54 = vld [vmem:[%s2428_s18 + $0x30] sm:$0xf]  ;;  %v2540_v27 = vld [vmem:[%s3024_s1] sm:$0xff]  }
  0x18   : > { %v247_v28 = vor.u32 %v246_v22, %v242_v15  ;;  %v612_v40 = vrot.slane %v1678_v20, 1  ;;  %1892 = vmatprep.subr.bf16.mxu0 %v2379_v1  ;;  %1940 = vmatprep.subr.bf16.mxu1 %v2379_v1  ;;  %v608_v42 = vrot.slane %v606_v35, 1  ;;  %v1688_v44 = vcombine.low %v2487_v32, %v1643_v37  ;;  %v1645_v55 = vld [vmem:[%s2428_s18 + $0x34] sm:$0x1]  ;;  %v2524_v63 = vld [vmem:[%s2428_s18 + $0x38] sm:$0xf] }
  0x19   : > { %v426_v33 = vor.u32 %v425_v26, %v421_v23  ;;  %v223_v41 = vor.u32 %v222_v34, %v218_v30  ;;  %v753_v43 = vshll.u32 %v1683_v36, 16  ;;  %v751_v45 = vshrl.u32 %v1683_v36, 16  ;;  %v1647_v5 = vld [vmem:[%s2428_s18 + $0x3c] sm:$0x1]  ;;  %v2531_v15 = vld [vmem:[%s2428_s18 + $0x40] sm:$0xf] }
  0x1a   : > { %248 = vrot.lane.b32.xlu0 %v247_v28, %s2382_s26  ;;  %430 = vrot.lane.b32.xlu1 %v429_v24, %s2381_s23  ;;  %v759_v46 = vrot.slane %v1683_v36, 1  ;;  %v609_v47 = vor.u32 %v608_v42, %v604_v39  ;;  %v900_v49 = vshll.u32 %v1688_v44, 16  ;;  %v898_v51 = vshrl.u32 %v1688_v44, 16  ;;  %v1649_v16 = vld [vmem:[%s2428_s18 + $0x44] sm:$0x1]  ;;  %v2550_v34 = vld [vmem:[%s3024_s1 + $0x8] sm:$0xff]  }
  0x1b   : > { %1893 = vmatpush3.bf16.msra.mxu0 %v2497_v38  ;;  %1941 = vmatpush3.bf16.msra.mxu1 %v2497_v38  ;;  %v755_v48 = vrot.slane %v753_v43, 1  ;;  %v906_v53 = vrot.slane %v1688_v44, 1  ;;  %v1693_v56 = vcombine.low %v2514_v54, %v1645_v55  ;;  %v1698_v7 = vcombine.low %v2524_v63, %v1647_v5  ;;  %v2567_v36 = vld [vmem:[%s3024_s1 + $0x10] sm:$0xff]   ;;  %v2587_v37 = vld [vmem:[%s3024_s1 + $0x20] sm:$0xff]   ;;  %v2592_v39 = vld [vmem:[%s2428_s18 + $0x48] sm:$0xf] }
  0x1c   : > { %1898 = vmatprep.subr.bf16.mxu0 %v2379_v1  ;;  %1946 = vmatprep.subr.bf16.mxu1 %v2379_v1  ;;  %v902_v52 = vrot.slane %v900_v49, 1  ;;  %v1703_v17 = vcombine.low %v2531_v15, %v1649_v16  ;;  %v2601_v43 = vld [vmem:[%s3024_s1 + $0x28] sm:$0xff]   ;;  %v2648_v55 = vld [vmem:[%s3024_s1 + $0x78] sm:$0xff]  }
  0x1d   : > { %v756_v50 = vor.u32 %v755_v48, %v751_v45  ;;  %v1047_v58 = vshll.u32 %v1693_v56, 16  ;;  %v1045_v59 = vshrl.u32 %v1693_v56, 16  ;;  %v1053_v62 = vrot.slane %v1693_v56, 1  ;;  %v2657_v56 = vld [vmem:[%s3024_s1 + $0x80] sm:$0xff]  }
  0x1e   : > { %427 = vrot.lane.b32.xlu0 %v426_v33, %s2382_s26  ;;  %227 = vrot.lane.b32.xlu1 %v226_v31, %s2381_s23  ;;  %v903_v57 = vor.u32 %v902_v52, %v898_v51  ;;  %v1194_v8 = vshll.u32 %v1698_v7, 16  ;;  %v1192_v10 = vshrl.u32 %v1698_v7, 16  ;;  %v1200_v14 = vrot.slane %v1698_v7, 1 }
  0x1f   : > { %v1049_v60 = vrot.slane %v1047_v58, 1  ;;  %v1341_v19 = vshll.u32 %v1703_v17, 16  ;;  %v1339_v20 = vshrl.u32 %v1703_v17, 16  ;;  %v1347_v24 = vrot.slane %v1703_v17, 1 }
  0x20   : > { %v1196_v11 = vrot.slane %v1194_v8, 1 }
  0x21   : > { %v1050_v61 = vor.u32 %v1049_v60, %v1045_v59  ;;  %v1343_v22 = vrot.slane %v1341_v19, 1 }
  0x22   : > { %224 = vrot.lane.b32.xlu0 %v223_v41, %s2382_s26  ;;  %613 = vrot.lane.b32.xlu1 %v612_v40, %s2381_s23  ;;  %v1197_v12 = vor.u32 %v1196_v11, %v1192_v10  ;;  %v1651_v40 = vld [vmem:[%s2428_s18 + $0x4c] sm:$0x1] }
  0x23   : > { %v1344_v23 = vor.u32 %v1343_v22, %v1339_v20  ;;  %v1708_v42 = vcombine.low %v2592_v39, %v1651_v40 }
  0x25   : > { %v1488_v44 = vshll.u32 %v1708_v42, 16  ;;  %v1494_v52 = vrot.slane %v1708_v42, 1 }
  0x26   : > { %610 = vrot.lane.b32.xlu0 %v609_v47, %s2382_s26  ;;  %760 = vrot.lane.b32.xlu1 %v759_v46, %s2381_s23  ;;  %v1486_v47 = vshrl.u32 %v1708_v42, 16 }
  0x27   : > { %v1490_v48 = vrot.slane %v1488_v44, 1 }
  0x29   : > { %v1491_v51 = vor.u32 %v1490_v48, %v1486_v47 }
  0x2a   : > { %757 = vrot.lane.b32.xlu0 %v756_v50, %s2382_s26  ;;  %907 = vrot.lane.b32.xlu1 %v906_v53, %s2381_s23  ;;  %v2613_v50 = vld [vmem:[%s3024_s1 + $0x60] sm:$0xff]   ;;  %v2637_v53 = vld [vmem:[%s3024_s1 + $0x70] sm:$0xff]  }
  0x2e   : > { %904 = vrot.lane.b32.xlu0 %v903_v57, %s2382_s26  ;;  %1054 = vrot.lane.b32.xlu1 %v1053_v62, %s2381_s23  ;;  %v2666_v57 = vld [vmem:[%s3024_s1 + $0x88] sm:$0xff]  }
  0x32   : > { %1051 = vrot.lane.b32.xlu0 %v1050_v61, %s2382_s26  ;;  %1201 = vrot.lane.b32.xlu1 %v1200_v14, %s2381_s23 }
  0x36   : > { %1198 = vrot.lane.b32.xlu0 %v1197_v12, %s2382_s26  ;;  %1348 = vrot.lane.b32.xlu1 %v1347_v24, %s2381_s23 }
  0x3a   : > { %1345 = vrot.lane.b32.xlu0 %v1344_v23, %s2382_s26  ;;  %1495 = vrot.lane.b32.xlu1 %v1494_v52, %s2381_s23 }
  0x3e   : > { %1492 = vrot.lane.b32.xlu0 %v1491_v51, %s2382_s26 }
  0x88   : > { %v252_v25 = vpop.permute.xlu1 %251 }
  0x8c   : > { %v249_v26 = vpop.permute.xlu0 %248  ;;  %v431_v31 = vpop.permute.xlu1 %430 }
  0x8d   : > { %v255_v28 = vsel %vm229_vm1, %v2438_v4, %v249_v26 }
  0x8e   : > { %v257_v30 = vsel %vm233_vm2, %v255_v28, %v252_v25 }
  0x8f   : > { %1895 = vmatmul.mubr.msk.bf16.vlgmr.msra.gmra.mrb[0].mxu0 %vm294_vm3, %v257_v30 }
  0x90   : > { %1899 = vmatpush3.bf16.msra.mxu0 %v2540_v27  ;;  %v428_v33 = vpop.permute.xlu0 %427  ;;  %1910 = vmatprep.mubr.msk.bf16.mxu0 %vm2380_vm0, %v2379_v1  ;;  %v228_v46 = vpop.permute.xlu1 %227 }
  0x91   : > { %v434_v35 = vsel %vm229_vm1, %v2442_v6, %v428_v33  ;;  %1900 = vmatprep.subr.bf16.mxu0 %v2379_v1  ;;  %v2578_v6 = vld [vmem:[%s3024_s1 + $0x18] sm:$0xff]  }
  0x92   : > { %v2558_v4 = vsel %vm233_vm2, %v434_v35, %v431_v31 }
  0x93   : > { %1943 = vmatmul.mubr.msk.bf16.vlgmr.msra.gmra.mrb[0].mxu1 %vm294_vm3, %v2558_v4 }
  0x94   : > { %1901 = vmatpush3.bf16.msra.mxu0 %v2550_v34  ;;  %1947 = vmatpush3.bf16.msra.mxu1 %v2540_v27  ;;  %v225_v41 = vpop.permute.xlu0 %224  ;;  %v614_v60 = vpop.permute.xlu1 %613 }
  0x95   : > { %1902 = vmatprep.subr.bf16.mxu0 %v2379_v1  ;;  %1948 = vmatprep.subr.bf16.mxu1 %v2379_v1  ;;  %v232_v45 = vsel %vm229_vm1, %v2449_v9, %v225_v41  ;;  %v2625_v9 = vld [vmem:[%s3024_s1 + $0x68] sm:$0xff]  }
  0x96   : > { %1958 = vmatprep.mubr.msk.bf16.mxu1 %vm2380_vm0, %v2379_v1  ;;  %v235_v49 = vsel %vm233_vm2, %v232_v45, %v228_v46 }
  0x98   : > { %1903 = vmatpush3.bf16.msra.mxu0 %v2567_v36  ;;  %1949 = vmatpush3.bf16.msra.mxu1 %v2550_v34  ;;  %v611_v58 = vpop.permute.xlu0 %610  ;;  %v761_v5 = vpop.permute.xlu1 %760 }
  0x99   : > { %1904 = vmatprep.subr.bf16.mxu0 %v2379_v1  ;;  %1950 = vmatprep.subr.bf16.mxu1 %v2379_v1  ;;  %v617_v59 = vsel %vm229_vm1, %v2459_v13, %v611_v58 }
  0x9a   : > { %v2681_v61 = vsel %vm233_vm2, %v617_v59, %v614_v60 }
  0x9c   : > { %1905 = vmatpush3.bf16.msra.mxu0 %v2578_v6  ;;  %1951 = vmatpush3.bf16.msra.mxu1 %v2567_v36  ;;  %v758_v13 = vpop.permute.xlu0 %757  ;;  %v908_v10 = vpop.permute.xlu1 %907 }
  0x9d   : > { %1906 = vmatprep.subr.bf16.mxu0 %v2379_v1  ;;  %1952 = vmatprep.subr.bf16.mxu1 %v2379_v1  ;;  %v764_v62 = vsel %vm229_vm1, %v2471_v21, %v758_v13 }
  0x9e   : > { %v2718_v7 = vsel %vm233_vm2, %v764_v62, %v761_v5 }
  0xa0   : > { %1907 = vmatpush3.bf16.msra.mxu0 %v2587_v37  ;;  %1953 = vmatpush3.bf16.msra.mxu1 %v2578_v6  ;;  %v905_v21 = vpop.permute.xlu0 %904  ;;  %v1055_v14 = vpop.permute.xlu1 %1054 }
  0xa1   : > { %1908 = vmatprep.subr.bf16.mxu0 %v2379_v1  ;;  %1954 = vmatprep.subr.bf16.mxu1 %v2379_v1  ;;  %v911_v8 = vsel %vm229_vm1, %v2487_v32, %v905_v21 }
  0xa2   : > { %v2787_v11 = vsel %vm233_vm2, %v911_v8, %v908_v10 }
  0xa4   : > { %1909 = vmatpush3.bf16.msra.mxu0 %v2601_v43  ;;  %1955 = vmatpush3.bf16.msra.mxu1 %v2587_v37  ;;  %v1052_v32 = vpop.permute.xlu0 %1051  ;;  %v1202_v19 = vpop.permute.xlu1 %1201 }
  0xa5   : > { %1914 = vmatprep.subr.bf16.mxu0 %v2379_v1  ;;  %1956 = vmatprep.subr.bf16.mxu1 %v2379_v1  ;;  %v1058_v12 = vsel %vm229_vm1, %v2514_v54, %v1052_v32 }
  0xa6   : > { %v2824_v16 = vsel %vm233_vm2, %v1058_v12, %v1055_v14 }
  0xa7   : > { %1911 = vmatmul.mubr.msk.bf16.vlgmr.msra.gmra.mrb[0].mxu0 %vm294_vm3, %v235_v49 }
  0xa8   : > { %1915 = vmatpush3.bf16.msra.mxu0 %v2613_v50  ;;  %1957 = vmatpush3.bf16.msra.mxu1 %v2601_v43  ;;  %v1199_v54 = vpop.permute.xlu0 %1198 }
  0xa9   : > { %1916 = vmatprep.subr.bf16.mxu0 %v2379_v1  ;;  %1962 = vmatprep.subr.bf16.mxu1 %v2379_v1  ;;  %v1205_v17 = vsel %vm229_vm1, %v2524_v63, %v1199_v54 }
  0xaa   : > { %1926 = vmatprep.mubr.msk.bf16.mxu0 %vm2380_vm0, %v2379_v1  ;;  %v2893_v20 = vsel %vm233_vm2, %v1205_v17, %v1202_v19 }
  0xab   : > { %1959 = vmatmul.mubr.msk.bf16.vlgmr.msra.gmra.mrb[0].mxu1 %vm294_vm3, %v257_v30 }
  0xac   : > { %1917 = vmatpush3.bf16.msra.mxu0 %v2625_v9  ;;  %1963 = vmatpush3.bf16.msra.mxu1 %v2613_v50 }
  0xad   : > { %1964 = vmatprep.subr.bf16.mxu1 %v2379_v1  ;;  %1918 = vmatprep.subr.bf16.mxu0 %v2379_v1 }
  0xae   : > { %1974 = vmatprep.mubr.msk.bf16.mxu1 %vm2380_vm0, %v2379_v1 }
  0xb0   : > { %1965 = vmatpush3.bf16.msra.mxu1 %v2625_v9  ;;  %1919 = vmatpush3.bf16.msra.mxu0 %v2637_v53 }
  0xb1   : > { %1920 = vmatprep.subr.bf16.mxu0 %v2379_v1  ;;  %1966 = vmatprep.subr.bf16.mxu1 %v2379_v1 }
  0xb4   : > { %1921 = vmatpush3.bf16.msra.mxu0 %v2648_v55  ;;  %1967 = vmatpush3.bf16.msra.mxu1 %v2637_v53 }
  0xb5   : > { %1922 = vmatprep.subr.bf16.mxu0 %v2379_v1  ;;  %1968 = vmatprep.subr.bf16.mxu1 %v2379_v1 }
  0xb8   : > { %1923 = vmatpush3.bf16.msra.mxu0 %v2657_v56  ;;  %1969 = vmatpush3.bf16.msra.mxu1 %v2648_v55 }
  0xb9   : > { %1924 = vmatprep.subr.bf16.mxu0 %v2379_v1  ;;  %1970 = vmatprep.subr.bf16.mxu1 %v2379_v1 }
  0xbc   : > { %1925 = vmatpush3.bf16.msra.mxu0 %v2666_v57  ;;  %1971 = vmatpush3.bf16.msra.mxu1 %v2657_v56 }
  0xbd   : > { %1972 = vmatprep.subr.bf16.mxu1 %v2379_v1  ;;  %1978 = vmatprep.subr.bf16.mxu0 %v2379_v1 }
  0xbf   : > { %1927 = vmatmul.mubr.msk.bf16.vlgmr.msra.gmra.mrb[0].mxu0 %vm294_vm3, %v2558_v4 }
  0xc0   : > { %1973 = vmatpush3.bf16.msra.mxu1 %v2666_v57  ;;  %1979 = vmatpush3.bf16.msra.mxu0 %v2409_v0 }
  0xc1   : > { %1980 = vmatprep.subr.bf16.mxu0 %v2379_v1  ;;  %2026 = vmatprep.subr.bf16.mxu1 %v2379_v1 }
  0xc2   : > { %1990 = vmatprep.mubr.msk.bf16.mxu0 %vm2380_vm0, %v2379_v1 }
  0xc3   : > { %1975 = vmatmul.mubr.msk.bf16.vlgmr.msra.gmra.mrb[0].mxu1 %vm294_vm3, %v2681_v61 }
  0xc4   : > { %1981 = vmatpush3.bf16.msra.mxu0 %v2419_v2  ;;  %2027 = vmatpush3.bf16.msra.mxu1 %v2409_v0 }
  0xc5   : > { %1982 = vmatprep.subr.bf16.mxu0 %v2379_v1  ;;  %2028 = vmatprep.subr.bf16.mxu1 %v2379_v1 }
  0xc6   : > { %2038 = vmatprep.mubr.msk.bf16.mxu1 %vm2380_vm0, %v2379_v1 }
  0xc8   : > { %1983 = vmatpush3.bf16.msra.mxu0 %v2434_v3  ;;  %2029 = vmatpush3.bf16.msra.mxu1 %v2419_v2 }
  0xc9   : > { %1984 = vmatprep.subr.bf16.mxu0 %v2379_v1  ;;  %2030 = vmatprep.subr.bf16.mxu1 %v2379_v1 }
  0xcc   : > { %1985 = vmatpush3.bf16.msra.mxu0 %v2466_v18  ;;  %2031 = vmatpush3.bf16.msra.mxu1 %v2434_v3 }
  0xcd   : > { %1986 = vmatprep.subr.bf16.mxu0 %v2379_v1  ;;  %2032 = vmatprep.subr.bf16.mxu1 %v2379_v1 }
  0xd0   : > { %1987 = vmatpush3.bf16.msra.mxu0 %v2481_v29  ;;  %2033 = vmatpush3.bf16.msra.mxu1 %v2466_v18 }
  0xd1   : > { %1988 = vmatprep.subr.bf16.mxu0 %v2379_v1  ;;  %2034 = vmatprep.subr.bf16.mxu1 %v2379_v1 }
  0xd4   : > { %1989 = vmatpush3.bf16.msra.mxu0 %v2497_v38  ;;  %2035 = vmatpush3.bf16.msra.mxu1 %v2481_v29 }
  0xd5   : > { %1994 = vmatprep.subr.bf16.mxu0 %v2379_v1  ;;  %2036 = vmatprep.subr.bf16.mxu1 %v2379_v1 }
  0xd7   : > { %1991 = vmatmul.mubr.msk.bf16.vlgmr.msra.gmra.mrb[4].mxu0 %vm294_vm3, %v2681_v61 }
  0xd8   : > { %1995 = vmatpush3.bf16.msra.mxu0 %v2540_v27  ;;  %2037 = vmatpush3.bf16.msra.mxu1 %v2497_v38 }
  0xd9   : > { %1996 = vmatprep.subr.bf16.mxu0 %v2379_v1  ;;  %2042 = vmatprep.subr.bf16.mxu1 %v2379_v1 }
  0xda   : > { %2006 = vmatprep.mubr.msk.bf16.mxu0 %vm2380_vm0, %v2379_v1 }
  0xdb   : > { %2039 = vmatmul.mubr.msk.bf16.vlgmr.msra.gmra.mrb[4].mxu1 %vm294_vm3, %v2718_v7 }
  0xdc   : > { %1997 = vmatpush3.bf16.msra.mxu0 %v2550_v34  ;;  %2043 = vmatpush3.bf16.msra.mxu1 %v2540_v27 }
  0xdd   : > { %1998 = vmatprep.subr.bf16.mxu0 %v2379_v1  ;;  %2044 = vmatprep.subr.bf16.mxu1 %v2379_v1 }
  0xde   : > { %2054 = vmatprep.mubr.msk.bf16.mxu1 %vm2380_vm0, %v2379_v1 }
  0xe0   : > { %1999 = vmatpush3.bf16.msra.mxu0 %v2567_v36  ;;  %2045 = vmatpush3.bf16.msra.mxu1 %v2550_v34 }
  0xe1   : > { %2000 = vmatprep.subr.bf16.mxu0 %v2379_v1  ;;  %2046 = vmatprep.subr.bf16.mxu1 %v2379_v1 }
  0xe4   : > { %2001 = vmatpush3.bf16.msra.mxu0 %v2578_v6  ;;  %2047 = vmatpush3.bf16.msra.mxu1 %v2567_v36 }
  0xe5   : > { %2002 = vmatprep.subr.bf16.mxu0 %v2379_v1  ;;  %2048 = vmatprep.subr.bf16.mxu1 %v2379_v1 }
  0xe8   : > { %2003 = vmatpush3.bf16.msra.mxu0 %v2587_v37  ;;  %2049 = vmatpush3.bf16.msra.mxu1 %v2578_v6 }
  0xe9   : > { %2004 = vmatprep.subr.bf16.mxu0 %v2379_v1  ;;  %2050 = vmatprep.subr.bf16.mxu1 %v2379_v1 }
  0xec   : > { %2005 = vmatpush3.bf16.msra.mxu0 %v2601_v43  ;;  %2051 = vmatpush3.bf16.msra.mxu1 %v2587_v37 }
  0xed   : > { %2010 = vmatprep.subr.bf16.mxu0 %v2379_v1  ;;  %2052 = vmatprep.subr.bf16.mxu1 %v2379_v1 }
  0xef   : > { %2007 = vmatmul.mubr.msk.bf16.vlgmr.msra.gmra.mrb[4].mxu0 %vm294_vm3, %v2558_v4 }
  0xf0   : > { %2011 = vmatpush3.bf16.msra.mxu0 %v2613_v50  ;;  %2053 = vmatpush3.bf16.msra.mxu1 %v2601_v43 }
  0xf1   : > { %2012 = vmatprep.subr.bf16.mxu0 %v2379_v1  ;;  %2058 = vmatprep.subr.bf16.mxu1 %v2379_v1 }
  0xf2   : > { %2022 = vmatprep.mubr.msk.bf16.mxu0 %vm2380_vm0, %v2379_v1 }
  0xf3   : > { %2055 = vmatmul.mubr.msk.bf16.vlgmr.msra.gmra.mrb[4].mxu1 %vm294_vm3, %v2681_v61 }
  0xf4   : > { %2013 = vmatpush3.bf16.msra.mxu0 %v2625_v9  ;;  %2059 = vmatpush3.bf16.msra.mxu1 %v2613_v50 }
  0xf5   : > { %2014 = vmatprep.subr.bf16.mxu0 %v2379_v1  ;;  %2060 = vmatprep.subr.bf16.mxu1 %v2379_v1 }
  0xf6   : > { %2070 = vmatprep.mubr.msk.bf16.mxu1 %vm2380_vm0, %v2379_v1 }
  0xf8   : > { %2015 = vmatpush3.bf16.msra.mxu0 %v2637_v53  ;;  %2061 = vmatpush3.bf16.msra.mxu1 %v2625_v9 }
  0xf9   : > { %2016 = vmatprep.subr.bf16.mxu0 %v2379_v1  ;;  %2062 = vmatprep.subr.bf16.mxu1 %v2379_v1 }
  0xfc   : > { %2017 = vmatpush3.bf16.msra.mxu0 %v2648_v55  ;;  %2063 = vmatpush3.bf16.msra.mxu1 %v2637_v53 }
  0xfd   : > { %2018 = vmatprep.subr.bf16.mxu0 %v2379_v1  ;;  %2064 = vmatprep.subr.bf16.mxu1 %v2379_v1 }
 0x100   : > { %2019 = vmatpush3.bf16.msra.mxu0 %v2657_v56  ;;  %2065 = vmatpush3.bf16.msra.mxu1 %v2648_v55 }
 0x101   : > { %2020 = vmatprep.subr.bf16.mxu0 %v2379_v1  ;;  %2066 = vmatprep.subr.bf16.mxu1 %v2379_v1 }
 0x104   : > { %2021 = vmatpush3.bf16.msra.mxu0 %v2666_v57  ;;  %2067 = vmatpush3.bf16.msra.mxu1 %v2657_v56 }
 0x105   : > { %2068 = vmatprep.subr.bf16.mxu1 %v2379_v1  ;;  %2074 = vmatprep.subr.bf16.mxu0 %v2379_v1 }
 0x107   : > { %2023 = vmatmul.mubr.msk.bf16.vlgmr.msra.gmra.mrb[4].mxu0 %vm294_vm3, %v2718_v7 }
 0x108   : > { %2069 = vmatpush3.bf16.msra.mxu1 %v2666_v57  ;;  %2075 = vmatpush3.bf16.msra.mxu0 %v2409_v0 }
 0x109   : > { %2076 = vmatprep.subr.bf16.mxu0 %v2379_v1  ;;  %2122 = vmatprep.subr.bf16.mxu1 %v2379_v1 }
 0x10a   : > { %2086 = vmatprep.mubr.msk.bf16.mxu0 %vm2380_vm0, %v2379_v1 }
 0x10b   : > { %2071 = vmatmul.mubr.msk.bf16.vlgmr.msra.gmra.mrb[4].mxu1 %vm294_vm3, %v2787_v11 }
 0x10c   : > { %2077 = vmatpush3.bf16.msra.mxu0 %v2419_v2  ;;  %2123 = vmatpush3.bf16.msra.mxu1 %v2409_v0 }
 0x10d   : > { %2078 = vmatprep.subr.bf16.mxu0 %v2379_v1  ;;  %2124 = vmatprep.subr.bf16.mxu1 %v2379_v1 }
 0x10e   : > { %2134 = vmatprep.mubr.msk.bf16.mxu1 %vm2380_vm0, %v2379_v1 }
 0x110   : > { %2079 = vmatpush3.bf16.msra.mxu0 %v2434_v3  ;;  %2125 = vmatpush3.bf16.msra.mxu1 %v2419_v2 }
 0x111   : > { %2080 = vmatprep.subr.bf16.mxu0 %v2379_v1  ;;  %2126 = vmatprep.subr.bf16.mxu1 %v2379_v1 }
 0x114   : > { %2081 = vmatpush3.bf16.msra.mxu0 %v2466_v18  ;;  %2127 = vmatpush3.bf16.msra.mxu1 %v2434_v3 }
 0x115   : > { %2082 = vmatprep.subr.bf16.mxu0 %v2379_v1  ;;  %2128 = vmatprep.subr.bf16.mxu1 %v2379_v1 }
 0x118   : > { %2083 = vmatpush3.bf16.msra.mxu0 %v2481_v29  ;;  %2129 = vmatpush3.bf16.msra.mxu1 %v2466_v18 }
 0x119   : > { %2084 = vmatprep.subr.bf16.mxu0 %v2379_v1  ;;  %2130 = vmatprep.subr.bf16.mxu1 %v2379_v1 }
 0x11c   : > { %2085 = vmatpush3.bf16.msra.mxu0 %v2497_v38  ;;  %2131 = vmatpush3.bf16.msra.mxu1 %v2481_v29 }
 0x11d   : > { %2090 = vmatprep.subr.bf16.mxu0 %v2379_v1  ;;  %2132 = vmatprep.subr.bf16.mxu1 %v2379_v1 }
 0x11f   : > { %2087 = vmatmul.mubr.msk.bf16.vlgmr.msra.gmra.mrb[8].mxu0 %vm294_vm3, %v2787_v11 }
 0x120   : > { %2091 = vmatpush3.bf16.msra.mxu0 %v2540_v27  ;;  %2133 = vmatpush3.bf16.msra.mxu1 %v2497_v38 }
 0x121   : > { %2092 = vmatprep.subr.bf16.mxu0 %v2379_v1  ;;  %2138 = vmatprep.subr.bf16.mxu1 %v2379_v1 }
 0x122   : > { %2102 = vmatprep.mubr.msk.bf16.mxu0 %vm2380_vm0, %v2379_v1 }
 0x123   : > { %2135 = vmatmul.mubr.msk.bf16.vlgmr.msra.gmra.mrb[8].mxu1 %vm294_vm3, %v2824_v16 }
 0x124   : > { %2093 = vmatpush3.bf16.msra.mxu0 %v2550_v34  ;;  %2139 = vmatpush3.bf16.msra.mxu1 %v2540_v27 }
 0x125   : > { %2094 = vmatprep.subr.bf16.mxu0 %v2379_v1  ;;  %2140 = vmatprep.subr.bf16.mxu1 %v2379_v1 }
 0x126   : > { %2150 = vmatprep.mubr.msk.bf16.mxu1 %vm2380_vm0, %v2379_v1 }
 0x128   : > { %2095 = vmatpush3.bf16.msra.mxu0 %v2567_v36  ;;  %2141 = vmatpush3.bf16.msra.mxu1 %v2550_v34 }
 0x129   : > { %2096 = vmatprep.subr.bf16.mxu0 %v2379_v1  ;;  %2142 = vmatprep.subr.bf16.mxu1 %v2379_v1 }
 0x12c   : > { %2097 = vmatpush3.bf16.msra.mxu0 %v2578_v6  ;;  %2143 = vmatpush3.bf16.msra.mxu1 %v2567_v36 }
 0x12d   : > { %2098 = vmatprep.subr.bf16.mxu0 %v2379_v1  ;;  %2144 = vmatprep.subr.bf16.mxu1 %v2379_v1 }
 0x130   : > { %2099 = vmatpush3.bf16.msra.mxu0 %v2587_v37  ;;  %2145 = vmatpush3.bf16.msra.mxu1 %v2578_v6 }
 0x131   : > { %2100 = vmatprep.subr.bf16.mxu0 %v2379_v1  ;;  %2146 = vmatprep.subr.bf16.mxu1 %v2379_v1 }
 0x134   : > { %2101 = vmatpush3.bf16.msra.mxu0 %v2601_v43  ;;  %2147 = vmatpush3.bf16.msra.mxu1 %v2587_v37 }
 0x135   : > { %2106 = vmatprep.subr.bf16.mxu0 %v2379_v1  ;;  %2148 = vmatprep.subr.bf16.mxu1 %v2379_v1 }
 0x137   : > { %2103 = vmatmul.mubr.msk.bf16.vlgmr.msra.gmra.mrb[8].mxu0 %vm294_vm3, %v2718_v7 }
 0x138   : > { %2107 = vmatpush3.bf16.msra.mxu0 %v2613_v50  ;;  %2149 = vmatpush3.bf16.msra.mxu1 %v2601_v43 }
 0x139   : > { %2108 = vmatprep.subr.bf16.mxu0 %v2379_v1  ;;  %2154 = vmatprep.subr.bf16.mxu1 %v2379_v1 }
 0x13a   : > { %2118 = vmatprep.mubr.msk.bf16.mxu0 %vm2380_vm0, %v2379_v1 }
 0x13b   : > { %2151 = vmatmul.mubr.msk.bf16.vlgmr.msra.gmra.mrb[8].mxu1 %vm294_vm3, %v2787_v11 }
 0x13c   : > { %2109 = vmatpush3.bf16.msra.mxu0 %v2625_v9  ;;  %2155 = vmatpush3.bf16.msra.mxu1 %v2613_v50 }
 0x13d   : > { %2110 = vmatprep.subr.bf16.mxu0 %v2379_v1  ;;  %2156 = vmatprep.subr.bf16.mxu1 %v2379_v1 }
 0x13e   : > { %2166 = vmatprep.mubr.msk.bf16.mxu1 %vm2380_vm0, %v2379_v1 }
 0x140   : > { %2111 = vmatpush3.bf16.msra.mxu0 %v2637_v53  ;;  %2157 = vmatpush3.bf16.msra.mxu1 %v2625_v9 }
 0x141   : > { %2112 = vmatprep.subr.bf16.mxu0 %v2379_v1  ;;  %2158 = vmatprep.subr.bf16.mxu1 %v2379_v1 }
 0x144   : > { %2113 = vmatpush3.bf16.msra.mxu0 %v2648_v55  ;;  %2159 = vmatpush3.bf16.msra.mxu1 %v2637_v53 }
 0x145   : > { %2114 = vmatprep.subr.bf16.mxu0 %v2379_v1  ;;  %2160 = vmatprep.subr.bf16.mxu1 %v2379_v1 }
 0x148   : > { %2115 = vmatpush3.bf16.msra.mxu0 %v2657_v56  ;;  %2161 = vmatpush3.bf16.msra.mxu1 %v2648_v55 }
 0x149   : > { %2116 = vmatprep.subr.bf16.mxu0 %v2379_v1  ;;  %2162 = vmatprep.subr.bf16.mxu1 %v2379_v1 }
 0x14c   : > { %2117 = vmatpush3.bf16.msra.mxu0 %v2666_v57  ;;  %2163 = vmatpush3.bf16.msra.mxu1 %v2657_v56 }
 0x14d   : > { %2164 = vmatprep.subr.bf16.mxu1 %v2379_v1  ;;  %2170 = vmatprep.subr.bf16.mxu0 %v2379_v1 }
 0x14f   : > { %2119 = vmatmul.mubr.msk.bf16.vlgmr.msra.gmra.mrb[8].mxu0 %vm294_vm3, %v2824_v16 }
 0x150   : > { %2165 = vmatpush3.bf16.msra.mxu1 %v2666_v57  ;;  %2171 = vmatpush3.bf16.msra.mxu0 %v2409_v0 }
 0x151   : > { %2172 = vmatprep.subr.bf16.mxu0 %v2379_v1  ;;  %2218 = vmatprep.subr.bf16.mxu1 %v2379_v1 }
 0x152   : > { %2182 = vmatprep.mubr.msk.bf16.mxu0 %vm2380_vm0, %v2379_v1 }
 0x153   : > { %2167 = vmatmul.mubr.msk.bf16.vlgmr.msra.gmra.mrb[8].mxu1 %vm294_vm3, %v2893_v20 }
 0x154   : > { %2173 = vmatpush3.bf16.msra.mxu0 %v2419_v2  ;;  %2219 = vmatpush3.bf16.msra.mxu1 %v2409_v0  ;;  %v1346_v0 = vpop.permute.xlu0 %1345 }
 0x155   : > { %2174 = vmatprep.subr.bf16.mxu0 %v2379_v1  ;;  %2220 = vmatprep.subr.bf16.mxu1 %v2379_v1 }
 0x156   : > { %2230 = vmatprep.mubr.msk.bf16.mxu1 %vm2380_vm0, %v2379_v1 }
 0x158   : > { %2175 = vmatpush3.bf16.msra.mxu0 %v2434_v3  ;;  %2221 = vmatpush3.bf16.msra.mxu1 %v2419_v2  ;;  %v1352_v2 = vsel %vm229_vm1, %v2531_v15, %v1346_v0 }
 0x159   : > { %2176 = vmatprep.subr.bf16.mxu0 %v2379_v1  ;;  %2222 = vmatprep.subr.bf16.mxu1 %v2379_v1 }
 0x15c   : > { %2177 = vmatpush3.bf16.msra.mxu0 %v2466_v18  ;;  %2223 = vmatpush3.bf16.msra.mxu1 %v2434_v3  ;;  %v1349_v3 = vpop.permute.xlu1 %1348 }
 0x15d   : > { %2178 = vmatprep.subr.bf16.mxu0 %v2379_v1  ;;  %2224 = vmatprep.subr.bf16.mxu1 %v2379_v1 }
 0x160   : > { %2179 = vmatpush3.bf16.msra.mxu0 %v2481_v29  ;;  %2225 = vmatpush3.bf16.msra.mxu1 %v2466_v18  ;;  %v2930_v18 = vsel %vm233_vm2, %v1352_v2, %v1349_v3  ;;  %v1496_v24 = vpop.permute.xlu1 %1495 }
 0x161   : > { %2180 = vmatprep.subr.bf16.mxu0 %v2379_v1  ;;  %2226 = vmatprep.subr.bf16.mxu1 %v2379_v1 }
 0x164   : > { %2181 = vmatpush3.bf16.msra.mxu0 %v2497_v38  ;;  %2227 = vmatpush3.bf16.msra.mxu1 %v2481_v29 }
 0x165   : > { %2186 = vmatprep.subr.bf16.mxu0 %v2379_v1  ;;  %2228 = vmatprep.subr.bf16.mxu1 %v2379_v1 }
 0x167   : > { %2183 = vmatmul.mubr.msk.bf16.vlgmr.msra.gmra.mrb[12].mxu0 %vm294_vm3, %v2893_v20 }
 0x168   : > { %2187 = vmatpush3.bf16.msra.mxu0 %v2540_v27  ;;  %2229 = vmatpush3.bf16.msra.mxu1 %v2497_v38  ;;  %v1493_v38 = vpop.permute.xlu0 %1492 }
 0x169   : > { %2188 = vmatprep.subr.bf16.mxu0 %v2379_v1  ;;  %2234 = vmatprep.subr.bf16.mxu1 %v2379_v1  ;;  %v1499_v23 = vsel %vm229_vm1, %v2592_v39, %v1493_v38 }
 0x16a   : > { %2198 = vmatprep.mubr.msk.bf16.mxu0 %vm2380_vm0, %v2379_v1  ;;  %v1501_v28 = vsel %vm233_vm2, %v1499_v23, %v1496_v24 }
 0x16b   : > { %2231 = vmatmul.mubr.msk.bf16.vlgmr.msra.gmra.mrb[12].mxu1 %vm294_vm3, %v2930_v18 }
 0x16c   : > { %2189 = vmatpush3.bf16.msra.mxu0 %v2550_v34  ;;  %2235 = vmatpush3.bf16.msra.mxu1 %v2540_v27 }
 0x16d   : > { %2190 = vmatprep.subr.bf16.mxu0 %v2379_v1  ;;  %2236 = vmatprep.subr.bf16.mxu1 %v2379_v1 }
 0x16e   : > { %2246 = vmatprep.mubr.msk.bf16.mxu1 %vm2380_vm0, %v2379_v1 }
 0x170   : > { %2191 = vmatpush3.bf16.msra.mxu0 %v2567_v36  ;;  %2237 = vmatpush3.bf16.msra.mxu1 %v2550_v34 }
 0x171   : > { %2192 = vmatprep.subr.bf16.mxu0 %v2379_v1  ;;  %2238 = vmatprep.subr.bf16.mxu1 %v2379_v1 }
 0x174   : > { %2193 = vmatpush3.bf16.msra.mxu0 %v2578_v6  ;;  %2239 = vmatpush3.bf16.msra.mxu1 %v2567_v36 }
 0x175   : > { %2194 = vmatprep.subr.bf16.mxu0 %v2379_v1  ;;  %2240 = vmatprep.subr.bf16.mxu1 %v2379_v1 }
 0x178   : > { %2195 = vmatpush3.bf16.msra.mxu0 %v2587_v37  ;;  %2241 = vmatpush3.bf16.msra.mxu1 %v2578_v6 }
 0x179   : > { %2196 = vmatprep.subr.bf16.mxu0 %v2379_v1  ;;  %2242 = vmatprep.subr.bf16.mxu1 %v2379_v1 }
 0x17c   : > { %2197 = vmatpush3.bf16.msra.mxu0 %v2601_v43  ;;  %2243 = vmatpush3.bf16.msra.mxu1 %v2587_v37 }
 0x17d   : > { %2202 = vmatprep.subr.bf16.mxu0 %v2379_v1  ;;  %2244 = vmatprep.subr.bf16.mxu1 %v2379_v1 }
 0x17f   : > { %2199 = vmatmul.mubr.msk.bf16.vlgmr.msra.gmra.mrb[12].mxu0 %vm294_vm3, %v2824_v16 }
 0x180   : > { %2203 = vmatpush3.bf16.msra.mxu0 %v2613_v50  ;;  %2245 = vmatpush3.bf16.msra.mxu1 %v2601_v43 }
 0x181   : > { %2204 = vmatprep.subr.bf16.mxu0 %v2379_v1  ;;  %2250 = vmatprep.subr.bf16.mxu1 %v2379_v1 }
 0x182   : > { %2214 = vmatprep.mubr.msk.bf16.mxu0 %vm2380_vm0, %v2379_v1 }
 0x183   : > { %2247 = vmatmul.mubr.msk.bf16.vlgmr.msra.gmra.mrb[12].mxu1 %vm294_vm3, %v2893_v20 }
 0x184   : > { %2205 = vmatpush3.bf16.msra.mxu0 %v2625_v9  ;;  %2251 = vmatpush3.bf16.msra.mxu1 %v2613_v50 }
 0x185   : > { %2206 = vmatprep.subr.bf16.mxu0 %v2379_v1  ;;  %2252 = vmatprep.subr.bf16.mxu1 %v2379_v1 }
 0x186   : > { %2262 = vmatprep.mubr.msk.bf16.mxu1 %vm2380_vm0, %v2379_v1 }
 0x188   : > { %2207 = vmatpush3.bf16.msra.mxu0 %v2637_v53  ;;  %2253 = vmatpush3.bf16.msra.mxu1 %v2625_v9 }
 0x189   : > { %2208 = vmatprep.subr.bf16.mxu0 %v2379_v1  ;;  %2254 = vmatprep.subr.bf16.mxu1 %v2379_v1 }
 0x18c   : > { %2209 = vmatpush3.bf16.msra.mxu0 %v2648_v55  ;;  %2255 = vmatpush3.bf16.msra.mxu1 %v2637_v53 }
 0x18d   : > { %2210 = vmatprep.subr.bf16.mxu0 %v2379_v1  ;;  %2256 = vmatprep.subr.bf16.mxu1 %v2379_v1 }
 0x190   : > { %2211 = vmatpush3.bf16.msra.mxu0 %v2657_v56  ;;  %2257 = vmatpush3.bf16.msra.mxu1 %v2648_v55 }
 0x191   : > { %2212 = vmatprep.subr.bf16.mxu0 %v2379_v1  ;;  %2258 = vmatprep.subr.bf16.mxu1 %v2379_v1 }
 0x192   : > { %v509_v29 = vpop.f32.mrb[0].mxu0 }
 0x193   : > { %517 = vst.msk [vmem:[%s2990_s30] sm:$0xff] %vm516_vm4, %v509_v29  ;;  %v1928_v63 = vpop.f32.mrb[1].mxu0 }
 0x194   : > { %v512_v15 = vpop.f32.mrb[2].mxu0  ;;  %2213 = vmatpush3.bf16.msra.mxu0 %v2666_v57  ;;  %2259 = vmatpush3.bf16.msra.mxu1 %v2657_v56 }
 0x195   : > { %v1929_v22 = vpop.f32.mrb[3].mxu0  ;;  %2260 = vmatprep.subr.bf16.mxu1 %v2379_v1 }
 0x196   : > { %v656_v25 = vpop.f32.mrb[0].mxu1 }
 0x197   : > { %1680 = vst.msk [vmem:[%s2990_s30 + $0x8] sm:$0xff] %vm516_vm4, %v656_v25  ;;  %v1976_v26 = vpop.f32.mrb[1].mxu1  ;;  %2215 = vmatmul.mubr.msk.bf16.vlgmr.msra.gmra.mrb[12].mxu0 %vm294_vm3, %v2930_v18 }
 0x198   : > { %v659_v27 = vpop.f32.mrb[2].mxu1  ;;  %2261 = vmatpush3.bf16.msra.mxu1 %v2666_v57 }
 0x199   : > { %v1977_v30 = vpop.f32.mrb[3].mxu1 }
 0x19b   : > { %2263 = vmatmul.mubr.msk.bf16.vlgmr.msra.gmra.mrb[12].mxu1 %vm294_vm3, %v1501_v28 }
 0x1da   : > { %v803_v1 = vpop.f32.mrb[4].mxu0 }
 0x1db   : > { %1685 = vst.msk [vmem:[%s2990_s30 + $0x10] sm:$0xff] %vm516_vm4, %v803_v1  ;;  %v2024_v31 = vpop.f32.mrb[5].mxu0 }
 0x1dc   : > { %v806_v33 = vpop.f32.mrb[6].mxu0 }
 0x1dd   : > { %v2025_v34 = vpop.f32.mrb[7].mxu0 }
 0x1de   : > { %v950_v35 = vpop.f32.mrb[4].mxu1 }
 0x1df   : > { %1690 = vst.msk [vmem:[%s2990_s30 + $0x18] sm:$0xff] %vm516_vm4, %v950_v35  ;;  %v2072_v4 = vpop.f32.mrb[5].mxu1 }
 0x1e0   : > { %v953_v36 = vpop.f32.mrb[6].mxu1 }
 0x1e1   : > { %v2073_v6 = vpop.f32.mrb[7].mxu1 }
 0x222   : > { %v1097_v37 = vpop.f32.mrb[8].mxu0 }
 0x223   : > { %1695 = vst.msk [vmem:[%s2990_s30 + $0x20] sm:$0xff] %vm516_vm4, %v1097_v37  ;;  %v2120_v39 = vpop.f32.mrb[9].mxu0 }
 0x224   : > { %v1100_v40 = vpop.f32.mrb[10].mxu0 }
 0x225   : > { %v2121_v41 = vpop.f32.mrb[11].mxu0 }
 0x226   : > { %v1244_v42 = vpop.f32.mrb[8].mxu1 }
 0x227   : > { %1700 = vst.msk [vmem:[%s2990_s30 + $0x28] sm:$0xff] %vm516_vm4, %v1244_v42  ;;  %v2168_v43 = vpop.f32.mrb[9].mxu1 }
 0x228   : > { %v1247_v44 = vpop.f32.mrb[10].mxu1 }
 0x229   : > { %v2169_v45 = vpop.f32.mrb[11].mxu1 }
 0x26a   : > { %v1391_v46 = vpop.f32.mrb[12].mxu0 }
 0x26b   : > { %1705 = vst.msk [vmem:[%s2990_s30 + $0x30] sm:$0xff] %vm516_vm4, %v1391_v46  ;;  %v2216_v47 = vpop.f32.mrb[13].mxu0 }
 0x26c   : > { %v1394_v48 = vpop.f32.mrb[14].mxu0 }
 0x26d   : > { %v2217_v49 = vpop.f32.mrb[15].mxu0 }
 0x26e   : > { %v1538_v50 = vpop.f32.mrb[12].mxu1 }
 0x26f   : > { %1710 = vst.msk [vmem:[%s2990_s30 + $0x38] sm:$0xff] %vm516_vm4, %v1538_v50  ;;  %v2264_v51 = vpop.f32.mrb[13].mxu1 }
 0x270   : > { %v1541_v52 = vpop.f32.mrb[14].mxu1 }
 0x271   : > { %v2265_v9 = vpop.f32.mrb[15].mxu1 }
 0x272 PF: > { %s12_s9 = sadd.s32 1, %s2377_s9  }
 0x273   : > { %p9_p4 = scmp.ge.s32.totalorder %s12_s9, 4  }
 0x275   :  { %11 = sbr.rel (!%p9_p4) target bundleno = 1 (0x1), region = 76 }

// kernel: densenet_forward.24
= control target key start
LH: loop header
LB: loop body
LE: loop exit
PB: predicated region body
PF: predicated region fallthrough
CT: control target
= control target key end

     0   :  { %s495_s15 = smov 0   ;;  %s543_s0 = inlined_call_operand.vmem [shape: f32[128,32], index: 0, kind: input, shape index: {}]   ;;  %s544_s1 = inlined_call_operand.vmem [shape: f32[1,32], index: 1, kind: input, shape index: {}]   ;;  %s545_s2 = inlined_call_operand.vmem [shape: f32[1,32], index: 2, kind: input, shape index: {}]   ;;  %s546_s3 = inlined_call_operand.vmem [shape: bf16[32,16], index: 3, kind: input, shape index: {}]   ;;  %s547_s4 = inlined_call_operand.vmem [shape: f32[128,16], index: 4, kind: output, shape index: {}]  }
   0x1 LB: > { %s411_s16 = sadd.s32 4294967295, %s468_s15   ;;  %p415_p0 = scmp.ge.s32.totalorder %s468_s15, 1  ;;  %s468_s15 = sphi %s495_s15, %s14_s15  }
   0x2   : > { %p163_p1 = scmp.lt.s32.totalorder %s468_s15, 3 }
   0x4   : > { %p164_p2 = pnand %p415_p0, %p163_p1 }
   0x5   : > { %v460_v0 = vld [vmem:[%s546_s3] sm:$0xff] (!%p164_p2)   ;;  %s416_s19 = sshll.u32 (!%p164_p2), %s411_s16, 3  ;;  %v461_v1 = vld [vmem:[%s546_s3 + $0x8] sm:$0xff] (!%p164_p2)   ;;  %vm268_vm0 = vcmask (!%p164_p2), 261120   ;;  %vm346_vm1 = vcmask (!%p164_p2), 130048  }
   0x6   : > { %167 = sbr.rel (%p164_p2) target bundleno = 244 (0xf4), region = 36  ;;  %p190_p3 = scmp.lt.s32.totalorder (!%p164_p2), %s416_s19, 15  ;;  %436 = vmatprep.subr.bf16.mxu0 (!%p164_p2), %v460_v0  ;;  %448 = vmatprep.subr.bf16.mxu1 (!%p164_p2), %v460_v0  ;;  %v420_v2 = vld [vmem:[%s544_s1] ss:$0 sm:$0xff] (!%p164_p2) }
   0x7   : > { %437 = vmatpush3.bf16.msra.mxu0 (!%p164_p2), %v460_v0  ;;  %450 = vmatpush3.bf16.msra.mxu1 (!%p164_p2), %v460_v0  ;;  %v421_v3 = vld [vmem:[%s545_s2] ss:$0 sm:$0xff] (!%p164_p2) }
   0x8   : > { %438 = vmatprep.subr.bf16.mxu0 (!%p164_p2), %v461_v1  ;;  %449 = vmatprep.subr.bf16.mxu1 (!%p164_p2), %v461_v1 }
   0xb   : > { %439 = vmatpush3.bf16.msra.mxu0 (!%p164_p2), %v461_v1  ;;  %451 = vmatpush3.bf16.msra.mxu1 (!%p164_p2), %v461_v1 }
   0xd   : > { %s549_s19 = smov (!%p190_p3, %s416_s19), 15 }
   0xe   : > { %s417_s22 = sshll.u32 %s549_s19, 3 }
   0xf   : > { %s193_s27 = scalar_lea.vmem %s543_s0, %s417_s22  ;;  %s199_s6 = scalar_lea.vmem %s547_s4, %s417_s22 }
  0x10   : > { %v202_v4 = vld [vmem:[%s193_s27] sm:$0xff]  ;;  %v203_v5 = vld [vmem:[%s193_s27 + $0x8] sm:$0xff]  ;;  %v204_v11 = vld [vmem:[%s193_s27 + $0x10] sm:$0xff] }
  0x11   : > { %v206_v6 = vld [vmem:[%s193_s27 + $0x20] sm:$0xff]  ;;  %v217_v7 = vmul.f32 %v420_v2, %v202_v4  ;;  %v218_v8 = vmul.f32 %v420_v2, %v203_v5  ;;  %v207_v9 = vld [vmem:[%s193_s27 + $0x28] sm:$0xff]  ;;  %v205_v12 = vld [vmem:[%s193_s27 + $0x18] sm:$0xff]  ;;  %v219_v14 = vmul.f32 %v420_v2, %v204_v11 }
  0x12   : > { %v221_v10 = vmul.f32 %v420_v2, %v206_v6  ;;  %v222_v13 = vmul.f32 %v420_v2, %v207_v9  ;;  %v220_v15 = vmul.f32 %v420_v2, %v205_v12  ;;  %v208_v16 = vld [vmem:[%s193_s27 + $0x30] sm:$0xff]  ;;  %v209_v17 = vld [vmem:[%s193_s27 + $0x38] sm:$0xff] }
  0x13   : > { %v232_v18 = vadd.f32 %v421_v3, %v217_v7  ;;  %v233_v19 = vadd.f32 %v421_v3, %v218_v8  ;;  %v223_v21 = vmul.f32 %v420_v2, %v208_v16  ;;  %v234_v23 = vadd.f32 %v421_v3, %v219_v14 }
  0x14   : > { %v236_v20 = vadd.f32 %v421_v3, %v221_v10  ;;  %v237_v22 = vadd.f32 %v421_v3, %v222_v13  ;;  %v235_v24 = vadd.f32 %v421_v3, %v220_v15  ;;  %v224_v25 = vmul.f32 %v420_v2, %v209_v17 }
  0x15   : > { %v240_v26 = vmax.f32 %v232_v18, 0.0  ;;  %v241_v27 = vmax.f32 %v233_v19, 0.0  ;;  %v238_v29 = vadd.f32 %v421_v3, %v223_v21  ;;  %v242_v31 = vmax.f32 %v234_v23, 0.0 }
  0x16   : > { %v244_v28 = vmax.f32 %v236_v20, 0.0  ;;  %v245_v30 = vmax.f32 %v237_v22, 0.0  ;;  %v243_v32 = vmax.f32 %v235_v24, 0.0  ;;  %v239_v33 = vadd.f32 %v421_v3, %v224_v25 }
  0x17   : > { %v248_v34 = vpack.c.bf16 %v241_v27, %v240_v26  ;;  %v246_v35 = vmax.f32 %v238_v29, 0.0 }
  0x18   : > { %v250_v36 = vpack.c.bf16 %v245_v30, %v244_v28  ;;  %v249_v37 = vpack.c.bf16 %v243_v32, %v242_v31  ;;  %v247_v38 = vmax.f32 %v239_v33, 0.0 }
  0x19   : > { %440 = vmatprep.mubr.msk.bf16.mxu0 %vm268_vm0, %v248_v34 }
  0x1a   : > { %444 = vmatprep.mubr.msk.bf16.mxu1 %vm268_vm0, %v250_v36  ;;  %441 = vmatmul.mubr.msk.bf16.vlgmr.msra.gmra.mrb[0].mxu0 %vm268_vm0, %v249_v37  ;;  %v251_v39 = vpack.c.bf16 %v247_v38, %v246_v35 }
  0x1c   : > { %445 = vmatmul.mubr.msk.bf16.vlgmr.msra.gmra.mrb[0].mxu1 %vm268_vm0, %v251_v39 }
  0xed   : > { %v442_v40 = vpop.f32.mrb[0].mxu0 }
  0xee   : > { %349 = vst.msk [vmem:[%s199_s6 + $0x10] sm:$0xff] %vm346_vm1, %v442_v40  ;;  %v315_v41 = vpop.f32.mrb[1].mxu0 }
  0xef   : > { %v446_v42 = vpop.f32.mrb[0].mxu1  ;;  %347 = vst.msk [vmem:[%s199_s6] sm:$0xff] %vm346_vm1, %v315_v41  ;;  %v443_v43 = vpop.f32.mrb[2].mxu0 }
  0xf0   : > { %353 = vst.msk [vmem:[%s199_s6 + $0x30] sm:$0xff] %vm346_vm1, %v446_v42  ;;  %v331_v44 = vpop.f32.mrb[1].mxu1  ;;  %350 = vst.msk [vmem:[%s199_s6 + $0x18] sm:$0xff] %vm346_vm1, %v443_v43  ;;  %v318_v45 = vpop.f32.mrb[3].mxu0 }
  0xf1   : > { %351 = vst.msk [vmem:[%s199_s6 + $0x20] sm:$0xff] %vm346_vm1, %v331_v44  ;;  %v447_v46 = vpop.f32.mrb[2].mxu1  ;;  %348 = vst.msk [vmem:[%s199_s6 + $0x8] sm:$0xff] %vm346_vm1, %v318_v45 }
  0xf2   : > { %354 = vst.msk [vmem:[%s199_s6 + $0x38] sm:$0xff] %vm346_vm1, %v447_v46  ;;  %v334_v47 = vpop.f32.mrb[3].mxu1 }
  0xf3   : > { %352 = vst.msk [vmem:[%s199_s6 + $0x28] sm:$0xff] %vm346_vm1, %v334_v47 }
  0xf4 PF: > { %s14_s15 = sadd.s32 1, %s468_s15  }
  0xf5   : > { %p11_p4 = scmp.ge.s32.totalorder %s14_s15, 4  }
  0xf7   :  { %13 = sbr.rel (!%p11_p4) target bundleno = 1 (0x1), region = 66 }

// kernel: densenet_forward.25
= control target key start
LH: loop header
LB: loop body
LE: loop exit
PB: predicated region body
PF: predicated region fallthrough
CT: control target
= control target key end

     0   :  { %s517_s21 = smov 0   ;;  %s556_s0 = inlined_call_operand.vmem [shape: f32[32,32], index: 0, kind: input, shape index: {}]   ;;  %s557_s1 = inlined_call_operand.vmem [shape: f32[1,32], index: 1, kind: input, shape index: {}]   ;;  %s558_s2 = inlined_call_operand.vmem [shape: f32[1,32], index: 2, kind: input, shape index: {}]   ;;  %s559_s3 = inlined_call_operand.vmem [shape: bf16[32,32], index: 3, kind: input, shape index: {}]   ;;  %s560_s4 = inlined_call_operand.vmem [shape: f32[1,32], index: 4, kind: input, shape index: {}]   ;;  %s561_s5 = inlined_call_operand.vmem [shape: f32[1,32], index: 5, kind: input, shape index: {}]   ;;  %s562_s6 = inlined_call_operand.vmem [shape: bf16[32,32], index: 6, kind: output, shape index: {}]  }
   0x1 LB: > { %s427_s22 = sadd.s32 4294967295, %s478_s21   ;;  %p431_p0 = scmp.ge.s32.totalorder %s478_s21, 1  ;;  %s478_s21 = sphi %s517_s21, %s16_s21  }
   0x2   : > { %p213_p1 = scmp.lt.s32.totalorder %s478_s21, 3 }
   0x4   : > { %p214_p2 = pnand %p431_p0, %p213_p1 }
   0x5   : > { %v470_v0 = vld [vmem:[%s559_s3] sm:$0xff] (!%p214_p2)   ;;  %v480_v1 = vmov (!%p214_p2), 0.0   ;;  %v471_v2 = vld [vmem:[%s559_s3 + $0x8] sm:$0xff] (!%p214_p2)   ;;  %vm481_vm0 = vmmov (!%p214_p2), 0   ;;  %s432_s27 = sshll.u32 (!%p214_p2), %s427_s22, 1  ;;  %vm295_vm1 = vcmask (!%p214_p2), 261120  }
   0x6   : > { %217 = sbr.rel (%p214_p2) target bundleno = 248 (0xf8), region = 44  ;;  %452 = vmatprep.subr.bf16.mxu0 (!%p214_p2), %v480_v1  ;;  %456 = vmatprep.mubr.msk.bf16.mxu0 (!%p214_p2), %vm481_vm0, %v480_v1  ;;  %p244_p3 = scmp.lt.s32.totalorder (!%p214_p2), %s432_s27, 3  ;;  %v436_v3 = vld [vmem:[%s557_s1] ss:$0 sm:$0xff] (!%p214_p2)  ;;  %vm368_vm2 = vcmask (!%p214_p2), 257024  }
   0x7   : > { %453 = vmatpush3.bf16.msra.mxu0 (!%p214_p2), %v470_v0  ;;  %v437_v6 = vld [vmem:[%s558_s2] ss:$0 sm:$0xff] (!%p214_p2) }
   0x8   : > { %454 = vmatprep.subr.bf16.mxu0 (!%p214_p2), %v480_v1  ;;  %v441_v14 = vld [vmem:[%s560_s4] ss:$0 sm:$0xff] (!%p214_p2) }
   0x9   : > { %v442_v16 = vld [vmem:[%s561_s5] ss:$0 sm:$0xff] (!%p214_p2) }
   0xb   : > { %455 = vmatpush3.bf16.msra.mxu0 (!%p214_p2), %v471_v2 }
   0xd   : > { %s564_s27 = smov (!%p244_p3, %s432_s27), 3 }
   0xe   : > { %s433_s28 = sshll.u32 %s564_s27, 3  ;;  %s435_s16 = sshll.u32 %s564_s27, 2 }
   0xf   : > { %s247_s9 = scalar_lea.vmem %s556_s0, %s433_s28  ;;  %s253_s19 = scalar_lea.vmem %s562_s6, %s435_s16 }
  0x10   : > { %v256_v4 = vld [vmem:[%s247_s9] sm:$0xff]  ;;  %v257_v5 = vld [vmem:[%s247_s9 + $0x8] sm:$0xff] }
  0x11   : > { %v265_v7 = vmul.f32 %v436_v3, %v256_v4  ;;  %v266_v8 = vmul.f32 %v436_v3, %v257_v5 }
  0x13   : > { %v274_v9 = vadd.f32 %v437_v6, %v265_v7  ;;  %v275_v10 = vadd.f32 %v437_v6, %v266_v8 }
  0x15   : > { %v276_v11 = vmax.f32 %v274_v9, 0.0  ;;  %v277_v12 = vmax.f32 %v275_v10, 0.0 }
  0x17   : > { %v278_v13 = vpack.c.bf16 %v277_v12, %v276_v11 }
  0x19   : > { %457 = vmatmul.mubr.msk.bf16.vlgmr.msra.gmra.mrb[0].mxu0 %vm295_vm1, %v278_v13 }
  0xec   : > { %v333_v15 = vpop.f32.mrb[0].mxu0 }
  0xed   : > { %v347_v17 = vmul.f32 %v441_v14, %v333_v15  ;;  %v458_v18 = vpop.f32.mrb[1].mxu0 }
  0xee   : > { %v336_v19 = vpop.f32.mrb[2].mxu0 }
  0xef   : > { %v356_v20 = vadd.f32 %v442_v16, %v347_v17  ;;  %v348_v21 = vmul.f32 %v441_v14, %v336_v19  ;;  %v459_v22 = vpop.f32.mrb[3].mxu0 }
  0xf1   : > { %v358_v23 = vmax.f32 %v356_v20, 0.0  ;;  %v357_v24 = vadd.f32 %v442_v16, %v348_v21 }
  0xf3   : > { %v447_v25 = vpack.c.bf16 %v358_v23, %v358_v23  ;;  %v359_v26 = vmax.f32 %v357_v24, 0.0 }
  0xf5   : > { %369 = vst.msk [vmem:[%s253_s19] sm:$0xf] %vm368_vm2, %v447_v25  ;;  %v448_v27 = vpack.c.bf16 %v359_v26, %v359_v26 }
  0xf7   : > { %370 = vst.msk [vmem:[%s253_s19 + $0x4] sm:$0xf] %vm368_vm2, %v448_v27 }
  0xf8 PF: > { %s16_s21 = sadd.s32 1, %s478_s21  }
  0xf9   : > { %p13_p4 = scmp.ge.s32.totalorder %s16_s21, 4  }
  0xfb   :  { %15 = sbr.rel (!%p13_p4) target bundleno = 1 (0x1), region = 74 }

// kernel: densenet_forward.26
= control target key start
LH: loop header
LB: loop body
LE: loop exit
PB: predicated region body
PF: predicated region fallthrough
CT: control target
= control target key end

     0   :  { %s1435_s9 = smov 0   ;;  %s1807_s0 = inlined_call_operand.vmem [shape: bf16[2,6,6,32], index: 0, kind: input, shape index: {}]   ;;  %s1808_s1 = inlined_call_operand.vmem [shape: bf16[3,96,8], index: 1, kind: input, shape index: {}]   ;;  %s1809_s2 = inlined_call_operand.vmem [shape: f32[2,4,4,8], index: 2, kind: output, shape index: {}]  }
   0x1 LB: > { %s984_s10 = sadd.s32 4294967295, %s1414_s9   ;;  %p988_p0 = scmp.ge.s32.totalorder %s1414_s9, 1  ;;  %s1414_s9 = sphi %s1435_s9, %s12_s9  }
   0x2   : > { %p112_p1 = scmp.lt.s32.totalorder %s1414_s9, 3 }
   0x4   : > { %p113_p2 = pnand %p988_p0, %p112_p1 }
   0x5   : > { %p134_p3 = scmp.lt.s32.totalorder (!%p113_p2), %s984_s10, 1  ;;  %v1446_v0 = vld [vmem:[%s1808_s1 + $0x30] sm:$0xff] (!%p113_p2)   ;;  %v1416_v1 = vmov (!%p113_p2), 0.0   ;;  %v1456_v2 = vld [vmem:[%s1808_s1 + $0x38] sm:$0xff] (!%p113_p2)   ;;  %v1471_v3 = vld [vmem:[%s1808_s1 + $0x40] sm:$0xff] (!%p113_p2)   ;;  %vm1417_vm0 = vmmov (!%p113_p2), 0  }
   0x6   : > { %116 = sbr.rel (%p113_p2) target bundleno = 482 (0x1e2), region = 28  ;;  %1147 = vmatprep.subr.bf16.mxu0 (!%p113_p2), %v1416_v1  ;;  %1195 = vmatprep.subr.bf16.mxu1 (!%p113_p2), %v1416_v1  ;;  %v1502_v14 = vld [vmem:[%s1808_s1 + $0x48] sm:$0xff] (!%p113_p2)   ;;  %s1418_s23 = smov (!%p113_p2), 64   ;;  %v1517_v24 = vld [vmem:[%s1808_s1 + $0x50] sm:$0xff] (!%p113_p2)   ;;  %v1529_v31 = vld [vmem:[%s1808_s1 + $0x58] sm:$0xff] (!%p113_p2)   ;;  %vm209_vm1 = vcmask (!%p113_p2), 261120  }
   0x7   : > { %1148 = vmatpush3.bf16.msra.mxu0 (!%p113_p2), %v1446_v0  ;;  %1196 = vmatpush3.bf16.msra.mxu1 (!%p113_p2), %v1446_v0  ;;  %s1419_s26 = smov (!%p113_p2), 32   ;;  %vm213_vm2 = vcmask (!%p113_p2), 523264   ;;  %vm272_vm3 = vcmask (!%p113_p2), 785408   ;;  %v1556_v51 = vld [vmem:[%s1808_s1] sm:$0xff] (!%p113_p2)   ;;  %v1566_v56 = vld [vmem:[%s1808_s1 + $0x8] sm:$0xff] (!%p113_p2)   ;;  %v1583_v60 = vld [vmem:[%s1808_s1 + $0x10] sm:$0xff] (!%p113_p2)  }
   0x8   : > { %1149 = vmatprep.subr.bf16.mxu0 (!%p113_p2), %v1416_v1  ;;  %1197 = vmatprep.subr.bf16.mxu1 (!%p113_p2), %v1416_v1  ;;  %v1596_v63 = vld [vmem:[%s1808_s1 + $0x18] sm:$0xff] (!%p113_p2)   ;;  %vm492_vm4 = vcmask (!%p113_p2), 60416  }
   0x9   : > { %1159 = vmatprep.mubr.msk.bf16.mxu0 (!%p113_p2), %vm1417_vm0, %v1416_v1  ;;  %1207 = vmatprep.mubr.msk.bf16.mxu1 (!%p113_p2), %vm1417_vm0, %v1416_v1 }
   0xb   : > { %1150 = vmatpush3.bf16.msra.mxu0 (!%p113_p2), %v1456_v2  ;;  %1198 = vmatpush3.bf16.msra.mxu1 (!%p113_p2), %v1456_v2 }
   0xc   : > { %1151 = vmatprep.subr.bf16.mxu0 (!%p113_p2), %v1416_v1  ;;  %1199 = vmatprep.subr.bf16.mxu1 (!%p113_p2), %v1416_v1 }
   0xd   : > { %s1811_s10 = smov (!%p134_p3, %s984_s10), 1 }
   0xe   : > { %s1371_s15 = smul.u32 24, %s1811_s10  ;;  %s1062_s27 = sshll.u32 %s1811_s10, 4 }
   0xf   : > { %1152 = vmatpush3.bf16.msra.mxu0 %v1471_v3  ;;  %1200 = vmatpush3.bf16.msra.mxu1 %v1471_v3  ;;  %s143_s30 = scalar_lea.vmem %s1809_s2, %s1062_s27 }
  0x10   : > { %s1465_s18 = scalar_lea.vmem %s1807_s0, %s1371_s15  ;;  %1153 = vmatprep.subr.bf16.mxu0 %v1416_v1  ;;  %1201 = vmatprep.subr.bf16.mxu1 %v1416_v1 }
  0x11   : > { %v1475_v4 = vld [vmem:[%s1465_s18 + $0x4] sm:$0x7]  ;;  %v1478_v5 = vld [vmem:[%s1465_s18 + $0x8] sm:$0x7]  ;;  %v1481_v6 = vld [vmem:[%s1465_s18] sm:$0x7] }
  0x12   : > { %v1022_v7 = vcombine.low %v1475_v4, %v1475_v4  ;;  %v1037_v8 = vcombine.low %v1478_v5, %v1478_v5  ;;  %v1021_v9 = vcombine.low %v1481_v6, %v1481_v6  ;;  %v1492_v10 = vld [vmem:[%s1465_s18 + $0xc] sm:$0x7]  ;;  %v1511_v22 = vld [vmem:[%s1465_s18 + $0x10] sm:$0x7]  ;;  %v1532_v32 = vld [vmem:[%s1465_s18 + $0x14] sm:$0x7] }
  0x13   : > { %v1047_v16 = vcombine.low %v1492_v10, %v1492_v10  ;;  %1154 = vmatpush3.bf16.msra.mxu0 %v1502_v14  ;;  %1202 = vmatpush3.bf16.msra.mxu1 %v1502_v14  ;;  %v1052_v30 = vcombine.low %v1511_v22, %v1511_v22  ;;  %v1057_v38 = vcombine.low %v1532_v32, %v1532_v32 }
  0x14   : > { %v220_v11 = vshrl.u32 %v1022_v7, 16  ;;  %v222_v12 = vshll.u32 %v1022_v7, 16  ;;  %v228_v13 = vrot.slane %v1022_v7, 1  ;;  %v399_v15 = vshll.u32 %v1037_v8, 16  ;;  %1155 = vmatprep.subr.bf16.mxu0 %v1416_v1  ;;  %1203 = vmatprep.subr.bf16.mxu1 %v1416_v1  ;;  %v1605_v7 = vld [vmem:[%s1808_s1 + $0x20] sm:$0xff]  }
  0x15   : > { %v397_v18 = vshrl.u32 %v1037_v8, 16  ;;  %v405_v19 = vrot.slane %v1037_v8, 1  ;;  %v200_v20 = vshll.u32 %v1021_v9, 16  ;;  %v198_v25 = vshrl.u32 %v1021_v9, 16 }
  0x16   : > { %v224_v17 = vrot.slane %v222_v12, 1  ;;  %229 = vrot.lane.b32.xlu1 %v228_v13, %s1418_s23  ;;  %v401_v21 = vrot.slane %v399_v15, 1  ;;  %v206_v26 = vrot.slane %v1021_v9, 1  ;;  %v580_v29 = vshll.u32 %v1047_v16, 16  ;;  %v1619_v13 = vld [vmem:[%s1808_s1 + $0x28] sm:$0xff]  }
  0x17   : > { %v202_v28 = vrot.slane %v200_v20, 1  ;;  %1156 = vmatpush3.bf16.msra.mxu0 %v1517_v24  ;;  %1204 = vmatpush3.bf16.msra.mxu1 %v1517_v24  ;;  %v578_v33 = vshrl.u32 %v1047_v16, 16  ;;  %v586_v34 = vrot.slane %v1047_v16, 1  ;;  %v725_v37 = vshll.u32 %v1052_v30, 16  ;;  %v1636_v20 = vld [vmem:[%s1808_s1 + $0x60] sm:$0xff]  }
  0x18   : > { %v225_v23 = vor.u32 %v224_v17, %v220_v11  ;;  %v402_v27 = vor.u32 %v401_v21, %v397_v18  ;;  %1157 = vmatprep.subr.bf16.mxu0 %v1416_v1  ;;  %1205 = vmatprep.subr.bf16.mxu1 %v1416_v1  ;;  %v582_v36 = vrot.slane %v580_v29, 1  ;;  %v723_v39 = vshrl.u32 %v1052_v30, 16  ;;  %v1658_v21 = vld [vmem:[%s1808_s1 + $0x70] sm:$0xff]  }
  0x19   : > { %v203_v35 = vor.u32 %v202_v28, %v198_v25  ;;  %v727_v41 = vrot.slane %v725_v37, 1  ;;  %v731_v42 = vrot.slane %v1052_v30, 1  ;;  %v870_v43 = vshll.u32 %v1057_v38, 16  ;;  %v1687_v25 = vld [vmem:[%s1808_s1 + $0x88] sm:$0xff]  }
  0x1a   : > { %226 = vrot.lane.b32.xlu0 %v225_v23, %s1419_s26  ;;  %406 = vrot.lane.b32.xlu1 %v405_v19, %s1418_s23  ;;  %v583_v40 = vor.u32 %v582_v36, %v578_v33  ;;  %v868_v45 = vshrl.u32 %v1057_v38, 16  ;;  %v876_v47 = vrot.slane %v1057_v38, 1  ;;  %v1678_v23 = vld [vmem:[%s1808_s1 + $0x80] sm:$0xff]  }
  0x1b   : > { %1158 = vmatpush3.bf16.msra.mxu0 %v1529_v31  ;;  %1206 = vmatpush3.bf16.msra.mxu1 %v1529_v31  ;;  %v728_v44 = vor.u32 %v727_v41, %v723_v39  ;;  %v872_v46 = vrot.slane %v870_v43, 1 }
  0x1c   : > { %1163 = vmatprep.subr.bf16.mxu0 %v1416_v1  ;;  %1211 = vmatprep.subr.bf16.mxu1 %v1416_v1 }
  0x1d   : > { %v873_v48 = vor.u32 %v872_v46, %v868_v45 }
  0x1e   : > { %403 = vrot.lane.b32.xlu0 %v402_v27, %s1419_s26  ;;  %207 = vrot.lane.b32.xlu1 %v206_v26, %s1418_s23 }
  0x22   : > { %204 = vrot.lane.b32.xlu0 %v203_v35, %s1419_s26  ;;  %587 = vrot.lane.b32.xlu1 %v586_v34, %s1418_s23 }
  0x26   : > { %584 = vrot.lane.b32.xlu0 %v583_v40, %s1419_s26  ;;  %732 = vrot.lane.b32.xlu1 %v731_v42, %s1418_s23 }
  0x2a   : > { %729 = vrot.lane.b32.xlu0 %v728_v44, %s1419_s26  ;;  %877 = vrot.lane.b32.xlu1 %v876_v47, %s1418_s23 }
  0x2e   : > { %874 = vrot.lane.b32.xlu0 %v873_v48, %s1419_s26 }
  0x88   : > { %v230_v49 = vpop.permute.xlu1 %229 }
  0x8c   : > { %v227_v50 = vpop.permute.xlu0 %226  ;;  %v407_v54 = vpop.permute.xlu1 %406 }
  0x8d   : > { %v233_v52 = vsel %vm209_vm1, %v1475_v4, %v227_v50 }
  0x8e   : > { %v235_v53 = vsel %vm213_vm2, %v233_v52, %v230_v49 }
  0x8f   : > { %1160 = vmatmul.mubr.msk.bf16.vlgmr.msra.gmra.mrb[0].mxu0 %vm272_vm3, %v235_v53 }
  0x90   : > { %1164 = vmatpush3.bf16.msra.mxu0 %v1556_v51  ;;  %v404_v55 = vpop.permute.xlu0 %403  ;;  %1175 = vmatprep.mubr.msk.bf16.mxu0 %vm1417_vm0, %v1416_v1  ;;  %v208_v59 = vpop.permute.xlu1 %207 }
  0x91   : > { %v410_v57 = vsel %vm209_vm1, %v1478_v5, %v404_v55  ;;  %1165 = vmatprep.subr.bf16.mxu0 %v1416_v1 }
  0x92   : > { %v1574_v58 = vsel %vm213_vm2, %v410_v57, %v407_v54 }
  0x93   : > { %1208 = vmatmul.mubr.msk.bf16.vlgmr.msra.gmra.mrb[0].mxu1 %vm272_vm3, %v1574_v58 }
  0x94   : > { %1166 = vmatpush3.bf16.msra.mxu0 %v1566_v56  ;;  %1212 = vmatpush3.bf16.msra.mxu1 %v1556_v51  ;;  %v205_v61 = vpop.permute.xlu0 %204  ;;  %v1589_v62 = vpop.permute.xlu1 %587 }
  0x95   : > { %1167 = vmatprep.subr.bf16.mxu0 %v1416_v1  ;;  %1213 = vmatprep.subr.bf16.mxu1 %v1416_v1  ;;  %v212_v16 = vsel %vm209_vm1, %v1481_v6, %v205_v61  ;;  %v1646_v6 = vld [vmem:[%s1808_s1 + $0x68] sm:$0xff]  }
  0x96   : > { %1223 = vmatprep.mubr.msk.bf16.mxu1 %vm1417_vm0, %v1416_v1  ;;  %v215_v19 = vsel %vm213_vm2, %v212_v16, %v208_v59 }
  0x98   : > { %1168 = vmatpush3.bf16.msra.mxu0 %v1583_v60  ;;  %1214 = vmatpush3.bf16.msra.mxu1 %v1566_v56  ;;  %v585_v4 = vpop.permute.xlu0 %584  ;;  %v733_v5 = vpop.permute.xlu1 %732 }
  0x99   : > { %1169 = vmatprep.subr.bf16.mxu0 %v1416_v1  ;;  %1215 = vmatprep.subr.bf16.mxu1 %v1416_v1  ;;  %v591_v26 = vsel %vm209_vm1, %v1492_v10, %v585_v4 }
  0x9a   : > { %v593_v27 = vsel %vm213_vm2, %v591_v26, %v1589_v62 }
  0x9c   : > { %1170 = vmatpush3.bf16.msra.mxu0 %v1596_v63  ;;  %1216 = vmatpush3.bf16.msra.mxu1 %v1583_v60  ;;  %v730_v8 = vpop.permute.xlu0 %729  ;;  %v878_v12 = vpop.permute.xlu1 %877 }
  0x9d   : > { %1171 = vmatprep.subr.bf16.mxu0 %v1416_v1  ;;  %1217 = vmatprep.subr.bf16.mxu1 %v1416_v1  ;;  %v736_v9 = vsel %vm209_vm1, %v1511_v22, %v730_v8  ;;  %v1669_v22 = vld [vmem:[%s1808_s1 + $0x78] sm:$0xff]  }
  0x9e   : > { %v1612_v11 = vsel %vm213_vm2, %v736_v9, %v733_v5 }
  0xa0   : > { %1172 = vmatpush3.bf16.msra.mxu0 %v1605_v7  ;;  %1218 = vmatpush3.bf16.msra.mxu1 %v1596_v63  ;;  %v875_v15 = vpop.permute.xlu0 %874 }
  0xa1   : > { %1173 = vmatprep.subr.bf16.mxu0 %v1416_v1  ;;  %1219 = vmatprep.subr.bf16.mxu1 %v1416_v1  ;;  %v881_v17 = vsel %vm209_vm1, %v1532_v32, %v875_v15 }
  0xa2   : > { %v1628_v18 = vsel %vm213_vm2, %v881_v17, %v878_v12 }
  0xa4   : > { %1174 = vmatpush3.bf16.msra.mxu0 %v1619_v13  ;;  %1220 = vmatpush3.bf16.msra.mxu1 %v1605_v7 }
  0xa5   : > { %1179 = vmatprep.subr.bf16.mxu0 %v1416_v1  ;;  %1221 = vmatprep.subr.bf16.mxu1 %v1416_v1 }
  0xa7   : > { %1176 = vmatmul.mubr.msk.bf16.vlgmr.msra.gmra.mrb[0].mxu0 %vm272_vm3, %v215_v19 }
  0xa8   : > { %1180 = vmatpush3.bf16.msra.mxu0 %v1636_v20  ;;  %1222 = vmatpush3.bf16.msra.mxu1 %v1619_v13 }
  0xa9   : > { %1181 = vmatprep.subr.bf16.mxu0 %v1416_v1  ;;  %1227 = vmatprep.subr.bf16.mxu1 %v1416_v1 }
  0xaa   : > { %1191 = vmatprep.mubr.msk.bf16.mxu0 %vm1417_vm0, %v1416_v1 }
  0xab   : > { %1224 = vmatmul.mubr.msk.bf16.vlgmr.msra.gmra.mrb[0].mxu1 %vm272_vm3, %v235_v53 }
  0xac   : > { %1182 = vmatpush3.bf16.msra.mxu0 %v1646_v6  ;;  %1228 = vmatpush3.bf16.msra.mxu1 %v1636_v20 }
  0xad   : > { %1183 = vmatprep.subr.bf16.mxu0 %v1416_v1  ;;  %1229 = vmatprep.subr.bf16.mxu1 %v1416_v1 }
  0xae   : > { %1239 = vmatprep.mubr.msk.bf16.mxu1 %vm1417_vm0, %v1416_v1 }
  0xb0   : > { %1184 = vmatpush3.bf16.msra.mxu0 %v1658_v21  ;;  %1230 = vmatpush3.bf16.msra.mxu1 %v1646_v6 }
  0xb1   : > { %1185 = vmatprep.subr.bf16.mxu0 %v1416_v1  ;;  %1231 = vmatprep.subr.bf16.mxu1 %v1416_v1 }
  0xb4   : > { %1186 = vmatpush3.bf16.msra.mxu0 %v1669_v22  ;;  %1232 = vmatpush3.bf16.msra.mxu1 %v1658_v21 }
  0xb5   : > { %1187 = vmatprep.subr.bf16.mxu0 %v1416_v1  ;;  %1233 = vmatprep.subr.bf16.mxu1 %v1416_v1 }
  0xb8   : > { %1188 = vmatpush3.bf16.msra.mxu0 %v1678_v23  ;;  %1234 = vmatpush3.bf16.msra.mxu1 %v1669_v22 }
  0xb9   : > { %1189 = vmatprep.subr.bf16.mxu0 %v1416_v1  ;;  %1235 = vmatprep.subr.bf16.mxu1 %v1416_v1 }
  0xbc   : > { %1190 = vmatpush3.bf16.msra.mxu0 %v1687_v25  ;;  %1236 = vmatpush3.bf16.msra.mxu1 %v1678_v23 }
  0xbd   : > { %1237 = vmatprep.subr.bf16.mxu1 %v1416_v1  ;;  %1243 = vmatprep.subr.bf16.mxu0 %v1416_v1 }
  0xbf   : > { %1192 = vmatmul.mubr.msk.bf16.vlgmr.msra.gmra.mrb[0].mxu0 %vm272_vm3, %v1574_v58 }
  0xc0   : > { %1238 = vmatpush3.bf16.msra.mxu1 %v1687_v25  ;;  %1244 = vmatpush3.bf16.msra.mxu0 %v1446_v0 }
  0xc1   : > { %1245 = vmatprep.subr.bf16.mxu0 %v1416_v1  ;;  %1291 = vmatprep.subr.bf16.mxu1 %v1416_v1 }
  0xc2   : > { %1255 = vmatprep.mubr.msk.bf16.mxu0 %vm1417_vm0, %v1416_v1 }
  0xc3   : > { %1240 = vmatmul.mubr.msk.bf16.vlgmr.msra.gmra.mrb[0].mxu1 %vm272_vm3, %v593_v27 }
  0xc4   : > { %1246 = vmatpush3.bf16.msra.mxu0 %v1456_v2  ;;  %1292 = vmatpush3.bf16.msra.mxu1 %v1446_v0 }
  0xc5   : > { %1247 = vmatprep.subr.bf16.mxu0 %v1416_v1  ;;  %1293 = vmatprep.subr.bf16.mxu1 %v1416_v1 }
  0xc6   : > { %1303 = vmatprep.mubr.msk.bf16.mxu1 %vm1417_vm0, %v1416_v1 }
  0xc8   : > { %1248 = vmatpush3.bf16.msra.mxu0 %v1471_v3  ;;  %1294 = vmatpush3.bf16.msra.mxu1 %v1456_v2 }
  0xc9   : > { %1249 = vmatprep.subr.bf16.mxu0 %v1416_v1  ;;  %1295 = vmatprep.subr.bf16.mxu1 %v1416_v1 }
  0xcc   : > { %1250 = vmatpush3.bf16.msra.mxu0 %v1502_v14  ;;  %1296 = vmatpush3.bf16.msra.mxu1 %v1471_v3 }
  0xcd   : > { %1251 = vmatprep.subr.bf16.mxu0 %v1416_v1  ;;  %1297 = vmatprep.subr.bf16.mxu1 %v1416_v1 }
  0xd0   : > { %1252 = vmatpush3.bf16.msra.mxu0 %v1517_v24  ;;  %1298 = vmatpush3.bf16.msra.mxu1 %v1502_v14 }
  0xd1   : > { %1253 = vmatprep.subr.bf16.mxu0 %v1416_v1  ;;  %1299 = vmatprep.subr.bf16.mxu1 %v1416_v1 }
  0xd4   : > { %1254 = vmatpush3.bf16.msra.mxu0 %v1529_v31  ;;  %1300 = vmatpush3.bf16.msra.mxu1 %v1517_v24 }
  0xd5   : > { %1259 = vmatprep.subr.bf16.mxu0 %v1416_v1  ;;  %1301 = vmatprep.subr.bf16.mxu1 %v1416_v1 }
  0xd7   : > { %1256 = vmatmul.mubr.msk.bf16.vlgmr.msra.gmra.mrb[4].mxu0 %vm272_vm3, %v593_v27 }
  0xd8   : > { %1260 = vmatpush3.bf16.msra.mxu0 %v1556_v51  ;;  %1302 = vmatpush3.bf16.msra.mxu1 %v1529_v31 }
  0xd9   : > { %1261 = vmatprep.subr.bf16.mxu0 %v1416_v1  ;;  %1307 = vmatprep.subr.bf16.mxu1 %v1416_v1 }
  0xda   : > { %1271 = vmatprep.mubr.msk.bf16.mxu0 %vm1417_vm0, %v1416_v1 }
  0xdb   : > { %1304 = vmatmul.mubr.msk.bf16.vlgmr.msra.gmra.mrb[4].mxu1 %vm272_vm3, %v1612_v11 }
  0xdc   : > { %1262 = vmatpush3.bf16.msra.mxu0 %v1566_v56  ;;  %1308 = vmatpush3.bf16.msra.mxu1 %v1556_v51 }
  0xdd   : > { %1263 = vmatprep.subr.bf16.mxu0 %v1416_v1  ;;  %1309 = vmatprep.subr.bf16.mxu1 %v1416_v1 }
  0xde   : > { %1319 = vmatprep.mubr.msk.bf16.mxu1 %vm1417_vm0, %v1416_v1 }
  0xe0   : > { %1264 = vmatpush3.bf16.msra.mxu0 %v1583_v60  ;;  %1310 = vmatpush3.bf16.msra.mxu1 %v1566_v56 }
  0xe1   : > { %1265 = vmatprep.subr.bf16.mxu0 %v1416_v1  ;;  %1311 = vmatprep.subr.bf16.mxu1 %v1416_v1 }
  0xe4   : > { %1266 = vmatpush3.bf16.msra.mxu0 %v1596_v63  ;;  %1312 = vmatpush3.bf16.msra.mxu1 %v1583_v60 }
  0xe5   : > { %1267 = vmatprep.subr.bf16.mxu0 %v1416_v1  ;;  %1313 = vmatprep.subr.bf16.mxu1 %v1416_v1 }
  0xe8   : > { %1268 = vmatpush3.bf16.msra.mxu0 %v1605_v7  ;;  %1314 = vmatpush3.bf16.msra.mxu1 %v1596_v63 }
  0xe9   : > { %1269 = vmatprep.subr.bf16.mxu0 %v1416_v1  ;;  %1315 = vmatprep.subr.bf16.mxu1 %v1416_v1 }
  0xec   : > { %1270 = vmatpush3.bf16.msra.mxu0 %v1619_v13  ;;  %1316 = vmatpush3.bf16.msra.mxu1 %v1605_v7 }
  0xed   : > { %1275 = vmatprep.subr.bf16.mxu0 %v1416_v1  ;;  %1317 = vmatprep.subr.bf16.mxu1 %v1416_v1 }
  0xef   : > { %1272 = vmatmul.mubr.msk.bf16.vlgmr.msra.gmra.mrb[4].mxu0 %vm272_vm3, %v1574_v58 }
  0xf0   : > { %1276 = vmatpush3.bf16.msra.mxu0 %v1636_v20  ;;  %1318 = vmatpush3.bf16.msra.mxu1 %v1619_v13 }
  0xf1   : > { %1277 = vmatprep.subr.bf16.mxu0 %v1416_v1  ;;  %1323 = vmatprep.subr.bf16.mxu1 %v1416_v1 }
  0xf2   : > { %1287 = vmatprep.mubr.msk.bf16.mxu0 %vm1417_vm0, %v1416_v1 }
  0xf3   : > { %1320 = vmatmul.mubr.msk.bf16.vlgmr.msra.gmra.mrb[4].mxu1 %vm272_vm3, %v593_v27 }
  0xf4   : > { %1278 = vmatpush3.bf16.msra.mxu0 %v1646_v6  ;;  %1324 = vmatpush3.bf16.msra.mxu1 %v1636_v20 }
  0xf5   : > { %1279 = vmatprep.subr.bf16.mxu0 %v1416_v1  ;;  %1325 = vmatprep.subr.bf16.mxu1 %v1416_v1 }
  0xf6   : > { %1335 = vmatprep.mubr.msk.bf16.mxu1 %vm1417_vm0, %v1416_v1 }
  0xf8   : > { %1280 = vmatpush3.bf16.msra.mxu0 %v1658_v21  ;;  %1326 = vmatpush3.bf16.msra.mxu1 %v1646_v6 }
  0xf9   : > { %1281 = vmatprep.subr.bf16.mxu0 %v1416_v1  ;;  %1327 = vmatprep.subr.bf16.mxu1 %v1416_v1 }
  0xfc   : > { %1282 = vmatpush3.bf16.msra.mxu0 %v1669_v22  ;;  %1328 = vmatpush3.bf16.msra.mxu1 %v1658_v21 }
  0xfd   : > { %1283 = vmatprep.subr.bf16.mxu0 %v1416_v1  ;;  %1329 = vmatprep.subr.bf16.mxu1 %v1416_v1 }
 0x100   : > { %1284 = vmatpush3.bf16.msra.mxu0 %v1678_v23  ;;  %1330 = vmatpush3.bf16.msra.mxu1 %v1669_v22 }
 0x101   : > { %1285 = vmatprep.subr.bf16.mxu0 %v1416_v1  ;;  %1331 = vmatprep.subr.bf16.mxu1 %v1416_v1 }
 0x104   : > { %1286 = vmatpush3.bf16.msra.mxu0 %v1687_v25  ;;  %1332 = vmatpush3.bf16.msra.mxu1 %v1678_v23 }
 0x105   : > { %1333 = vmatprep.subr.bf16.mxu1 %v1416_v1 }
 0x107   : > { %1288 = vmatmul.mubr.msk.bf16.vlgmr.msra.gmra.mrb[4].mxu0 %vm272_vm3, %v1612_v11 }
 0x108   : > { %1334 = vmatpush3.bf16.msra.mxu1 %v1687_v25 }
 0x10b   : > { %1336 = vmatmul.mubr.msk.bf16.vlgmr.msra.gmra.mrb[4].mxu1 %vm272_vm3, %v1628_v18 }
 0x192   : > { %v485_v0 = vpop.f32.mrb[0].mxu0 }
 0x193   : > { %493 = vst.msk [vmem:[%s143_s30] sm:$0xf] %vm492_vm4, %v485_v0  ;;  %v1193_v2 = vpop.f32.mrb[1].mxu0 }
 0x194   : > { %v488_v3 = vpop.f32.mrb[2].mxu0 }
 0x195   : > { %v1194_v1 = vpop.f32.mrb[3].mxu0 }
 0x196   : > { %v630_v10 = vpop.f32.mrb[0].mxu1 }
 0x197   : > { %1049 = vst.msk [vmem:[%s143_s30 + $0x4] sm:$0xf] %vm492_vm4, %v630_v10  ;;  %v1241_v14 = vpop.f32.mrb[1].mxu1 }
 0x198   : > { %v633_v24 = vpop.f32.mrb[2].mxu1 }
 0x199   : > { %v1242_v28 = vpop.f32.mrb[3].mxu1 }
 0x1da   : > { %v775_v29 = vpop.f32.mrb[4].mxu0 }
 0x1db   : > { %1054 = vst.msk [vmem:[%s143_s30 + $0x8] sm:$0xf] %vm492_vm4, %v775_v29  ;;  %v1289_v30 = vpop.f32.mrb[5].mxu0 }
 0x1dc   : > { %v778_v31 = vpop.f32.mrb[6].mxu0 }
 0x1dd   : > { %v1290_v32 = vpop.f32.mrb[7].mxu0 }
 0x1de   : > { %v920_v33 = vpop.f32.mrb[4].mxu1 }
 0x1df   : > { %1059 = vst.msk [vmem:[%s143_s30 + $0xc] sm:$0xf] %vm492_vm4, %v920_v33  ;;  %v1337_v34 = vpop.f32.mrb[5].mxu1 }
 0x1e0   : > { %v923_v35 = vpop.f32.mrb[6].mxu1 }
 0x1e1   : > { %v1338_v36 = vpop.f32.mrb[7].mxu1 }
 0x1e2 PF: > { %s12_s9 = sadd.s32 1, %s1414_s9  }
 0x1e3   : > { %p9_p4 = scmp.ge.s32.totalorder %s12_s9, 4  }
 0x1e5   :  { %11 = sbr.rel (!%p9_p4) target bundleno = 1 (0x1), region = 68 }

// kernel: densenet_forward.29
= control target key start
LH: loop header
LB: loop body
LE: loop exit
PB: predicated region body
PF: predicated region fallthrough
CT: control target
= control target key end

     0   :  { %s419_s15 = smov 0   ;;  %s448_s0 = inlined_call_operand.vmem [shape: f32[32,32], index: 0, kind: input, shape index: {}]   ;;  %s449_s1 = inlined_call_operand.vmem [shape: f32[1,32], index: 1, kind: input, shape index: {}]   ;;  %s450_s2 = inlined_call_operand.vmem [shape: f32[1,32], index: 2, kind: input, shape index: {}]   ;;  %s451_s3 = inlined_call_operand.vmem [shape: bf16[32,16], index: 3, kind: input, shape index: {}]   ;;  %s452_s4 = inlined_call_operand.vmem [shape: f32[32,16], index: 4, kind: output, shape index: {}]  }
   0x1 LB: > { %s345_s16 = sadd.s32 4294967295, %s390_s15   ;;  %p349_p0 = scmp.ge.s32.totalorder %s390_s15, 1  ;;  %s390_s15 = sphi %s419_s15, %s14_s15  }
   0x2   : > { %p163_p1 = scmp.lt.s32.totalorder %s390_s15, 3 }
   0x4   : > { %p164_p2 = pnand %p349_p0, %p163_p1 }
   0x5   : > { %v382_v0 = vld [vmem:[%s451_s3] sm:$0xff] (!%p164_p2)   ;;  %v392_v1 = vmov (!%p164_p2), 0.0   ;;  %v383_v2 = vld [vmem:[%s451_s3 + $0x8] sm:$0xff] (!%p164_p2)   ;;  %vm393_vm0 = vmmov (!%p164_p2), 0   ;;  %s350_s21 = sshll.u32 (!%p164_p2), %s345_s16, 1  ;;  %vm241_vm1 = vcmask (!%p164_p2), 261120  }
   0x6   : > { %167 = sbr.rel (%p164_p2) target bundleno = 240 (0xf0), region = 36  ;;  %364 = vmatprep.subr.bf16.mxu0 (!%p164_p2), %v392_v1  ;;  %368 = vmatprep.mubr.msk.bf16.mxu0 (!%p164_p2), %vm393_vm0, %v392_v1  ;;  %p190_p3 = scmp.lt.s32.totalorder (!%p164_p2), %s350_s21, 3  ;;  %v354_v3 = vld [vmem:[%s449_s1] ss:$0 sm:$0xff] (!%p164_p2)  ;;  %vm286_vm2 = vcmask (!%p164_p2), 130048  }
   0x7   : > { %365 = vmatpush3.bf16.msra.mxu0 (!%p164_p2), %v382_v0  ;;  %v355_v6 = vld [vmem:[%s450_s2] ss:$0 sm:$0xff] (!%p164_p2) }
   0x8   : > { %366 = vmatprep.subr.bf16.mxu0 (!%p164_p2), %v392_v1 }
   0xb   : > { %367 = vmatpush3.bf16.msra.mxu0 (!%p164_p2), %v383_v2 }
   0xd   : > { %s454_s21 = smov (!%p190_p3, %s350_s21), 3 }
   0xe   : > { %s351_s22 = sshll.u32 %s454_s21, 3 }
   0xf   : > { %s193_s27 = scalar_lea.vmem %s448_s0, %s351_s22  ;;  %s199_s6 = scalar_lea.vmem %s452_s4, %s351_s22 }
  0x10   : > { %v202_v4 = vld [vmem:[%s193_s27] sm:$0xff]  ;;  %v203_v5 = vld [vmem:[%s193_s27 + $0x8] sm:$0xff] }
  0x11   : > { %v211_v7 = vmul.f32 %v354_v3, %v202_v4  ;;  %v212_v8 = vmul.f32 %v354_v3, %v203_v5 }
  0x13   : > { %v220_v9 = vadd.f32 %v355_v6, %v211_v7  ;;  %v221_v10 = vadd.f32 %v355_v6, %v212_v8 }
  0x15   : > { %v222_v11 = vmax.f32 %v220_v9, 0.0  ;;  %v223_v12 = vmax.f32 %v221_v10, 0.0 }
  0x17   : > { %v224_v13 = vpack.c.bf16 %v223_v12, %v222_v11 }
  0x19   : > { %369 = vmatmul.mubr.msk.bf16.vlgmr.msra.gmra.mrb[0].mxu0 %vm241_vm1, %v224_v13 }
  0xec   : > { %v279_v14 = vpop.f32.mrb[0].mxu0 }
  0xed   : > { %287 = vst.msk [vmem:[%s199_s6] sm:$0xff] %vm286_vm2, %v279_v14  ;;  %v370_v15 = vpop.f32.mrb[1].mxu0 }
  0xee   : > { %v282_v16 = vpop.f32.mrb[2].mxu0 }
  0xef   : > { %288 = vst.msk [vmem:[%s199_s6 + $0x8] sm:$0xff] %vm286_vm2, %v282_v16  ;;  %v371_v17 = vpop.f32.mrb[3].mxu0 }
  0xf0 PF: > { %s14_s15 = sadd.s32 1, %s390_s15  }
  0xf1   : > { %p11_p4 = scmp.ge.s32.totalorder %s14_s15, 4  }
  0xf3   :  { %13 = sbr.rel (!%p11_p4) target bundleno = 1 (0x1), region = 66 }

// kernel: densenet_forward.30
= control target key start
LH: loop header
LB: loop body
LE: loop exit
PB: predicated region body
PF: predicated region fallthrough
CT: control target
= control target key end

     0   :  { %v149_v0 = vmov 0.0   ;;  %vm150_vm0 = vmmov 0   ;;  %vm59_vm1 = vcmask 261120   ;;  %vm121_vm2 = vcmask 257024   ;;  %s210_s3 = inlined_call_operand.vmem [shape: bf16[32,32], index: 3, kind: input, shape index: {}]   ;;  %s211_s0 = inlined_call_operand.vmem [shape: f32[8,32], index: 0, kind: input, shape index: {}]   ;;  %s212_s1 = inlined_call_operand.vmem [shape: f32[1,32], index: 1, kind: input, shape index: {}]   ;;  %s213_s2 = inlined_call_operand.vmem [shape: f32[1,32], index: 2, kind: input, shape index: {}]   ;;  %s214_s4 = inlined_call_operand.vmem [shape: f32[1,32], index: 4, kind: input, shape index: {}]   ;;  %s215_s5 = inlined_call_operand.vmem [shape: f32[1,32], index: 5, kind: input, shape index: {}]   ;;  %s216_s6 = inlined_call_operand.vmem [shape: bf16[8,32], index: 6, kind: output, shape index: {}]  }
   0x1   :  { %137 = vmatprep.subr.bf16.mxu0 %v149_v0  ;;  %v147_v1 = vld [vmem:[%s210_s3] sm:$0xff]   ;;  %141 = vmatprep.mubr.msk.bf16.mxu0 %vm150_vm0, %v149_v0  ;;  %v148_v2 = vld [vmem:[%s210_s3 + $0x8] sm:$0xff]  }
   0x2   :  { %138 = vmatpush3.bf16.msra.mxu0 %v147_v1  ;;  %v24_v3 = vld [vmem:[%s211_s0] sm:$0xff] }
   0x3   :  { %v127_v4 = vld [vmem:[%s212_s1] ss:$0 sm:$0xff]  ;;  %139 = vmatprep.subr.bf16.mxu0 %v149_v0 }
   0x4   :  { %v128_v5 = vld [vmem:[%s213_s2] ss:$0 sm:$0xff]  ;;  %v32_v6 = vmul.f32 %v127_v4, %v24_v3 }
   0x5   :  { %v132_v10 = vld [vmem:[%s214_s4] ss:$0 sm:$0xff] }
   0x6   :  { %v40_v7 = vadd.f32 %v128_v5, %v32_v6  ;;  %140 = vmatpush3.bf16.msra.mxu0 %v148_v2  ;;  %v133_v12 = vld [vmem:[%s215_s5] ss:$0 sm:$0xff] }
   0x8   :  { %v41_v8 = vmax.f32 %v40_v7, 0.0 }
   0xa   :  { %v42_v9 = vpack.c.bf16 %v41_v8, %v41_v8 }
   0xc   :  { %142 = vmatmul.mubr.msk.bf16.vlgmr.msra.gmra.mrb[0].mxu0 %vm59_vm1, %v42_v9 }
  0xdf   :  { %v97_v11 = vpop.f32.mrb[0].mxu0 }
  0xe0   :  { %v110_v13 = vmul.f32 %v132_v10, %v97_v11  ;;  %v143_v14 = vpop.f32.mrb[1].mxu0 }
  0xe1   :  { %v100_v15 = vpop.f32.mrb[2].mxu0 }
  0xe2   :  { %v118_v16 = vadd.f32 %v133_v12, %v110_v13  ;;  %v144_v17 = vpop.f32.mrb[3].mxu0 }
  0xe4   :  { %v119_v18 = vmax.f32 %v118_v16, 0.0 }
  0xe6   :  { %v120_v19 = vpack.c.bf16 %v119_v18, %v119_v18 }
  0xe8   :  { %122 = vst.msk [vmem:[%s216_s6] sm:$0xf] %vm121_vm2, %v120_v19 }

// kernel: densenet_forward.31
= control target key start
LH: loop header
LB: loop body
LE: loop exit
PB: predicated region body
PF: predicated region fallthrough
CT: control target
= control target key end

     0   :  { %s988_s9 = smov 0   ;;  %s1149_s0 = inlined_call_operand.vmem [shape: bf16[2,4,4,32], index: 0, kind: input, shape index: {}]   ;;  %s1150_s1 = inlined_call_operand.vmem [shape: bf16[3,96,8], index: 1, kind: input, shape index: {}]   ;;  %s1151_s2 = inlined_call_operand.vmem [shape: f32[2,2,2,8], index: 2, kind: output, shape index: {}]  }
   0x1 LB: > { %s710_s10 = sadd.s32 4294967295, %s966_s9   ;;  %p714_p0 = scmp.ge.s32.totalorder %s966_s9, 1  ;;  %s966_s9 = sphi %s988_s9, %s12_s9  }
   0x2   : > { %p112_p1 = scmp.lt.s32.totalorder %s966_s9, 3 }
   0x4   : > { %p113_p2 = pnand %p714_p0, %p112_p1 }
   0x5   : > { %p134_p3 = scmp.lt.s32.totalorder (!%p113_p2), %s710_s10, 1  ;;  %v194_v0 = vlaneseq (!%p113_p2)  ;;  %v942_v1 = vld [vmem:[%s1150_s1 + $0x30] sm:$0xff] (!%p113_p2)   ;;  %v968_v2 = vmov (!%p113_p2), 1983009808   ;;  %v969_v4 = vmov (!%p113_p2), 0.0   ;;  %v943_v5 = vld [vmem:[%s1150_s1 + $0x38] sm:$0xff] (!%p113_p2)  }
   0x6   : > { %116 = sbr.rel (%p113_p2) target bundleno = 409 (0x199), region = 28  ;;  %v192_v3 = vunpack.c.l.s4 (!%p113_p2), %v968_v2  ;;  %817 = vmatprep.subr.bf16.mxu0 (!%p113_p2), %v969_v4  ;;  %865 = vmatprep.subr.bf16.mxu1 (!%p113_p2), %v969_v4  ;;  %v944_v9 = vld [vmem:[%s1150_s1 + $0x40] sm:$0xff] (!%p113_p2)   ;;  %vm970_vm0 = vmmov (!%p113_p2), 0   ;;  %v945_v22 = vld [vmem:[%s1150_s1 + $0x48] sm:$0xff] (!%p113_p2)   ;;  %s971_s23 = smov (!%p113_p2), 64   ;;  %v946_v29 = vld [vmem:[%s1150_s1 + $0x50] sm:$0xff] (!%p113_p2)  }
   0x7   : > { %v195_v6 = vshrl.u32 (!%p113_p2), %v194_v0, 7  ;;  %818 = vmatpush3.bf16.msra.mxu0 (!%p113_p2), %v942_v1  ;;  %866 = vmatpush3.bf16.msra.mxu1 (!%p113_p2), %v942_v1  ;;  %s972_s26 = smov (!%p113_p2), 32   ;;  %v947_v36 = vld [vmem:[%s1150_s1 + $0x58] sm:$0xff] (!%p113_p2)   ;;  %vm210_vm1 = vcmask (!%p113_p2), 261120   ;;  %vm214_vm2 = vcmask (!%p113_p2), 523264   ;;  %vm278_vm3 = vcmask (!%p113_p2), 785408  }
   0x8   : > { %v193_v7 = vunpack.c.0.s8 (!%p113_p2), %v192_v3  ;;  %819 = vmatprep.subr.bf16.mxu0 (!%p113_p2), %v969_v4  ;;  %867 = vmatprep.subr.bf16.mxu1 (!%p113_p2), %v969_v4  ;;  %v948_v43 = vld [vmem:[%s1150_s1] sm:$0xff] (!%p113_p2)   ;;  %v949_v48 = vld [vmem:[%s1150_s1 + $0x8] sm:$0xff] (!%p113_p2)   ;;  %v950_v51 = vld [vmem:[%s1150_s1 + $0x10] sm:$0xff] (!%p113_p2)   ;;  %vm503_vm4 = vcmask (!%p113_p2), 58368  }
   0x9   : > { %829 = vmatprep.mubr.msk.bf16.mxu0 (!%p113_p2), %vm970_vm0, %v969_v4  ;;  %877 = vmatprep.mubr.msk.bf16.mxu1 (!%p113_p2), %vm970_vm0, %v969_v4  ;;  %v951_v52 = vld [vmem:[%s1150_s1 + $0x18] sm:$0xff] (!%p113_p2)   ;;  %v952_v53 = vld [vmem:[%s1150_s1 + $0x20] sm:$0xff] (!%p113_p2)   ;;  %v953_v55 = vld [vmem:[%s1150_s1 + $0x28] sm:$0xff] (!%p113_p2)  }
   0xa   : > { %v196_v8 = vsub.s32 (!%p113_p2), %v193_v7, %v195_v6  ;;  %v954_v59 = vld [vmem:[%s1150_s1 + $0x60] sm:$0xff] (!%p113_p2)   ;;  %v955_v60 = vld [vmem:[%s1150_s1 + $0x68] sm:$0xff] (!%p113_p2)   ;;  %v956_v61 = vld [vmem:[%s1150_s1 + $0x70] sm:$0xff] (!%p113_p2)  }
   0xb   : > { %820 = vmatpush3.bf16.msra.mxu0 (!%p113_p2), %v943_v5  ;;  %868 = vmatpush3.bf16.msra.mxu1 (!%p113_p2), %v943_v5  ;;  %v957_v62 = vld [vmem:[%s1150_s1 + $0x78] sm:$0xff] (!%p113_p2)   ;;  %v958_v63 = vld [vmem:[%s1150_s1 + $0x80] sm:$0xff] (!%p113_p2)   ;;  %v959_v0 = vld [vmem:[%s1150_s1 + $0x88] sm:$0xff] (!%p113_p2)  }
   0xc   : > { %821 = vmatprep.subr.bf16.mxu0 (!%p113_p2), %v969_v4  ;;  %869 = vmatprep.subr.bf16.mxu1 (!%p113_p2), %v969_v4 }
   0xd   : > { %s1153_s10 = smov (!%p134_p3, %s710_s10), 1 }
   0xe   : > { %s773_s15 = sshll.u32 %s1153_s10, 3  ;;  %s774_s27 = sshll.u32 %s1153_s10, 2 }
   0xf   : > { %s138_s18 = scalar_lea.vmem %s1149_s0, %s773_s15  ;;  %822 = vmatpush3.bf16.msra.mxu0 %v944_v9  ;;  %870 = vmatpush3.bf16.msra.mxu1 %v944_v9  ;;  %s143_s30 = scalar_lea.vmem %s1151_s2, %s774_s27 }
  0x10   : > { %v1015_v10 = vld [vmem:[%s138_s18 + $0x2] sm:$0x3]  ;;  %v1017_v11 = vld [vmem:[%s138_s18 + $0x4] sm:$0x3]  ;;  %v1019_v12 = vld [vmem:[%s138_s18] sm:$0x3]  ;;  %823 = vmatprep.subr.bf16.mxu0 %v969_v4  ;;  %871 = vmatprep.subr.bf16.mxu1 %v969_v4 }
  0x11   : > { %v224_v13 = vrot.slane %v1015_v10, %v196_v8  ;;  %v406_v14 = vrot.slane %v1017_v11, %v196_v8  ;;  %v197_v15 = vrot.slane %v1019_v12, %v196_v8  ;;  %v1024_v16 = vld [vmem:[%s138_s18 + $0x6] sm:$0x3] }
  0x12   : > { %v592_v21 = vrot.slane %v1024_v16, %v196_v8 }
  0x13   : > { %v226_v17 = vshrl.u32 %v224_v13, 16  ;;  %v228_v18 = vshll.u32 %v224_v13, 16  ;;  %v234_v19 = vrot.slane %v224_v13, 1  ;;  %v410_v20 = vshll.u32 %v406_v14, 16  ;;  %824 = vmatpush3.bf16.msra.mxu0 %v945_v22  ;;  %872 = vmatpush3.bf16.msra.mxu1 %v945_v22 }
  0x14   : > { %v408_v24 = vshrl.u32 %v406_v14, 16  ;;  %v416_v25 = vrot.slane %v406_v14, 1  ;;  %v201_v26 = vshll.u32 %v197_v15, 16  ;;  %v199_v30 = vshrl.u32 %v197_v15, 16  ;;  %825 = vmatprep.subr.bf16.mxu0 %v969_v4  ;;  %873 = vmatprep.subr.bf16.mxu1 %v969_v4 }
  0x15   : > { %v230_v23 = vrot.slane %v228_v18, 1  ;;  %235 = vrot.lane.b32.xlu1 %v234_v19, %s971_s23  ;;  %v412_v27 = vrot.slane %v410_v20, 1  ;;  %v207_v31 = vrot.slane %v197_v15, 1  ;;  %v596_v34 = vshll.u32 %v592_v21, 16 }
  0x16   : > { %v203_v33 = vrot.slane %v201_v26, 1  ;;  %v594_v35 = vshrl.u32 %v592_v21, 16  ;;  %v602_v39 = vrot.slane %v592_v21, 1 }
  0x17   : > { %v231_v28 = vor.u32 %v230_v23, %v226_v17  ;;  %v413_v32 = vor.u32 %v412_v27, %v408_v24  ;;  %826 = vmatpush3.bf16.msra.mxu0 %v946_v29  ;;  %874 = vmatpush3.bf16.msra.mxu1 %v946_v29  ;;  %v598_v38 = vrot.slane %v596_v34, 1 }
  0x18   : > { %v204_v37 = vor.u32 %v203_v33, %v199_v30  ;;  %827 = vmatprep.subr.bf16.mxu0 %v969_v4  ;;  %875 = vmatprep.subr.bf16.mxu1 %v969_v4 }
  0x19   : > { %232 = vrot.lane.b32.xlu0 %v231_v28, %s972_s26  ;;  %417 = vrot.lane.b32.xlu1 %v416_v25, %s971_s23  ;;  %v599_v40 = vor.u32 %v598_v38, %v594_v35 }
  0x1b   : > { %828 = vmatpush3.bf16.msra.mxu0 %v947_v36  ;;  %876 = vmatpush3.bf16.msra.mxu1 %v947_v36 }
  0x1c   : > { %833 = vmatprep.subr.bf16.mxu0 %v969_v4  ;;  %881 = vmatprep.subr.bf16.mxu1 %v969_v4 }
  0x1d   : > { %414 = vrot.lane.b32.xlu0 %v413_v32, %s972_s26  ;;  %208 = vrot.lane.b32.xlu1 %v207_v31, %s971_s23 }
  0x21   : > { %205 = vrot.lane.b32.xlu0 %v204_v37, %s972_s26  ;;  %603 = vrot.lane.b32.xlu1 %v602_v39, %s971_s23 }
  0x25   : > { %600 = vrot.lane.b32.xlu0 %v599_v40, %s972_s26 }
  0x87   : > { %v236_v41 = vpop.permute.xlu1 %235 }
  0x8b   : > { %v233_v42 = vpop.permute.xlu0 %232  ;;  %v418_v46 = vpop.permute.xlu1 %417 }
  0x8c   : > { %v239_v44 = vsel %vm210_vm1, %v1015_v10, %v233_v42 }
  0x8d   : > { %v241_v45 = vsel %vm214_vm2, %v239_v44, %v236_v41 }
  0x8e   : > { %830 = vmatmul.mubr.msk.bf16.vlgmr.msra.gmra.mrb[0].mxu0 %vm278_vm3, %v241_v45 }
  0x8f   : > { %834 = vmatpush3.bf16.msra.mxu0 %v948_v43  ;;  %v415_v47 = vpop.permute.xlu0 %414  ;;  %845 = vmatprep.mubr.msk.bf16.mxu0 %vm970_vm0, %v969_v4  ;;  %v209_v57 = vpop.permute.xlu1 %208 }
  0x90   : > { %v421_v49 = vsel %vm210_vm1, %v1017_v11, %v415_v47  ;;  %835 = vmatprep.subr.bf16.mxu0 %v969_v4 }
  0x91   : > { %v1070_v50 = vsel %vm214_vm2, %v421_v49, %v418_v46 }
  0x92   : > { %878 = vmatmul.mubr.msk.bf16.vlgmr.msra.gmra.mrb[0].mxu1 %vm278_vm3, %v1070_v50 }
  0x93   : > { %836 = vmatpush3.bf16.msra.mxu0 %v949_v48  ;;  %882 = vmatpush3.bf16.msra.mxu1 %v948_v43  ;;  %v206_v54 = vpop.permute.xlu0 %205  ;;  %v604_v3 = vpop.permute.xlu1 %603 }
  0x94   : > { %837 = vmatprep.subr.bf16.mxu0 %v969_v4  ;;  %883 = vmatprep.subr.bf16.mxu1 %v969_v4  ;;  %v213_v56 = vsel %vm210_vm1, %v1019_v12, %v206_v54 }
  0x95   : > { %893 = vmatprep.mubr.msk.bf16.mxu1 %vm970_vm0, %v969_v4  ;;  %v216_v58 = vsel %vm214_vm2, %v213_v56, %v209_v57 }
  0x97   : > { %838 = vmatpush3.bf16.msra.mxu0 %v950_v51  ;;  %884 = vmatpush3.bf16.msra.mxu1 %v949_v48  ;;  %v601_v1 = vpop.permute.xlu0 %600 }
  0x98   : > { %839 = vmatprep.subr.bf16.mxu0 %v969_v4  ;;  %885 = vmatprep.subr.bf16.mxu1 %v969_v4  ;;  %v607_v2 = vsel %vm210_vm1, %v1024_v16, %v601_v1 }
  0x99   : > { %v609_v5 = vsel %vm214_vm2, %v607_v2, %v604_v3 }
  0x9b   : > { %840 = vmatpush3.bf16.msra.mxu0 %v951_v52  ;;  %886 = vmatpush3.bf16.msra.mxu1 %v950_v51 }
  0x9c   : > { %841 = vmatprep.subr.bf16.mxu0 %v969_v4  ;;  %887 = vmatprep.subr.bf16.mxu1 %v969_v4 }
  0x9f   : > { %842 = vmatpush3.bf16.msra.mxu0 %v952_v53  ;;  %888 = vmatpush3.bf16.msra.mxu1 %v951_v52 }
  0xa0   : > { %843 = vmatprep.subr.bf16.mxu0 %v969_v4  ;;  %889 = vmatprep.subr.bf16.mxu1 %v969_v4 }
  0xa3   : > { %844 = vmatpush3.bf16.msra.mxu0 %v953_v55  ;;  %890 = vmatpush3.bf16.msra.mxu1 %v952_v53 }
  0xa4   : > { %849 = vmatprep.subr.bf16.mxu0 %v969_v4  ;;  %891 = vmatprep.subr.bf16.mxu1 %v969_v4 }
  0xa6   : > { %846 = vmatmul.mubr.msk.bf16.vlgmr.msra.gmra.mrb[0].mxu0 %vm278_vm3, %v216_v58 }
  0xa7   : > { %850 = vmatpush3.bf16.msra.mxu0 %v954_v59  ;;  %892 = vmatpush3.bf16.msra.mxu1 %v953_v55 }
  0xa8   : > { %851 = vmatprep.subr.bf16.mxu0 %v969_v4  ;;  %897 = vmatprep.subr.bf16.mxu1 %v969_v4 }
  0xa9   : > { %861 = vmatprep.mubr.msk.bf16.mxu0 %vm970_vm0, %v969_v4 }
  0xaa   : > { %894 = vmatmul.mubr.msk.bf16.vlgmr.msra.gmra.mrb[0].mxu1 %vm278_vm3, %v241_v45 }
  0xab   : > { %852 = vmatpush3.bf16.msra.mxu0 %v955_v60  ;;  %898 = vmatpush3.bf16.msra.mxu1 %v954_v59 }
  0xac   : > { %853 = vmatprep.subr.bf16.mxu0 %v969_v4  ;;  %899 = vmatprep.subr.bf16.mxu1 %v969_v4 }
  0xad   : > { %909 = vmatprep.mubr.msk.bf16.mxu1 %vm970_vm0, %v969_v4 }
  0xaf   : > { %854 = vmatpush3.bf16.msra.mxu0 %v956_v61  ;;  %900 = vmatpush3.bf16.msra.mxu1 %v955_v60 }
  0xb0   : > { %855 = vmatprep.subr.bf16.mxu0 %v969_v4  ;;  %901 = vmatprep.subr.bf16.mxu1 %v969_v4 }
  0xb3   : > { %856 = vmatpush3.bf16.msra.mxu0 %v957_v62  ;;  %902 = vmatpush3.bf16.msra.mxu1 %v956_v61 }
  0xb4   : > { %857 = vmatprep.subr.bf16.mxu0 %v969_v4  ;;  %903 = vmatprep.subr.bf16.mxu1 %v969_v4 }
  0xb7   : > { %858 = vmatpush3.bf16.msra.mxu0 %v958_v63  ;;  %904 = vmatpush3.bf16.msra.mxu1 %v957_v62 }
  0xb8   : > { %859 = vmatprep.subr.bf16.mxu0 %v969_v4  ;;  %905 = vmatprep.subr.bf16.mxu1 %v969_v4 }
  0xbb   : > { %860 = vmatpush3.bf16.msra.mxu0 %v959_v0  ;;  %906 = vmatpush3.bf16.msra.mxu1 %v958_v63 }
  0xbc   : > { %907 = vmatprep.subr.bf16.mxu1 %v969_v4 }
  0xbe   : > { %862 = vmatmul.mubr.msk.bf16.vlgmr.msra.gmra.mrb[0].mxu0 %vm278_vm3, %v1070_v50 }
  0xbf   : > { %908 = vmatpush3.bf16.msra.mxu1 %v959_v0 }
  0xc2   : > { %910 = vmatmul.mubr.msk.bf16.vlgmr.msra.gmra.mrb[0].mxu1 %vm278_vm3, %v609_v5 }
 0x191   : > { %v496_v6 = vpop.f32.mrb[0].mxu0 }
 0x192   : > { %504 = vst.msk [vmem:[%s143_s30] sm:$0x3] %vm503_vm4, %v496_v6  ;;  %v863_v4 = vpop.f32.mrb[1].mxu0 }
 0x193   : > { %v499_v7 = vpop.f32.mrb[2].mxu0 }
 0x194   : > { %v864_v8 = vpop.f32.mrb[3].mxu0 }
 0x195   : > { %v646_v9 = vpop.f32.mrb[0].mxu1 }
 0x196   : > { %770 = vst.msk [vmem:[%s143_s30 + $0x2] sm:$0x3] %vm503_vm4, %v646_v9  ;;  %v911_v10 = vpop.f32.mrb[1].mxu1 }
 0x197   : > { %v649_v11 = vpop.f32.mrb[2].mxu1 }
 0x198   : > { %v912_v12 = vpop.f32.mrb[3].mxu1 }
 0x199 PF: > { %s12_s9 = sadd.s32 1, %s966_s9  }
 0x19a   : > { %p9_p4 = scmp.ge.s32.totalorder %s12_s9, 4  }
 0x19c   :  { %11 = sbr.rel (!%p9_p4) target bundleno = 1 (0x1), region = 64 }

// kernel: densenet_forward.34
= control target key start
LH: loop header
LB: loop body
LE: loop exit
PB: predicated region body
PF: predicated region fallthrough
CT: control target
= control target key end

     0   :  { %v123_v0 = vmov 0.0   ;;  %vm124_vm0 = vmmov 0   ;;  %vm53_vm1 = vcmask 261120   ;;  %vm97_vm2 = vcmask 130048   ;;  %s168_s3 = inlined_call_operand.vmem [shape: bf16[32,16], index: 3, kind: input, shape index: {}]   ;;  %s169_s0 = inlined_call_operand.vmem [shape: f32[8,32], index: 0, kind: input, shape index: {}]   ;;  %s170_s1 = inlined_call_operand.vmem [shape: f32[1,32], index: 1, kind: input, shape index: {}]   ;;  %s171_s2 = inlined_call_operand.vmem [shape: f32[1,32], index: 2, kind: input, shape index: {}]   ;;  %s172_s4 = inlined_call_operand.vmem [shape: f32[8,16], index: 4, kind: output, shape index: {}]  }
   0x1   :  { %111 = vmatprep.subr.bf16.mxu0 %v123_v0  ;;  %v121_v1 = vld [vmem:[%s168_s3] sm:$0xff]   ;;  %115 = vmatprep.mubr.msk.bf16.mxu0 %vm124_vm0, %v123_v0  ;;  %v122_v2 = vld [vmem:[%s168_s3 + $0x8] sm:$0xff]  }
   0x2   :  { %112 = vmatpush3.bf16.msra.mxu0 %v121_v1  ;;  %v18_v3 = vld [vmem:[%s169_s0] sm:$0xff] }
   0x3   :  { %v103_v4 = vld [vmem:[%s170_s1] ss:$0 sm:$0xff]  ;;  %113 = vmatprep.subr.bf16.mxu0 %v123_v0 }
   0x4   :  { %v104_v5 = vld [vmem:[%s171_s2] ss:$0 sm:$0xff]  ;;  %v26_v6 = vmul.f32 %v103_v4, %v18_v3 }
   0x6   :  { %v34_v7 = vadd.f32 %v104_v5, %v26_v6  ;;  %114 = vmatpush3.bf16.msra.mxu0 %v122_v2 }
   0x8   :  { %v35_v8 = vmax.f32 %v34_v7, 0.0 }
   0xa   :  { %v36_v9 = vpack.c.bf16 %v35_v8, %v35_v8 }
   0xc   :  { %116 = vmatmul.mubr.msk.bf16.vlgmr.msra.gmra.mrb[0].mxu0 %vm53_vm1, %v36_v9 }
  0xdf   :  { %v91_v10 = vpop.f32.mrb[0].mxu0 }
  0xe0   :  { %98 = vst.msk [vmem:[%s172_s4] sm:$0xff] %vm97_vm2, %v91_v10  ;;  %v117_v11 = vpop.f32.mrb[1].mxu0 }
  0xe1   :  { %v94_v12 = vpop.f32.mrb[2].mxu0 }
  0xe2   :  { %v118_v13 = vpop.f32.mrb[3].mxu0 }

// kernel: densenet_forward.35
= control target key start
LH: loop header
LB: loop body
LE: loop exit
PB: predicated region body
PF: predicated region fallthrough
CT: control target
= control target key end

     0   :  { %v149_v0 = vmov 0.0   ;;  %vm150_vm0 = vmmov 0   ;;  %vm59_vm1 = vcmask 261120   ;;  %vm121_vm2 = vcmask 253952   ;;  %s210_s3 = inlined_call_operand.vmem [shape: bf16[32,32], index: 3, kind: input, shape index: {}]   ;;  %s211_s0 = inlined_call_operand.vmem [shape: f32[2,32], index: 0, kind: input, shape index: {}]   ;;  %s212_s1 = inlined_call_operand.vmem [shape: f32[1,32], index: 1, kind: input, shape index: {}]   ;;  %s213_s2 = inlined_call_operand.vmem [shape: f32[1,32], index: 2, kind: input, shape index: {}]   ;;  %s214_s4 = inlined_call_operand.vmem [shape: f32[1,32], index: 4, kind: input, shape index: {}]   ;;  %s215_s5 = inlined_call_operand.vmem [shape: f32[1,32], index: 5, kind: input, shape index: {}]   ;;  %s216_s6 = inlined_call_operand.vmem [shape: bf16[2,32], index: 6, kind: output, shape index: {}]  }
   0x1   :  { %137 = vmatprep.subr.bf16.mxu0 %v149_v0  ;;  %v147_v1 = vld [vmem:[%s210_s3] sm:$0xff]   ;;  %141 = vmatprep.mubr.msk.bf16.mxu0 %vm150_vm0, %v149_v0  ;;  %v148_v2 = vld [vmem:[%s210_s3 + $0x8] sm:$0xff]  }
   0x2   :  { %138 = vmatpush3.bf16.msra.mxu0 %v147_v1  ;;  %v24_v3 = vld [vmem:[%s211_s0] sm:$0x3] }
   0x3   :  { %v127_v4 = vld [vmem:[%s212_s1] ss:$0 sm:$0xff]  ;;  %139 = vmatprep.subr.bf16.mxu0 %v149_v0 }
   0x4   :  { %v128_v5 = vld [vmem:[%s213_s2] ss:$0 sm:$0xff]  ;;  %v32_v6 = vmul.f32 %v127_v4, %v24_v3 }
   0x5   :  { %v132_v10 = vld [vmem:[%s214_s4] ss:$0 sm:$0xff] }
   0x6   :  { %v40_v7 = vadd.f32 %v128_v5, %v32_v6  ;;  %140 = vmatpush3.bf16.msra.mxu0 %v148_v2  ;;  %v133_v12 = vld [vmem:[%s215_s5] ss:$0 sm:$0xff] }
   0x8   :  { %v41_v8 = vmax.f32 %v40_v7, 0.0 }
   0xa   :  { %v42_v9 = vpack.c.bf16 %v41_v8, %v41_v8 }
   0xc   :  { %142 = vmatmul.mubr.msk.bf16.vlgmr.msra.gmra.mrb[0].mxu0 %vm59_vm1, %v42_v9 }
  0xdf   :  { %v97_v11 = vpop.f32.mrb[0].mxu0 }
  0xe0   :  { %v110_v13 = vmul.f32 %v132_v10, %v97_v11  ;;  %v143_v14 = vpop.f32.mrb[1].mxu0 }
  0xe1   :  { %v100_v15 = vpop.f32.mrb[2].mxu0 }
  0xe2   :  { %v118_v16 = vadd.f32 %v133_v12, %v110_v13  ;;  %v144_v17 = vpop.f32.mrb[3].mxu0 }
  0xe4   :  { %v119_v18 = vmax.f32 %v118_v16, 0.0 }
  0xe6   :  { %v120_v19 = vpack.c.bf16 %v119_v18, %v119_v18 }
  0xe8   :  { %122 = vst.msk [vmem:[%s216_s6] sm:$0x1] %vm121_vm2, %v120_v19 }

// kernel: densenet_forward.36
= control target key start
LH: loop header
LB: loop body
LE: loop exit
PB: predicated region body
PF: predicated region fallthrough
CT: control target
= control target key end

     0   :  { %s723_s9 = smov 0   ;;  %s835_s0 = inlined_call_operand.vmem [shape: bf16[2,3,3,32], index: 0, kind: input, shape index: {}]   ;;  %s836_s1 = inlined_call_operand.vmem [shape: bf16[3,96,8], index: 1, kind: input, shape index: {}]   ;;  %s837_s2 = inlined_call_operand.vmem [shape: f32[2,1,1,8], index: 2, kind: output, shape index: {}]  }
   0x1 LB: > { %s534_s10 = sadd.s32 4294967295, %s701_s9   ;;  %p538_p0 = scmp.ge.s32.totalorder %s701_s9, 1  ;;  %s701_s9 = sphi %s723_s9, %s12_s9  }
   0x2   : > { %p112_p1 = scmp.lt.s32.totalorder %s701_s9, 3 }
   0x4   : > { %p113_p2 = pnand %p538_p0, %p112_p1 }
   0x5   : > { %p132_p3 = scmp.lt.s32.totalorder (!%p113_p2), %s534_s10, 1  ;;  %v188_v0 = vlaneseq (!%p113_p2)  ;;  %v677_v1 = vld [vmem:[%s836_s1] sm:$0xff] (!%p113_p2)   ;;  %v703_v2 = vmov (!%p113_p2), 1983009808   ;;  %v704_v4 = vmov (!%p113_p2), 0.0   ;;  %v678_v5 = vld [vmem:[%s836_s1 + $0x8] sm:$0xff] (!%p113_p2)  }
   0x6   : > { %116 = sbr.rel (%p113_p2) target bundleno = 381 (0x17d), region = 28  ;;  %v186_v3 = vunpack.c.l.s4 (!%p113_p2), %v703_v2  ;;  %626 = vmatprep.subr.bf16.mxu0 (!%p113_p2), %v704_v4  ;;  %610 = vmatprep.subr.bf16.mxu1 (!%p113_p2), %v704_v4  ;;  %v681_v9 = vld [vmem:[%s836_s1 + $0x30] sm:$0xff] (!%p113_p2)   ;;  %v683_v17 = vld [vmem:[%s836_s1 + $0x38] sm:$0xff] (!%p113_p2)   ;;  %vm705_vm0 = vmmov (!%p113_p2), 0   ;;  %v685_v21 = vld [vmem:[%s836_s1 + $0x40] sm:$0xff] (!%p113_p2)   ;;  %s706_s29 = smov (!%p113_p2), 32  }
   0x7   : > { %v189_v6 = vshrl.u32 (!%p113_p2), %v188_v0, 7  ;;  %627 = vmatpush3.bf16.msra.mxu0 (!%p113_p2), %v677_v1  ;;  %v679_v10 = vld [vmem:[%s836_s1 + $0x10] sm:$0xff] (!%p113_p2)   ;;  %611 = vmatpush3.bf16.msra.mxu1 (!%p113_p2), %v681_v9  ;;  %v680_v20 = vld [vmem:[%s836_s1 + $0x18] sm:$0xff] (!%p113_p2)   ;;  %v682_v24 = vld [vmem:[%s836_s1 + $0x20] sm:$0xff] (!%p113_p2)   ;;  %s707_s6 = smov (!%p113_p2), 64   ;;  %vm200_vm1 = vcmask (!%p113_p2), 261120  }
   0x8   : > { %v187_v7 = vunpack.c.0.s8 (!%p113_p2), %v186_v3  ;;  %628 = vmatprep.subr.bf16.mxu0 (!%p113_p2), %v704_v4  ;;  %612 = vmatprep.subr.bf16.mxu1 (!%p113_p2), %v704_v4  ;;  %v687_v25 = vld [vmem:[%s836_s1 + $0x48] sm:$0xff] (!%p113_p2)   ;;  %v689_v29 = vld [vmem:[%s836_s1 + $0x50] sm:$0xff] (!%p113_p2)   ;;  %v691_v30 = vld [vmem:[%s836_s1 + $0x58] sm:$0xff] (!%p113_p2)   ;;  %vm204_vm2 = vcmask (!%p113_p2), 523264   ;;  %vm264_vm3 = vcmask (!%p113_p2), 785408   ;;  %vm485_vm4 = vcmask (!%p113_p2), 57344  }
   0x9   : > { %638 = vmatprep.mubr.msk.bf16.mxu0 (!%p113_p2), %vm705_vm0, %v704_v4  ;;  %622 = vmatprep.mubr.msk.bf16.mxu1 (!%p113_p2), %vm705_vm0, %v704_v4  ;;  %v684_v28 = vld [vmem:[%s836_s1 + $0x28] sm:$0xff] (!%p113_p2)   ;;  %v686_v32 = vld [vmem:[%s836_s1 + $0x60] sm:$0xff] (!%p113_p2)   ;;  %v690_v41 = vld [vmem:[%s836_s1 + $0x70] sm:$0xff] (!%p113_p2)  }
   0xa   : > { %v190_v8 = vsub.s32 (!%p113_p2), %v187_v7, %v189_v6  ;;  %v688_v38 = vld [vmem:[%s836_s1 + $0x68] sm:$0xff] (!%p113_p2)   ;;  %v692_v42 = vld [vmem:[%s836_s1 + $0x78] sm:$0xff] (!%p113_p2)   ;;  %v693_v43 = vld [vmem:[%s836_s1 + $0x80] sm:$0xff] (!%p113_p2)  }
   0xb   : > { %629 = vmatpush3.bf16.msra.mxu0 (!%p113_p2), %v678_v5  ;;  %613 = vmatpush3.bf16.msra.mxu1 (!%p113_p2), %v683_v17  ;;  %v694_v45 = vld [vmem:[%s836_s1 + $0x88] sm:$0xff] (!%p113_p2)  }
   0xc   : > { %630 = vmatprep.subr.bf16.mxu0 (!%p113_p2), %v704_v4  ;;  %614 = vmatprep.subr.bf16.mxu1 (!%p113_p2), %v704_v4 }
   0xd   : > { %s839_s10 = smov (!%p132_p3, %s534_s10), 1 }
   0xe   : > { %s663_s15 = smul.u32 6, %s839_s10 }
   0xf   : > { %631 = vmatpush3.bf16.msra.mxu0 %v679_v10  ;;  %615 = vmatpush3.bf16.msra.mxu1 %v685_v21 }
  0x10   : > { %s136_s20 = scalar_lea.vmem %s835_s0, %s663_s15  ;;  %632 = vmatprep.subr.bf16.mxu0 %v704_v4  ;;  %616 = vmatprep.subr.bf16.mxu1 %v704_v4 }
  0x11   : > { %v179_v11 = vld [vmem:[%s136_s20] sm:$0x3]  ;;  %v564_v12 = vld [vmem:[%s136_s20 + $0x2] sm:$0x3]  ;;  %v752_v13 = vld [vmem:[%s136_s20 + $0x4] sm:$0x3] }
  0x12   : > { %v191_v14 = vrot.slane %v179_v11, %v190_v8  ;;  %v214_v15 = vrot.slane %v564_v12, %v190_v8  ;;  %v392_v16 = vrot.slane %v752_v13, %v190_v8 }
  0x13   : > { %633 = vmatpush3.bf16.msra.mxu0 %v680_v20  ;;  %617 = vmatpush3.bf16.msra.mxu1 %v687_v25 }
  0x14   : > { %v193_v18 = vshrl.u32 %v191_v14, 16  ;;  %v216_v19 = vshrl.u32 %v214_v15, 16  ;;  %v197_v22 = vrot.slane %v191_v14, 1  ;;  %v394_v23 = vshrl.u32 %v392_v16, 16  ;;  %634 = vmatprep.subr.bf16.mxu0 %v704_v4  ;;  %618 = vmatprep.subr.bf16.mxu1 %v704_v4 }
  0x15   : > { %v220_v26 = vrot.slane %v214_v15, 1  ;;  %v398_v27 = vrot.slane %v392_v16, 1 }
  0x16   : > { %195 = vrot.lane.b32.xlu0 %v193_v18, %s706_s29  ;;  %218 = vrot.lane.b32.xlu1 %v216_v19, %s706_s29 }
  0x17   : > { %635 = vmatpush3.bf16.msra.mxu0 %v682_v24  ;;  %619 = vmatpush3.bf16.msra.mxu1 %v689_v29 }
  0x18   : > { %636 = vmatprep.subr.bf16.mxu0 %v704_v4  ;;  %620 = vmatprep.subr.bf16.mxu1 %v704_v4 }
  0x1a   : > { %198 = vrot.lane.b32.xlu0 %v197_v22, %s707_s6  ;;  %396 = vrot.lane.b32.xlu1 %v394_v23, %s706_s29  ;;  %s139_s29 = scalar_lea.vmem %s837_s2, %s839_s10 }
  0x1b   : > { %637 = vmatpush3.bf16.msra.mxu0 %v684_v28  ;;  %621 = vmatpush3.bf16.msra.mxu1 %v691_v30 }
  0x1c   : > { %642 = vmatprep.subr.bf16.mxu0 %v704_v4 }
  0x1e   : > { %221 = vrot.lane.b32.xlu0 %v220_v26, %s707_s6  ;;  %399 = vrot.lane.b32.xlu1 %v398_v27, %s707_s6 }
  0x88   : > { %v196_v31 = vpop.permute.xlu0 %195  ;;  %v219_v33 = vpop.permute.xlu1 %218 }
  0x89   : > { %v203_v34 = vsel %vm200_vm1, %v179_v11, %v196_v31  ;;  %v225_v37 = vsel %vm200_vm1, %v564_v12, %v219_v33 }
  0x8c   : > { %v199_v35 = vpop.permute.xlu0 %198  ;;  %v397_v44 = vpop.permute.xlu1 %396 }
  0x8d   : > { %v206_v36 = vsel %vm204_vm2, %v203_v34, %v199_v35  ;;  %v403_v46 = vsel %vm200_vm1, %v752_v13, %v397_v44 }
  0x8e   : > { %639 = vmatmul.mubr.msk.bf16.vlgmr.msra.gmra.mrb[0].mxu0 %vm264_vm3, %v206_v36 }
  0x8f   : > { %643 = vmatpush3.bf16.msra.mxu0 %v686_v32  ;;  %654 = vmatprep.mubr.msk.bf16.mxu0 %vm705_vm0, %v704_v4 }
  0x90   : > { %644 = vmatprep.subr.bf16.mxu0 %v704_v4  ;;  %v222_v39 = vpop.permute.xlu0 %221  ;;  %v400_v47 = vpop.permute.xlu1 %399 }
  0x91   : > { %v227_v40 = vsel %vm204_vm2, %v225_v37, %v222_v39  ;;  %v405_v48 = vsel %vm204_vm2, %v403_v46, %v400_v47 }
  0x92   : > { %623 = vmatmul.mubr.msk.bf16.vlgmr.msra.gmra.mrb[0].mxu1 %vm264_vm3, %v227_v40 }
  0x93   : > { %645 = vmatpush3.bf16.msra.mxu0 %v688_v38 }
  0x94   : > { %646 = vmatprep.subr.bf16.mxu0 %v704_v4 }
  0x97   : > { %647 = vmatpush3.bf16.msra.mxu0 %v690_v41 }
  0x98   : > { %648 = vmatprep.subr.bf16.mxu0 %v704_v4 }
  0x9b   : > { %649 = vmatpush3.bf16.msra.mxu0 %v692_v42 }
  0x9c   : > { %650 = vmatprep.subr.bf16.mxu0 %v704_v4 }
  0x9f   : > { %651 = vmatpush3.bf16.msra.mxu0 %v693_v43 }
  0xa0   : > { %652 = vmatprep.subr.bf16.mxu0 %v704_v4 }
  0xa3   : > { %653 = vmatpush3.bf16.msra.mxu0 %v694_v45 }
  0xa6   : > { %655 = vmatmul.mubr.msk.bf16.vlgmr.msra.gmra.mrb[0].mxu0 %vm264_vm3, %v405_v48 }
 0x165   : > { %v301_v49 = vpop.f32.mrb[0].mxu1 }
 0x166   : > { %v624_v50 = vpop.f32.mrb[1].mxu1 }
 0x167   : > { %v304_v51 = vpop.f32.mrb[2].mxu1 }
 0x168   : > { %v625_v52 = vpop.f32.mrb[3].mxu1 }
 0x179   : > { %v478_v53 = vpop.f32.mrb[0].mxu0 }
 0x17a   : > { %v658_v54 = vadd.f32 %v478_v53, %v301_v49  ;;  %v656_v55 = vpop.f32.mrb[1].mxu0 }
 0x17b   : > { %v481_v56 = vpop.f32.mrb[2].mxu0 }
 0x17c   : > { %486 = vst.msk [vmem:[%s139_s29] sm:$0x1] %vm485_vm4, %v658_v54  ;;  %v657_v57 = vpop.f32.mrb[3].mxu0 }
 0x17d PF: > { %s12_s9 = sadd.s32 1, %s701_s9  }
 0x17e   : > { %p9_p4 = scmp.ge.s32.totalorder %s12_s9, 4  }
 0x180   :  { %11 = sbr.rel (!%p9_p4) target bundleno = 1 (0x1), region = 62 }

// kernel: densenet_forward.39
= control target key start
LH: loop header
LB: loop body
LE: loop exit
PB: predicated region body
PF: predicated region fallthrough
CT: control target
= control target key end

     0   :  { %vm32_vm0 = vcmask 254976   ;;  %s72_s0 = inlined_call_operand.vmem [shape: f32[2,32], index: 0, kind: input, shape index: {}]   ;;  %s73_s1 = inlined_call_operand.vmem [shape: f32[1,32], index: 1, kind: input, shape index: {}]   ;;  %s74_s2 = inlined_call_operand.vmem [shape: f32[1,32], index: 2, kind: input, shape index: {}]   ;;  %s75_s3 = inlined_call_operand.vmem [shape: f32[2,32], index: 3, kind: output, shape index: {}]  }
   0x1   :  { %v14_v0 = vld [vmem:[%s72_s0] sm:$0x3] }
   0x2   :  { %v38_v1 = vld [vmem:[%s73_s1] ss:$0 sm:$0xff] }
   0x3   :  { %v39_v2 = vld [vmem:[%s74_s2] ss:$0 sm:$0xff]  ;;  %v22_v3 = vmul.f32 %v38_v1, %v14_v0 }
   0x5   :  { %v30_v4 = vadd.f32 %v39_v2, %v22_v3 }
   0x7   :  { %v31_v5 = vmax.f32 %v30_v4, 0.0 }
   0x9   :  { %33 = vst.msk [vmem:[%s75_s3] sm:$0x3] %vm32_vm0, %v31_v5 }

</bundles_post_ra>
